<compile_context>
chip_gen: v7x
topology: tpu7x:2x2x1
jax: 0.10.0
libtpu: 0.0.40
codegen_flags: <defaults>
</compile_context>

<pallas_src>
import functools
import math

import jax
import jax.numpy as jnp
from jax.experimental import pallas as pl
from jax.experimental.pallas import tpu as pltpu


def _round_up(n: int, m: int) -> int:
    return ((n + m - 1) // m) * m


def multi_attn_kernel(q_ref, k_ref, wq_ref, wk_ref, bq_ref, bk_ref, o_ref,
                      kc_ref, *, d_model: int, n_views: int, lk_valid: int):
    """One grid step = (batch element b, Lq tile i); all views handled here."""
    mp = wq_ref.shape[1] // n_views          # padded per-view d_model (Mp)
    lkp = kc_ref.shape[0]
    scale = 1.0 / math.sqrt(float(d_model))  # scale uses the *true* d_model

    # --- K-projection cache: computed once per batch element (first Lq tile)
    # and carried across all Lq tiles in VMEM scratch ("arbitrary" Lq axis).
    @pl.when(pl.program_id(1) == 0)
    def _():
        kc_ref[...] = (jnp.dot(k_ref[0], wk_ref[...],
                               preferred_element_type=jnp.float32)
                       + bk_ref[...])        # (Lkp, V*Mp)

    # --- Fused Q projection for ALL views: one wide (TQ,Dp)x(Dp,V*Mp) matmul
    # instead of V narrow 128-wide ones (fills the 256-wide MXU on v6e/v7x).
    q_all = (jnp.dot(q_ref[0], wq_ref[...], preferred_element_type=jnp.float32)
             + bq_ref[...])                  # (TQ, V*Mp)

    # Column-validity mask for Lk padding (trace-time constant shape).
    need_mask = lk_valid < lkp
    if need_mask:
        col = jax.lax.broadcasted_iota(jnp.int32, (1, lkp), 1)
        col_valid = col < lk_valid           # (1, Lkp), broadcasts over rows

    # V is small and static -> unrolled Python loop.
    for v in range(n_views):
        qv = q_all[:, v * mp:(v + 1) * mp]   # (TQ,  Mp) 128-aligned slice
        kv = kc_ref[:, v * mp:(v + 1) * mp]  # (Lkp, Mp) from the K cache

        # NT-form scores: contract the d_model axes, no explicit K transpose.
        scores = jax.lax.dot_general(
            qv, kv,
            dimension_numbers=(((1,), (1,)), ((), ())),
            preferred_element_type=jnp.float32) * scale          # (TQ, Lkp)

        if need_mask:
            scores = jnp.where(col_valid, scores, jnp.float32(-1e30))

        # Numerically stable softmax; scaled result goes straight to o_ref
        # (no separate `attn` temporary).
        e = jnp.exp(scores - jnp.max(scores, axis=-1, keepdims=True))
        inv = pl.reciprocal(jnp.sum(e, axis=-1, keepdims=True), approx=False)
        o_ref[v, 0] = (e * inv).astype(o_ref.dtype)


def _build_call(n_views, B, Lqp, Lkp, TQ, Dp, VMp, d_model, lk_valid,
                single_buffer_weights):
    kernel = functools.partial(multi_attn_kernel, d_model=d_model,
                               n_views=n_views, lk_valid=lk_valid)

    def const_spec(shape):
        if single_buffer_weights:
            # Constant-index operands are DMA'd once; drop the dead 2nd buffer.
            return pl.BlockSpec(shape, lambda b, i: (0, 0),
                                pipeline_mode=pl.Buffered(1))
        return pl.BlockSpec(shape, lambda b, i: (0, 0))

    grid = (B, Lqp // TQ)

    # Explicit VMEM budget (2x headroom), clamped to a range valid on v5e/v6e
    # (128 MiB physical, 16/32 MiB scoped default) and v7x (64 MiB physical).
    wb = 1 if single_buffer_weights else 2
    vmem_est = 4 * (
        2 * TQ * Dp                      # query block (double-buffered)
        + 2 * Lkp * Dp                   # key block (double-buffered)
        + wb * 2 * Dp * VMp              # Wq_all + Wk_all
        + wb * 2 * VMp                   # bq_all + bk_all
        + 2 * n_views * TQ * Lkp         # output block (double-buffered)
        + Lkp * VMp                      # K-projection cache scratch
        + TQ * VMp                       # Q_all temporary
        + 3 * TQ * Lkp)                  # scores / exp temporaries headroom
    vmem_limit = int(min(max(2 * vmem_est, 32 * 1024 * 1024),
                         64 * 1024 * 1024))

    # K projection counted once per batch element (it is cached), Q projection
    # once per Lq tile, scores once per (tile, view).
    flops = 2 * B * (Lqp * Dp * VMp + Lkp * Dp * VMp + Lqp * Lkp * VMp)
    in_bytes = 4 * (B * Lqp * Dp + B * Lkp * Dp + 2 * Dp * VMp + 2 * VMp)
    out_bytes = 4 * n_views * B * Lqp * Lkp

    return pl.pallas_call(
        kernel,
        out_shape=jax.ShapeDtypeStruct((n_views, B, Lqp, Lkp), jnp.float32),
        grid_spec=pltpu.PrefetchScalarGridSpec(
            num_scalar_prefetch=0,
            grid=grid,
            in_specs=[
                # Activations: indexed by batch / Lq-tile only.
                pl.BlockSpec((1, TQ, Dp), lambda b, i: (b, i, 0)),    # query
                pl.BlockSpec((1, Lkp, Dp), lambda b, i: (b, 0, 0)),   # key
                # Fused weights/biases: fully resident across the whole grid.
                const_spec((Dp, VMp)),                                # Wq_all
                const_spec((Dp, VMp)),                                # Wk_all
                const_spec((1, VMp)),                                 # bq_all
                const_spec((1, VMp)),                                 # bk_all
            ],
            out_specs=pl.BlockSpec((n_views, 1, TQ, Lkp),
                                   lambda b, i: (0, b, i, 0)),
            scratch_shapes=[pltpu.VMEM((Lkp, VMp), jnp.float32)],
        ),
        compiler_params=pltpu.CompilerParams(
            # Batch axis "parallel" (what v7x's 2 TCs split); the Lq axis must
            # be "arbitrary" because the K cache carries across its tiles.
            dimension_semantics=("parallel", "arbitrary"),
            vmem_limit_bytes=vmem_limit),
        cost_estimate=pl.CostEstimate(
            flops=flops,
            transcendentals=n_views * B * Lqp * Lkp,
            bytes_accessed=in_bytes + out_bytes),
    )


def multi_attn(query, key, wq, wk, bq, bk, *, tq=128, use_bf16=False):
    """query/key: (B, L, D_in); wq/wk: (V, D_in, M); bq/bk: (V, 1, M).
    Returns attention probabilities of shape (V, B, Lq, Lk) in float32."""
    n_views, d_in, d_model = wq.shape
    B, Lq, _ = query.shape
    Lk = key.shape[1]

    # Lane/sublane/MXU-friendly padded sizes.  tq defaults to 128 so the
    # double-buffered output block also fits comfortably on v7x (64 MiB VMEM).
    Dp = _round_up(d_in, 128)
    Mp = _round_up(d_model, 128)
    Lkp = _round_up(Lk, 128)
    TQ = min(tq, _round_up(Lq, 128))
    Lqp = _round_up(Lq, TQ)
    VMp = n_views * Mp

    def pad_to(x, shape):
        if x.shape == tuple(shape):
            return x                      # already aligned: no HBM round trip
        return jnp.pad(x, [(0, t - s) for s, t in zip(x.shape, shape)])

    qp = pad_to(query, (B, Lqp, Dp))
    kp = pad_to(key, (B, Lkp, Dp))
    # Per-view weights padded then fused along lanes: (V, D_in, M) ->
    # (Dp, V*Mp) so one wide matmul projects every view at once; the per-view
    # column blocks sit on 128-lane boundaries, so in-kernel slices are free.
    wq_all = jnp.transpose(pad_to(wq, (n_views, Dp, Mp)), (1, 0, 2)).reshape(Dp, VMp)
    wk_all = jnp.transpose(pad_to(wk, (n_views, Dp, Mp)), (1, 0, 2)).reshape(Dp, VMp)
    bq_all = pad_to(bq, (n_views, 1, Mp)).reshape(1, VMp)
    bk_all = pad_to(bk, (n_views, 1, Mp)).reshape(1, VMp)

    if use_bf16:
        # Optional bf16 matmul operands for v6e/v7x MXUs (accumulation stays
        # f32).  Off by default so the 1e-5 probability tolerance holds.
        qp, kp = qp.astype(jnp.bfloat16), kp.astype(jnp.bfloat16)
        wq_all, wk_all = wq_all.astype(jnp.bfloat16), wk_all.astype(jnp.bfloat16)

    args = (qp, kp, wq_all, wk_all, bq_all, bk_all)
    try:
        out = _build_call(n_views, B, Lqp, Lkp, TQ, Dp, VMp, d_model, Lk,
                          single_buffer_weights=True)(*args)
    except Exception:
        # pipeline_mode=pl.Buffered(1) not accepted on this jax build: fall
        # back to default double-buffered weight blocks (identical semantics).
        out = _build_call(n_views, B, Lqp, Lkp, TQ, Dp, VMp, d_model, Lk,
                          single_buffer_weights=False)(*args)

    if Lqp != Lq or Lkp != Lk:
        # TODO(synk): at production sizes return the padded block and slice
        # lazily in the consumer to avoid this extra HBM round trip.
        out = out[:, :, :Lq, :Lk]
    return out


def multi_attn_reference(query, key, wq, wk, bq, bk):
    d_model = wq.shape[-1]
    Q = jnp.einsum("bld,vdm->vblm", query, wq) + bq[:, None, :, :]
    K = jnp.einsum("bkd,vdm->vbkm", key, wk) + bk[:, None, :, :]
    scores = jnp.einsum("vblm,vbkm->vblk", Q, K) / math.sqrt(d_model)
    return jax.nn.softmax(scores, axis=-1)


if __name__ == "__main__":
    # Small shapes consistent with the module.
    B, L, D_IN, D_MODEL, N_VIEWS = 2, 8, 16, 32, 3

    key0 = jax.random.PRNGKey(0)
    k_q, k_k, k_v, k_wq, k_wk, k_bq, k_bk = jax.random.split(key0, 7)

    query = jax.random.normal(k_q, (B, L, D_IN), dtype=jnp.float32)
    key_in = jax.random.normal(k_k, (B, L, D_IN), dtype=jnp.float32)
    value = jax.random.normal(k_v, (B, L, D_IN), dtype=jnp.float32)  # dead code

    # Deterministic parameter init (nn.Linear-like uniform bound 1/sqrt(D_IN)).
    bound = 1.0 / math.sqrt(D_IN)
    wq = jax.random.uniform(k_wq, (N_VIEWS, D_IN, D_MODEL), jnp.float32, -bound, bound)
    wk = jax.random.uniform(k_wk, (N_VIEWS, D_IN, D_MODEL), jnp.float32, -bound, bound)
    bq = jax.random.uniform(k_bq, (N_VIEWS, 1, D_MODEL), jnp.float32, -bound, bound)
    bk = jax.random.uniform(k_bk, (N_VIEWS, 1, D_MODEL), jnp.float32, -bound, bound)

    out = multi_attn(query, key_in, wq, wk, bq, bk)
    out = jax.block_until_ready(out)

    ref = multi_attn_reference(query, key_in, wq, wk, bq, bk)
    assert out.shape == (N_VIEWS, B, L, L), out.shape
    assert jnp.allclose(out, ref, atol=1e-5, rtol=1e-5), "mismatch vs reference"
    # Softmax rows sum to 1 (padding is masked out before the softmax).
    assert jnp.allclose(jnp.sum(out, axis=-1), 1.0, atol=1e-5)

    print("KERNEL_OK")
</pallas_src>

<mosaic_0001>
module attributes {stable_mosaic.version = 11 : i64} {
  func.func @multi_attn_kernel(%arg0: i32, %arg1: i32, %arg2: memref<1x128x128xf32, #tpu.memory_space<vmem>>, %arg3: memref<1x128x128xf32, #tpu.memory_space<vmem>>, %arg4: memref<128x384xf32, #tpu.memory_space<vmem>>, %arg5: memref<128x384xf32, #tpu.memory_space<vmem>>, %arg6: memref<1x384xf32, #tpu.memory_space<vmem>>, %arg7: memref<1x384xf32, #tpu.memory_space<vmem>>, %arg8: memref<3x1x128x128xf32, #tpu.memory_space<vmem>>, %arg9: memref<128x384xf32, #tpu.memory_space<vmem>>) attributes {dimension_semantics = [#tpu.dimension_semantics<parallel>, #tpu.dimension_semantics<arbitrary>], iteration_bounds = array<i64: 2, 1>, scalar_prefetch = 0 : i64, scratch_operands = 1 : i64, tpu.core_type = #tpu.core_type<tc>, window_params = [{transform_indices = @transform_0, window_bounds = array<i64: 1, 128, 128>}, {transform_indices = @transform_1, window_bounds = array<i64: 1, 128, 128>}, {pipeline_mode = #tpu.pipeline_mode<synchronous>, transform_indices = @transform_2, window_bounds = array<i64: 128, 384>}, {pipeline_mode = #tpu.pipeline_mode<synchronous>, transform_indices = @transform_3, window_bounds = array<i64: 128, 384>}, {pipeline_mode = #tpu.pipeline_mode<synchronous>, transform_indices = @transform_4, window_bounds = array<i64: 1, 384>}, {pipeline_mode = #tpu.pipeline_mode<synchronous>, transform_indices = @transform_5, window_bounds = array<i64: 1, 384>}, {transform_indices = @transform_6, window_bounds = array<i64: 3, 1, 128, 128>}]} {
    %c0_i32 = arith.constant 0 : i32
    %0 = arith.cmpi eq, %arg1, %c0_i32 : i32
    %1 = arith.extui %0 : i1 to i32
    %c0_i32_0 = arith.constant 0 : i32
    %2 = arith.cmpi ne, %1, %c0_i32_0 : i32
    scf.if %2 {
      %c0_36 = arith.constant 0 : index
      %c0_37 = arith.constant 0 : index
      %c0_38 = arith.constant 0 : index
      %79 = vector.load %arg3[%c0_36, %c0_37, %c0_38] : memref<1x128x128xf32, #tpu.memory_space<vmem>>, vector<1x128x128xf32>
      %80 = vector.shape_cast %79 : vector<1x128x128xf32> to vector<128x128xf32>
      %c0_39 = arith.constant 0 : index
      %c0_40 = arith.constant 0 : index
      %81 = vector.load %arg5[%c0_39, %c0_40] : memref<128x384xf32, #tpu.memory_space<vmem>>, vector<128x384xf32>
      %cst_41 = arith.constant dense<0.000000e+00> : vector<128x384xf32>
      %82 = tpu.matmul %80, %81, %cst_41 {dimension_numbers = #tpu.dot_dimension_numbers<[1], [0], [0], [1], [0, 0, 1, 1], [], []>} : vector<128x128xf32>, vector<128x384xf32>, vector<128x384xf32> -> vector<128x384xf32>
      %c0_42 = arith.constant 0 : index
      %c0_43 = arith.constant 0 : index
      %83 = vector.load %arg7[%c0_42, %c0_43] : memref<1x384xf32, #tpu.memory_space<vmem>>, vector<1x384xf32>
      %84 = vector.broadcast %83 : vector<1x384xf32> to vector<128x384xf32>
      %85 = arith.addf %82, %84 : vector<128x384xf32>
      %c0_44 = arith.constant 0 : index
      %c0_45 = arith.constant 0 : index
      %86 = vector.load %arg9[%c0_44, %c0_45] : memref<128x384xf32, #tpu.memory_space<vmem>>, vector<128x384xf32>
      tpu.vector_store %arg9[%c0_44, %c0_45], %85 {strides = array<i32>} : memref<128x384xf32, #tpu.memory_space<vmem>>, vector<128x384xf32>,
    } else {
    }
    %c0 = arith.constant 0 : index
    %c0_1 = arith.constant 0 : index
    %c0_2 = arith.constant 0 : index
    %3 = vector.load %arg2[%c0, %c0_1, %c0_2] : memref<1x128x128xf32, #tpu.memory_space<vmem>>, vector<1x128x128xf32>
    %4 = vector.shape_cast %3 : vector<1x128x128xf32> to vector<128x128xf32>
    %c0_3 = arith.constant 0 : index
    %c0_4 = arith.constant 0 : index
    %5 = vector.load %arg4[%c0_3, %c0_4] : memref<128x384xf32, #tpu.memory_space<vmem>>, vector<128x384xf32>
    %cst = arith.constant dense<0.000000e+00> : vector<128x384xf32>
    %6 = tpu.matmul %4, %5, %cst {dimension_numbers = #tpu.dot_dimension_numbers<[1], [0], [0], [1], [0, 0, 1, 1], [], []>} : vector<128x128xf32>, vector<128x384xf32>, vector<128x384xf32> -> vector<128x384xf32>
    %c0_5 = arith.constant 0 : index
    %c0_6 = arith.constant 0 : index
    %7 = vector.load %arg6[%c0_5, %c0_6] : memref<1x384xf32, #tpu.memory_space<vmem>>, vector<1x384xf32>
    %8 = vector.broadcast %7 : vector<1x384xf32> to vector<128x384xf32>
    %9 = arith.addf %6, %8 : vector<128x384xf32>
    %10 = tpu.iota {dimensions = array<i32: 1>} : vector<1x128xi32>
    %c8_i32 = arith.constant 8 : i32
    %11 = vector.broadcast %c8_i32 : i32 to vector<1x128xi32>
    %12 = arith.cmpi slt, %10, %11 : vector<1x128xi32>
    %13 = vector.extract_strided_slice %9 {offsets = [0, 0], sizes = [128, 128], strides = [1, 1]} : vector<128x384xf32> to vector<128x128xf32>
    %c0_7 = arith.constant 0 : index
    %c0_8 = arith.constant 0 : index
    %14 = vector.load %arg9[%c0_7, %c0_8] : memref<128x384xf32, #tpu.memory_space<vmem>>, vector<128x128xf32>
    %cst_9 = arith.constant dense<0.000000e+00> : vector<128x128xf32>
    %15 = tpu.matmul %13, %14, %cst_9 {dimension_numbers = #tpu.dot_dimension_numbers<[1], [1], [0], [0], [0, 0, 1, 0], [], []>} : vector<128x128xf32>, vector<128x128xf32>, vector<128x128xf32> -> vector<128x128xf32>
    %cst_10 = arith.constant 0.176776692 : f32
    %16 = vector.broadcast %cst_10 : f32 to vector<128x128xf32>
    %17 = arith.mulf %15, %16 : vector<128x128xf32>
    %cst_11 = arith.constant -1.000000e+30 : f32
    %18 = vector.shape_cast %12 : vector<1x128xi1> to vector<1x128xi1>
    %19 = vector.broadcast %18 : vector<1x128xi1> to vector<128x128xi1>
    %20 = vector.broadcast %cst_11 : f32 to vector<128x128xf32>
    %21 = arith.select %19, %17, %20 : vector<128x128xi1>, vector<128x128xf32>
    %cst_12 = arith.constant dense<0xFF800000> : vector<128xf32>
    %22 = vector.multi_reduction <maximumf>, %21, %cst_12 [1] : vector<128x128xf32> to vector<128xf32>
    %23 = vector.shape_cast %22 : vector<128xf32> to vector<128x1xf32>
    %24 = vector.broadcast %23 : vector<128x1xf32> to vector<128x128xf32>
    %25 = arith.subf %21, %24 : vector<128x128xf32>
    %26 = math.exp %25 : vector<128x128xf32>
    %cst_13 = arith.constant dense<0.000000e+00> : vector<128xf32>
    %27 = vector.multi_reduction <add>, %26, %cst_13 [1] : vector<128x128xf32> to vector<128xf32>
    %28 = vector.shape_cast %27 : vector<128xf32> to vector<128x1xf32>
    %29 = tpu.reciprocal %28 : vector<128x1xf32> -> vector<128x1xf32>
    %30 = vector.broadcast %29 : vector<128x1xf32> to vector<128x128xf32>
    %31 = arith.mulf %26, %30 : vector<128x128xf32>
    %c0_14 = arith.constant 0 : index
    %c0_15 = arith.constant 0 : index
    %c0_16 = arith.constant 0 : index
    %c0_17 = arith.constant 0 : index
    %32 = vector.load %arg8[%c0_14, %c0_15, %c0_16, %c0_17] : memref<3x1x128x128xf32, #tpu.memory_space<vmem>>, vector<1x1x128x128xf32>
    %33 = vector.shape_cast %32 : vector<1x1x128x128xf32> to vector<128x128xf32>
    %34 = vector.shape_cast %31 : vector<128x128xf32> to vector<1x1x128x128xf32>
    tpu.vector_store %arg8[%c0_14, %c0_15, %c0_16, %c0_17], %34 {strides = array<i32>} : memref<3x1x128x128xf32, #tpu.memory_space<vmem>>, vector<1x1x128x128xf32>,
    %35 = vector.extract_strided_slice %9 {offsets = [0, 128], sizes = [128, 128], strides = [1, 1]} : vector<128x384xf32> to vector<128x128xf32>
    %c0_18 = arith.constant 0 : index
    %c128 = arith.constant 128 : index
    %36 = vector.load %arg9[%c0_18, %c128] : memref<128x384xf32, #tpu.memory_space<vmem>>, vector<128x128xf32>
    %cst_19 = arith.constant dense<0.000000e+00> : vector<128x128xf32>
    %37 = tpu.matmul %35, %36, %cst_19 {dimension_numbers = #tpu.dot_dimension_numbers<[1], [1], [0], [0], [0, 0, 1, 0], [], []>} : vector<128x128xf32>, vector<128x128xf32>, vector<128x128xf32> -> vector<128x128xf32>
    %cst_20 = arith.constant 0.176776692 : f32
    %38 = vector.broadcast %cst_20 : f32 to vector<128x128xf32>
    %39 = arith.mulf %37, %38 : vector<128x128xf32>
    %cst_21 = arith.constant -1.000000e+30 : f32
    %40 = vector.shape_cast %12 : vector<1x128xi1> to vector<1x128xi1>
    %41 = vector.broadcast %40 : vector<1x128xi1> to vector<128x128xi1>
    %42 = vector.broadcast %cst_21 : f32 to vector<128x128xf32>
    %43 = arith.select %41, %39, %42 : vector<128x128xi1>, vector<128x128xf32>
    %cst_22 = arith.constant dense<0xFF800000> : vector<128xf32>
    %44 = vector.multi_reduction <maximumf>, %43, %cst_22 [1] : vector<128x128xf32> to vector<128xf32>
    %45 = vector.shape_cast %44 : vector<128xf32> to vector<128x1xf32>
    %46 = vector.broadcast %45 : vector<128x1xf32> to vector<128x128xf32>
    %47 = arith.subf %43, %46 : vector<128x128xf32>
    %48 = math.exp %47 : vector<128x128xf32>
    %cst_23 = arith.constant dense<0.000000e+00> : vector<128xf32>
    %49 = vector.multi_reduction <add>, %48, %cst_23 [1] : vector<128x128xf32> to vector<128xf32>
    %50 = vector.shape_cast %49 : vector<128xf32> to vector<128x1xf32>
    %51 = tpu.reciprocal %50 : vector<128x1xf32> -> vector<128x1xf32>
    %52 = vector.broadcast %51 : vector<128x1xf32> to vector<128x128xf32>
    %53 = arith.mulf %48, %52 : vector<128x128xf32>
    %c1 = arith.constant 1 : index
    %c0_24 = arith.constant 0 : index
    %c0_25 = arith.constant 0 : index
    %c0_26 = arith.constant 0 : index
    %54 = vector.load %arg8[%c1, %c0_24, %c0_25, %c0_26] : memref<3x1x128x128xf32, #tpu.memory_space<vmem>>, vector<1x1x128x128xf32>
    %55 = vector.shape_cast %54 : vector<1x1x128x128xf32> to vector<128x128xf32>
    %56 = vector.shape_cast %53 : vector<128x128xf32> to vector<1x1x128x128xf32>
    tpu.vector_store %arg8[%c1, %c0_24, %c0_25, %c0_26], %56 {strides = array<i32>} : memref<3x1x128x128xf32, #tpu.memory_space<vmem>>, vector<1x1x128x128xf32>,
    %57 = vector.extract_strided_slice %9 {offsets = [0, 256], sizes = [128, 128], strides = [1, 1]} : vector<128x384xf32> to vector<128x128xf32>
    %c0_27 = arith.constant 0 : index
    %c256 = arith.constant 256 : index
    %58 = vector.load %arg9[%c0_27, %c256] : memref<128x384xf32, #tpu.memory_space<vmem>>, vector<128x128xf32>
    %cst_28 = arith.constant dense<0.000000e+00> : vector<128x128xf32>
    %59 = tpu.matmul %57, %58, %cst_28 {dimension_numbers = #tpu.dot_dimension_numbers<[1], [1], [0], [0], [0, 0, 1, 0], [], []>} : vector<128x128xf32>, vector<128x128xf32>, vector<128x128xf32> -> vector<128x128xf32>
    %cst_29 = arith.constant 0.176776692 : f32
    %60 = vector.broadcast %cst_29 : f32 to vector<128x128xf32>
    %61 = arith.mulf %59, %60 : vector<128x128xf32>
    %cst_30 = arith.constant -1.000000e+30 : f32
    %62 = vector.shape_cast %12 : vector<1x128xi1> to vector<1x128xi1>
    %63 = vector.broadcast %62 : vector<1x128xi1> to vector<128x128xi1>
    %64 = vector.broadcast %cst_30 : f32 to vector<128x128xf32>
    %65 = arith.select %63, %61, %64 : vector<128x128xi1>, vector<128x128xf32>
    %cst_31 = arith.constant dense<0xFF800000> : vector<128xf32>
    %66 = vector.multi_reduction <maximumf>, %65, %cst_31 [1] : vector<128x128xf32> to vector<128xf32>
    %67 = vector.shape_cast %66 : vector<128xf32> to vector<128x1xf32>
    %68 = vector.broadcast %67 : vector<128x1xf32> to vector<128x128xf32>
    %69 = arith.subf %65, %68 : vector<128x128xf32>
    %70 = math.exp %69 : vector<128x128xf32>
    %cst_32 = arith.constant dense<0.000000e+00> : vector<128xf32>
    %71 = vector.multi_reduction <add>, %70, %cst_32 [1] : vector<128x128xf32> to vector<128xf32>
    %72 = vector.shape_cast %71 : vector<128xf32> to vector<128x1xf32>
    %73 = tpu.reciprocal %72 : vector<128x1xf32> -> vector<128x1xf32>
    %74 = vector.broadcast %73 : vector<128x1xf32> to vector<128x128xf32>
    %75 = arith.mulf %70, %74 : vector<128x128xf32>
    %c2 = arith.constant 2 : index
    %c0_33 = arith.constant 0 : index
    %c0_34 = arith.constant 0 : index
    %c0_35 = arith.constant 0 : index
    %76 = vector.load %arg8[%c2, %c0_33, %c0_34, %c0_35] : memref<3x1x128x128xf32, #tpu.memory_space<vmem>>, vector<1x1x128x128xf32>
    %77 = vector.shape_cast %76 : vector<1x1x128x128xf32> to vector<128x128xf32>
    %78 = vector.shape_cast %75 : vector<128x128xf32> to vector<1x1x128x128xf32>
    tpu.vector_store %arg8[%c2, %c0_33, %c0_34, %c0_35], %78 {strides = array<i32>} : memref<3x1x128x128xf32, #tpu.memory_space<vmem>>, vector<1x1x128x128xf32>,
    return
  }
  func.func @transform_0(%arg0: i32, %arg1: i32) -> (i32, i32, i32) {
    %c0_i32 = arith.constant 0 : i32
    %c0_i32_0 = arith.constant 0 : i32
    return %arg0, %arg1, %c0_i32 : i32, i32, i32
  }
  func.func @transform_1(%arg0: i32, %arg1: i32) -> (i32, i32, i32) {
    %c0_i32 = arith.constant 0 : i32
    %c0_i32_0 = arith.constant 0 : i32
    %c0_i32_1 = arith.constant 0 : i32
    return %arg0, %c0_i32, %c0_i32_0 : i32, i32, i32
  }
  func.func @transform_2(%arg0: i32, %arg1: i32) -> (i32, i32) {
    %c0_i32 = arith.constant 0 : i32
    %c0_i32_0 = arith.constant 0 : i32
    %c0_i32_1 = arith.constant 0 : i32
    return %c0_i32, %c0_i32_0 : i32, i32
  }
  func.func @transform_3(%arg0: i32, %arg1: i32) -> (i32, i32) {
    %c0_i32 = arith.constant 0 : i32
    %c0_i32_0 = arith.constant 0 : i32
    %c0_i32_1 = arith.constant 0 : i32
    return %c0_i32, %c0_i32_0 : i32, i32
  }
  func.func @transform_4(%arg0: i32, %arg1: i32) -> (i32, i32) {
    %c0_i32 = arith.constant 0 : i32
    %c0_i32_0 = arith.constant 0 : i32
    %c0_i32_1 = arith.constant 0 : i32
    return %c0_i32, %c0_i32_0 : i32, i32
  }
  func.func @transform_5(%arg0: i32, %arg1: i32) -> (i32, i32) {
    %c0_i32 = arith.constant 0 : i32
    %c0_i32_0 = arith.constant 0 : i32
    %c0_i32_1 = arith.constant 0 : i32
    return %c0_i32, %c0_i32_0 : i32, i32
  }
  func.func @transform_6(%arg0: i32, %arg1: i32) -> (i32, i32, i32, i32) {
    %c0_i32 = arith.constant 0 : i32
    %c0_i32_0 = arith.constant 0 : i32
    %c0_i32_1 = arith.constant 0 : i32
    return %c0_i32, %arg0, %arg1, %c0_i32_0 : i32, i32, i32, i32
  }
}

module attributes {stable_mosaic.version = 11 : i64} {
  func.func @multi_attn_kernel(%arg0: i32, %arg1: i32, %arg2: memref<1x128x128xf32, #tpu.memory_space<vmem>>, %arg3: memref<1x128x128xf32, #tpu.memory_space<vmem>>, %arg4: memref<128x384xf32, #tpu.memory_space<vmem>>, %arg5: memref<128x384xf32, #tpu.memory_space<vmem>>, %arg6: memref<1x384xf32, #tpu.memory_space<vmem>>, %arg7: memref<1x384xf32, #tpu.memory_space<vmem>>, %arg8: memref<3x1x128x128xf32, #tpu.memory_space<vmem>>, %arg9: memref<128x384xf32, #tpu.memory_space<vmem>>) attributes {dimension_semantics = [#tpu.dimension_semantics<parallel>, #tpu.dimension_semantics<arbitrary>], iteration_bounds = array<i64: 2, 1>, scalar_prefetch = 0 : i64, scratch_operands = 1 : i64, tpu.core_type = #tpu.core_type<tc>, window_params = [{transform_indices = @transform_0, window_bounds = array<i64: 1, 128, 128>}, {transform_indices = @transform_1, window_bounds = array<i64: 1, 128, 128>}, {pipeline_mode = #tpu.pipeline_mode<synchronous>, transform_indices = @transform_2, window_bounds = array<i64: 128, 384>}, {pipeline_mode = #tpu.pipeline_mode<synchronous>, transform_indices = @transform_3, window_bounds = array<i64: 128, 384>}, {pipeline_mode = #tpu.pipeline_mode<synchronous>, transform_indices = @transform_4, window_bounds = array<i64: 1, 384>}, {pipeline_mode = #tpu.pipeline_mode<synchronous>, transform_indices = @transform_5, window_bounds = array<i64: 1, 384>}, {transform_indices = @transform_6, window_bounds = array<i64: 3, 1, 128, 128>}]} {
    %c0_i32 = arith.constant 0 : i32
    %0 = arith.cmpi eq, %arg1, %c0_i32 : i32
    %1 = arith.extui %0 : i1 to i32
    %c0_i32_0 = arith.constant 0 : i32
    %2 = arith.cmpi ne, %1, %c0_i32_0 : i32
    scf.if %2 {
      %c0_36 = arith.constant 0 : index
      %c0_37 = arith.constant 0 : index
      %c0_38 = arith.constant 0 : index
      %79 = vector.load %arg3[%c0_36, %c0_37, %c0_38] : memref<1x128x128xf32, #tpu.memory_space<vmem>>, vector<1x128x128xf32>
      %80 = vector.shape_cast %79 : vector<1x128x128xf32> to vector<128x128xf32>
      %c0_39 = arith.constant 0 : index
      %c0_40 = arith.constant 0 : index
      %81 = vector.load %arg5[%c0_39, %c0_40] : memref<128x384xf32, #tpu.memory_space<vmem>>, vector<128x384xf32>
      %cst_41 = arith.constant dense<0.000000e+00> : vector<128x384xf32>
      %82 = tpu.matmul %80, %81, %cst_41 {dimension_numbers = #tpu.dot_dimension_numbers<[1], [0], [0], [1], [0, 0, 1, 1], [], []>} : vector<128x128xf32>, vector<128x384xf32>, vector<128x384xf32> -> vector<128x384xf32>
      %c0_42 = arith.constant 0 : index
      %c0_43 = arith.constant 0 : index
      %83 = vector.load %arg7[%c0_42, %c0_43] : memref<1x384xf32, #tpu.memory_space<vmem>>, vector<1x384xf32>
      %84 = vector.broadcast %83 : vector<1x384xf32> to vector<128x384xf32>
      %85 = arith.addf %82, %84 : vector<128x384xf32>
      %c0_44 = arith.constant 0 : index
      %c0_45 = arith.constant 0 : index
      %86 = vector.load %arg9[%c0_44, %c0_45] : memref<128x384xf32, #tpu.memory_space<vmem>>, vector<128x384xf32>
      tpu.vector_store %arg9[%c0_44, %c0_45], %85 {strides = array<i32>} : memref<128x384xf32, #tpu.memory_space<vmem>>, vector<128x384xf32>,
    } else {
    }
    %c0 = arith.constant 0 : index
    %c0_1 = arith.constant 0 : index
    %c0_2 = arith.constant 0 : index
    %3 = vector.load %arg2[%c0, %c0_1, %c0_2] : memref<1x128x128xf32, #tpu.memory_space<vmem>>, vector<1x128x128xf32>
    %4 = vector.shape_cast %3 : vector<1x128x128xf32> to vector<128x128xf32>
    %c0_3 = arith.constant 0 : index
    %c0_4 = arith.constant 0 : index
    %5 = vector.load %arg4[%c0_3, %c0_4] : memref<128x384xf32, #tpu.memory_space<vmem>>, vector<128x384xf32>
    %cst = arith.constant dense<0.000000e+00> : vector<128x384xf32>
    %6 = tpu.matmul %4, %5, %cst {dimension_numbers = #tpu.dot_dimension_numbers<[1], [0], [0], [1], [0, 0, 1, 1], [], []>} : vector<128x128xf32>, vector<128x384xf32>, vector<128x384xf32> -> vector<128x384xf32>
    %c0_5 = arith.constant 0 : index
    %c0_6 = arith.constant 0 : index
    %7 = vector.load %arg6[%c0_5, %c0_6] : memref<1x384xf32, #tpu.memory_space<vmem>>, vector<1x384xf32>
    %8 = vector.broadcast %7 : vector<1x384xf32> to vector<128x384xf32>
    %9 = arith.addf %6, %8 : vector<128x384xf32>
    %10 = tpu.iota {dimensions = array<i32: 1>} : vector<1x128xi32>
    %c8_i32 = arith.constant 8 : i32
    %11 = vector.broadcast %c8_i32 : i32 to vector<1x128xi32>
    %12 = arith.cmpi slt, %10, %11 : vector<1x128xi32>
    %13 = vector.extract_strided_slice %9 {offsets = [0, 0], sizes = [128, 128], strides = [1, 1]} : vector<128x384xf32> to vector<128x128xf32>
    %c0_7 = arith.constant 0 : index
    %c0_8 = arith.constant 0 : index
    %14 = vector.load %arg9[%c0_7, %c0_8] : memref<128x384xf32, #tpu.memory_space<vmem>>, vector<128x128xf32>
    %cst_9 = arith.constant dense<0.000000e+00> : vector<128x128xf32>
    %15 = tpu.matmul %13, %14, %cst_9 {dimension_numbers = #tpu.dot_dimension_numbers<[1], [1], [0], [0], [0, 0, 1, 0], [], []>} : vector<128x128xf32>, vector<128x128xf32>, vector<128x128xf32> -> vector<128x128xf32>
    %cst_10 = arith.constant 0.176776692 : f32
    %16 = vector.broadcast %cst_10 : f32 to vector<128x128xf32>
    %17 = arith.mulf %15, %16 : vector<128x128xf32>
    %cst_11 = arith.constant -1.000000e+30 : f32
    %18 = vector.shape_cast %12 : vector<1x128xi1> to vector<1x128xi1>
    %19 = vector.broadcast %18 : vector<1x128xi1> to vector<128x128xi1>
    %20 = vector.broadcast %cst_11 : f32 to vector<128x128xf32>
    %21 = arith.select %19, %17, %20 : vector<128x128xi1>, vector<128x128xf32>
    %cst_12 = arith.constant dense<0xFF800000> : vector<128xf32>
    %22 = vector.multi_reduction <maximumf>, %21, %cst_12 [1] : vector<128x128xf32> to vector<128xf32>
    %23 = vector.shape_cast %22 : vector<128xf32> to vector<128x1xf32>
    %24 = vector.broadcast %23 : vector<128x1xf32> to vector<128x128xf32>
    %25 = arith.subf %21, %24 : vector<128x128xf32>
    %26 = math.exp %25 : vector<128x128xf32>
    %cst_13 = arith.constant dense<0.000000e+00> : vector<128xf32>
    %27 = vector.multi_reduction <add>, %26, %cst_13 [1] : vector<128x128xf32> to vector<128xf32>
    %28 = vector.shape_cast %27 : vector<128xf32> to vector<128x1xf32>
    %29 = tpu.reciprocal %28 : vector<128x1xf32> -> vector<128x1xf32>
    %30 = vector.broadcast %29 : vector<128x1xf32> to vector<128x128xf32>
    %31 = arith.mulf %26, %30 : vector<128x128xf32>
    %c0_14 = arith.constant 0 : index
    %c0_15 = arith.constant 0 : index
    %c0_16 = arith.constant 0 : index
    %c0_17 = arith.constant 0 : index
    %32 = vector.load %arg8[%c0_14, %c0_15, %c0_16, %c0_17] : memref<3x1x128x128xf32, #tpu.memory_space<vmem>>, vector<1x1x128x128xf32>
    %33 = vector.shape_cast %32 : vector<1x1x128x128xf32> to vector<128x128xf32>
    %34 = vector.shape_cast %31 : vector<128x128xf32> to vector<1x1x128x128xf32>
    tpu.vector_store %arg8[%c0_14, %c0_15, %c0_16, %c0_17], %34 {strides = array<i32>} : memref<3x1x128x128xf32, #tpu.memory_space<vmem>>, vector<1x1x128x128xf32>,
    %35 = vector.extract_strided_slice %9 {offsets = [0, 128], sizes = [128, 128], strides = [1, 1]} : vector<128x384xf32> to vector<128x128xf32>
    %c0_18 = arith.constant 0 : index
    %c128 = arith.constant 128 : index
    %36 = vector.load %arg9[%c0_18, %c128] : memref<128x384xf32, #tpu.memory_space<vmem>>, vector<128x128xf32>
    %cst_19 = arith.constant dense<0.000000e+00> : vector<128x128xf32>
    %37 = tpu.matmul %35, %36, %cst_19 {dimension_numbers = #tpu.dot_dimension_numbers<[1], [1], [0], [0], [0, 0, 1, 0], [], []>} : vector<128x128xf32>, vector<128x128xf32>, vector<128x128xf32> -> vector<128x128xf32>
    %cst_20 = arith.constant 0.176776692 : f32
    %38 = vector.broadcast %cst_20 : f32 to vector<128x128xf32>
    %39 = arith.mulf %37, %38 : vector<128x128xf32>
    %cst_21 = arith.constant -1.000000e+30 : f32
    %40 = vector.shape_cast %12 : vector<1x128xi1> to vector<1x128xi1>
    %41 = vector.broadcast %40 : vector<1x128xi1> to vector<128x128xi1>
    %42 = vector.broadcast %cst_21 : f32 to vector<128x128xf32>
    %43 = arith.select %41, %39, %42 : vector<128x128xi1>, vector<128x128xf32>
    %cst_22 = arith.constant dense<0xFF800000> : vector<128xf32>
    %44 = vector.multi_reduction <maximumf>, %43, %cst_22 [1] : vector<128x128xf32> to vector<128xf32>
    %45 = vector.shape_cast %44 : vector<128xf32> to vector<128x1xf32>
    %46 = vector.broadcast %45 : vector<128x1xf32> to vector<128x128xf32>
    %47 = arith.subf %43, %46 : vector<128x128xf32>
    %48 = math.exp %47 : vector<128x128xf32>
    %cst_23 = arith.constant dense<0.000000e+00> : vector<128xf32>
    %49 = vector.multi_reduction <add>, %48, %cst_23 [1] : vector<128x128xf32> to vector<128xf32>
    %50 = vector.shape_cast %49 : vector<128xf32> to vector<128x1xf32>
    %51 = tpu.reciprocal %50 : vector<128x1xf32> -> vector<128x1xf32>
    %52 = vector.broadcast %51 : vector<128x1xf32> to vector<128x128xf32>
    %53 = arith.mulf %48, %52 : vector<128x128xf32>
    %c1 = arith.constant 1 : index
    %c0_24 = arith.constant 0 : index
    %c0_25 = arith.constant 0 : index
    %c0_26 = arith.constant 0 : index
    %54 = vector.load %arg8[%c1, %c0_24, %c0_25, %c0_26] : memref<3x1x128x128xf32, #tpu.memory_space<vmem>>, vector<1x1x128x128xf32>
    %55 = vector.shape_cast %54 : vector<1x1x128x128xf32> to vector<128x128xf32>
    %56 = vector.shape_cast %53 : vector<128x128xf32> to vector<1x1x128x128xf32>
    tpu.vector_store %arg8[%c1, %c0_24, %c0_25, %c0_26], %56 {strides = array<i32>} : memref<3x1x128x128xf32, #tpu.memory_space<vmem>>, vector<1x1x128x128xf32>,
    %57 = vector.extract_strided_slice %9 {offsets = [0, 256], sizes = [128, 128], strides = [1, 1]} : vector<128x384xf32> to vector<128x128xf32>
    %c0_27 = arith.constant 0 : index
    %c256 = arith.constant 256 : index
    %58 = vector.load %arg9[%c0_27, %c256] : memref<128x384xf32, #tpu.memory_space<vmem>>, vector<128x128xf32>
    %cst_28 = arith.constant dense<0.000000e+00> : vector<128x128xf32>
    %59 = tpu.matmul %57, %58, %cst_28 {dimension_numbers = #tpu.dot_dimension_numbers<[1], [1], [0], [0], [0, 0, 1, 0], [], []>} : vector<128x128xf32>, vector<128x128xf32>, vector<128x128xf32> -> vector<128x128xf32>
    %cst_29 = arith.constant 0.176776692 : f32
    %60 = vector.broadcast %cst_29 : f32 to vector<128x128xf32>
    %61 = arith.mulf %59, %60 : vector<128x128xf32>
    %cst_30 = arith.constant -1.000000e+30 : f32
    %62 = vector.shape_cast %12 : vector<1x128xi1> to vector<1x128xi1>
    %63 = vector.broadcast %62 : vector<1x128xi1> to vector<128x128xi1>
    %64 = vector.broadcast %cst_30 : f32 to vector<128x128xf32>
    %65 = arith.select %63, %61, %64 : vector<128x128xi1>, vector<128x128xf32>
    %cst_31 = arith.constant dense<0xFF800000> : vector<128xf32>
    %66 = vector.multi_reduction <maximumf>, %65, %cst_31 [1] : vector<128x128xf32> to vector<128xf32>
    %67 = vector.shape_cast %66 : vector<128xf32> to vector<128x1xf32>
    %68 = vector.broadcast %67 : vector<128x1xf32> to vector<128x128xf32>
    %69 = arith.subf %65, %68 : vector<128x128xf32>
    %70 = math.exp %69 : vector<128x128xf32>
    %cst_32 = arith.constant dense<0.000000e+00> : vector<128xf32>
    %71 = vector.multi_reduction <add>, %70, %cst_32 [1] : vector<128x128xf32> to vector<128xf32>
    %72 = vector.shape_cast %71 : vector<128xf32> to vector<128x1xf32>
    %73 = tpu.reciprocal %72 : vector<128x1xf32> -> vector<128x1xf32>
    %74 = vector.broadcast %73 : vector<128x1xf32> to vector<128x128xf32>
    %75 = arith.mulf %70, %74 : vector<128x128xf32>
    %c2 = arith.constant 2 : index
    %c0_33 = arith.constant 0 : index
    %c0_34 = arith.constant 0 : index
    %c0_35 = arith.constant 0 : index
    %76 = vector.load %arg8[%c2, %c0_33, %c0_34, %c0_35] : memref<3x1x128x128xf32, #tpu.memory_space<vmem>>, vector<1x1x128x128xf32>
    %77 = vector.shape_cast %76 : vector<1x1x128x128xf32> to vector<128x128xf32>
    %78 = vector.shape_cast %75 : vector<128x128xf32> to vector<1x1x128x128xf32>
    tpu.vector_store %arg8[%c2, %c0_33, %c0_34, %c0_35], %78 {strides = array<i32>} : memref<3x1x128x128xf32, #tpu.memory_space<vmem>>, vector<1x1x128x128xf32>,
    return
  }
  func.func @transform_0(%arg0: i32, %arg1: i32) -> (i32, i32, i32) {
    %c0_i32 = arith.constant 0 : i32
    %c0_i32_0 = arith.constant 0 : i32
    return %arg0, %arg1, %c0_i32 : i32, i32, i32
  }
  func.func @transform_1(%arg0: i32, %arg1: i32) -> (i32, i32, i32) {
    %c0_i32 = arith.constant 0 : i32
    %c0_i32_0 = arith.constant 0 : i32
    %c0_i32_1 = arith.constant 0 : i32
    return %arg0, %c0_i32, %c0_i32_0 : i32, i32, i32
  }
  func.func @transform_2(%arg0: i32, %arg1: i32) -> (i32, i32) {
    %c0_i32 = arith.constant 0 : i32
    %c0_i32_0 = arith.constant 0 : i32
    %c0_i32_1 = arith.constant 0 : i32
    return %c0_i32, %c0_i32_0 : i32, i32
  }
  func.func @transform_3(%arg0: i32, %arg1: i32) -> (i32, i32) {
    %c0_i32 = arith.constant 0 : i32
    %c0_i32_0 = arith.constant 0 : i32
    %c0_i32_1 = arith.constant 0 : i32
    return %c0_i32, %c0_i32_0 : i32, i32
  }
  func.func @transform_4(%arg0: i32, %arg1: i32) -> (i32, i32) {
    %c0_i32 = arith.constant 0 : i32
    %c0_i32_0 = arith.constant 0 : i32
    %c0_i32_1 = arith.constant 0 : i32
    return %c0_i32, %c0_i32_0 : i32, i32
  }
  func.func @transform_5(%arg0: i32, %arg1: i32) -> (i32, i32) {
    %c0_i32 = arith.constant 0 : i32
    %c0_i32_0 = arith.constant 0 : i32
    %c0_i32_1 = arith.constant 0 : i32
    return %c0_i32, %c0_i32_0 : i32, i32
  }
  func.func @transform_6(%arg0: i32, %arg1: i32) -> (i32, i32, i32, i32) {
    %c0_i32 = arith.constant 0 : i32
    %c0_i32_0 = arith.constant 0 : i32
    %c0_i32_1 = arith.constant 0 : i32
    return %c0_i32, %arg0, %arg1, %c0_i32_0 : i32, i32, i32, i32
  }
}

</mosaic_0001>

<bundles_post_ra>
// kernel: tpu_custom_call.1
= control target key start
LH: loop header
LB: loop body
LE: loop exit
PB: predicated region body
PF: predicated region fallthrough
CT: control target
= control target key end

     0   :  { %s4778_s0 = inlined_call_operand.hbm [shape: f32[2,128,128], index: 0, kind: input, shape index: {}]   ;;  %s4779_s1 = inlined_call_operand.hbm [shape: f32[2,128,128], index: 1, kind: input, shape index: {}]   ;;  %s4780_s2 = inlined_call_operand.hbm [shape: f32[128,384], index: 2, kind: input, shape index: {}]   ;;  %s4781_s3 = inlined_call_operand.hbm [shape: f32[128,384], index: 3, kind: input, shape index: {}]   ;;  %s4782_s4 = inlined_call_operand.vmem [shape: f32[1,384], index: 4, kind: input, shape index: {}]   ;;  %s4783_s5 = inlined_call_operand.vmem [shape: f32[1,384], index: 5, kind: input, shape index: {}]   ;;  %s4784_s6 = inlined_call_operand.hbm [shape: f32[3,2,128,128], index: 6, kind: output, shape index: {}]  }
   0x1   :  { %4790 = sst [smem:[#allocation21_spill]] %s4778_s0 }
   0x2   :  { %4791 = sst [smem:[#allocation22_spill]] %s4780_s2 }
   0x3   :  { %4792 = sst [smem:[#allocation23_spill]] %s4781_s3 }
   0x4   :  { %11 = vsyncpa [#allocation4], 0 }
   0x5   :  { %13 = vsyncpa [#allocation4 + $0x1], 0 }
   0x6   :  { %14 = vsyncpa [#allocation7], 0 }
   0x7   :  { %16 = vsyncpa [#allocation7 + $0x1], 0 }
   0x8   :  { %17 = vsyncpa [#allocation10], 0 }
   0x9   :  { %18 = vsyncpa [#allocation5], 0 }
   0xa   :  { %20 = vsyncpa [#allocation5 + $0x1], 0  ;;  %s3679_s21 = smov 0   ;;  %s3681_s22 = smov 0  }
   0xb   :  { %s3683_s23 = smov 0   ;;  %s3685_s24 = smov 0  }
   0xc   :  { %s3687_s25 = smov 0   ;;  %s3689_s26 = smov 0  }
   0xd LB: > { %s3710_s27 = sadd.s32 4294967295, %s3626_s26   ;;  %s2426_s28 = sadd.s32 4294967294, %s3626_s26   ;;  %s3626_s26 = sphi %s3689_s26, %s26_s26   ;;  %s3622_s25 = sphi %s3687_s25, %s4820_s25   ;;  %s3618_s24 = sphi %s3685_s24, %s4819_s24   ;;  %s3614_s23 = sphi %s3683_s23, %s4818_s23   ;;  %s3610_s22 = sphi %s3681_s22, %s4817_s22   ;;  %s3606_s21 = sphi %s3679_s21, %s4816_s21  }
   0xe   : > { %p60_p0 = scmp.ne.s32.totalorder %s3610_s22, %s3606_s21  ;;  %p4785_p1 = scmp.eq.s32.totalorder %s3710_s27, 0 }
   0xf   : > { %p202_p3 = scmp.eq.s32.totalorder %s2426_s28, 1  ;;  %p2427_p5 = scmp.ge.s32.totalorder %s3626_s26, 1 }
  0x10   : > { %p3719_p4 = por %p4785_p1, %p60_p0  ;;  %p209_p7 = scmp.lt.s32.totalorder %s3626_s26, 3 }
  0x11   : > { %p3724_p6 = por %p202_p3, %p60_p0  ;;  %s3628_s8 = smov [#allocation8]  }
  0x12   : > { %s4793_s29 = scalar_select %p3719_p4, 1, 0 }
  0x13   : > { %s4794_s30 = scalar_select %p3724_p6, 1, 0 }
  0x14   : > { %p3729_p8 = pnand %p2427_p5, %p209_p7  ;;  %s221_s9 = sshll.u32 %s3628_s8, 4  ;;  %s3733_s9 = int_to_ptr.vmem [resolvable:$true] %s221_s9 }
  0x15   : > { %s3629_s11 = smov [#allocation9]   ;;  %s4797_s2 = sld [smem:[#allocation22_spill]] }
  0x16   : > { %p3166_p9 = pneg %p3729_p8  ;;  %s234_s12 = sshll.u32 %s3629_s11, 4  ;;  %s3744_s12 = int_to_ptr.vmem [resolvable:$true] %s234_s12 }
  0x18   : > { %p3740_p11 = pnand %p3166_p9, %p4785_p1 }
  0x1a   : > { %p3446_p13 = pneg %p3740_p11 }
  0x1b   : > { %s3444_s15 = scalar_lea.hbm %s4797_s2, 6144 }
  0x1c   : > { %p3445_p12 = scmp.ne.s32.totalorder %s4797_s2, %s3444_s15  ;;  %p3451_p5 = scmp.lt.u32.totalorder %s3444_s15, %s4797_s2 }
  0x1e   : > { %p3447_p0 = pnand %p3446_p13, %p3445_p12 }
  0x20   : > { %p3448_p3 = pneg %p3447_p0 }
  0x22   : > { %p3453_p7 = pnand %p3451_p5, %p3448_p3 }
  0x24   : > { %3456 = shalt.err (!%p3453_p7)
}
  0x25   : > { %s3457_s20 = scalar_lea.vmem %s3733_s9, 6144  ;;  %p3465_p2 = scmp.lt.s32.totalorder %s3733_s9, %s3733_s9 }
  0x26   : > { %p3458_p9 = scmp.ne.s32.totalorder %s3733_s9, %s3457_s20  ;;  %p3466_p12 = scmp.lt.s32.totalorder %s3457_s20, %s3457_s20 }
  0x28   : > { %p3460_p10 = pnand %p3458_p9, %p3446_p13  ;;  %p3467_p0 = por %p3466_p12, %p3465_p2 }
  0x2a   : > { %p3461_p1 = pneg %p3460_p10 }
  0x2c   : > { %p3468_p6 = pnand %p3467_p0, %p3461_p1 }
  0x2e   : > { %3471 = shalt.err (!%p3468_p6)
}
  0x2f   : > { %s3630_s28 = smov 384   ;;  %s3631_s8 = smov 24  }
  0x30   : > { %3169 = dma.hbm_to_vmem [thread:$0]  (!%p3740_p11), %s4797_s2, 6144, %s3733_s9, [#allocation7], %s3630_s28, %s3630_s28, %s3631_s8  }
  0x31   : > { %s4798_s3 = sld [smem:[#allocation23_spill]] }
  0x37   : > { %s3472_s16 = scalar_lea.hbm %s4798_s3, 6144 }
  0x38   : > { %p3473_p2 = scmp.ne.s32.totalorder %s4798_s3, %s3472_s16  ;;  %p3479_p10 = scmp.lt.u32.totalorder %s3472_s16, %s4798_s3 }
  0x3a   : > { %p3475_p1 = pnand %p3473_p2, %p3446_p13 }
  0x3c   : > { %p3476_p6 = pneg %p3475_p1 }
  0x3e   : > { %p3481_p3 = pnand %p3479_p10, %p3476_p6 }
  0x40   : > { %3484 = shalt.err (!%p3481_p3)
}
  0x41   : > { %s3485_s9 = scalar_lea.vmem %s3744_s12, 6144  ;;  %p3493_p12 = scmp.lt.s32.totalorder %s3744_s12, %s3744_s12 }
  0x42   : > { %p3486_p5 = scmp.ne.s32.totalorder %s3744_s12, %s3485_s9  ;;  %p3494_p0 = scmp.lt.s32.totalorder %s3485_s9, %s3485_s9 }
  0x44   : > { %p3488_p7 = pnand %p3486_p5, %p3446_p13  ;;  %p3495_p2 = por %p3494_p0, %p3493_p12 }
  0x46   : > { %p3489_p9 = pneg %p3488_p7 }
  0x48   : > { %p3496_p1 = pnand %p3495_p2, %p3489_p9 }
  0x4a   : > { %3499 = shalt.err (!%p3496_p1)
}
  0x4b   : > { %3172 = dma.hbm_to_vmem [thread:$0]  (!%p3740_p11), %s4798_s3, 6144, %s3744_s12, [#allocation10], %s3630_s28, %s3630_s28, %s3631_s8  }
  0x4c   : > { %s38_s14 = sadd.s32 1, %s3622_s25  ;;  %s47_s15 = sadd.s32 1, %s3614_s23 }
  0x4d   : > { %p40_p13 = scmp.ge.s32.totalorder %s38_s14, 2  ;;  %p54_p6 = scmp.ne.s32.totalorder %s3614_s23, %s3610_s22 }
  0x4e   : > { %p55_p10 = scmp.eq.s32.totalorder %s3626_s26, 0  ;;  %p3186_p3 = scmp.lt.s32.totalorder %s3626_s26, 2 }
  0x4f   : > { %s4822_s14 = smov (%p40_p13, %s38_s14), 0  ;;  %p4800_p7 = scmp.eq.s32.totalorder %s3710_s27, 1 }
  0x50   : > { %4799 = sst [smem:[#allocation19_spill]] %s4822_s14  ;;  %p56_p5 = por %p55_p10, %p54_p6 }
  0x51   : > { %p3808_p9 = por %p4800_p7, %p54_p6  ;;  %s42_s16 = ssub.s32 %s3622_s25, %s4822_s14 }
  0x52   : > { %s254_s17 = sand.u32 1, %s3614_s23   ;;  %p45_p11 = scmp.eq.s32.totalorder %s42_s16, 0 }
  0x53   : > { %s4801_s10 = scalar_select %p3808_p9, 1, 0 }
  0x54   : > { %s3815_s12 = sshll.u32 %s254_s17, 7  ;;  %s4786_s28 = sshll.u32 %s3622_s25, 11 }
  0x55   : > { %s3819_s8 = scalar_select %p45_p11, %s3614_s23, %s47_s15  }
  0x56   : > { %s4803_s0 = sld [smem:[#allocation21_spill]]  ;;  %s258_s9 = scalar_lea.vmem [#allocation3], %s3815_s12 }
  0x57   : > { %4802 = sst [smem:[#allocation20_spill]] %s3819_s8  ;;  %s267_s11 = sshll.u32 %s258_s9, 4  ;;  %s3835_s11 = int_to_ptr.vmem [resolvable:$true] %s267_s11 }
  0x58   : > { %p3831_p12 = pnand %p3186_p3, %p56_p5  ;;  %s3837_s15 = scalar_lea.sflag [#allocation4], %s254_s17 }
  0x5a   : > { %p3502_p2 = pneg %p3831_p12 }
  0x5c   : > { %s3826_s20 = scalar_lea.hbm %s4803_s0, %s4786_s28  ;;  %s3505_s9 = scalar_lea.hbm %s4803_s0, 4096 }
  0x5d   : > { %s3500_s16 = scalar_lea.hbm %s3826_s20, 2048  ;;  %p3506_p6 = scmp.lt.u32.totalorder %s3826_s20, %s4803_s0 }
  0x5e   : > { %p3501_p0 = scmp.ne.s32.totalorder %s3826_s20, %s3500_s16  ;;  %p3507_p10 = scmp.lt.u32.totalorder %s3505_s9, %s3500_s16 }
  0x5f   : > { %p3509_p5 = scmp.lt.u32.totalorder %s3500_s16, %s3826_s20 }
  0x60   : > { %p3503_p1 = pnand %p3502_p2, %p3501_p0  ;;  %p3508_p3 = por %p3507_p10, %p3506_p6 }
  0x62   : > { %p3504_p13 = pneg %p3503_p1  ;;  %p3510_p7 = por %p3509_p5, %p3508_p3 }
  0x64   : > { %p3511_p11 = pnand %p3510_p7, %p3504_p13 }
  0x66   : > { %3514 = shalt.err (!%p3511_p11)
}
  0x67   : > { %s3515_s17 = scalar_lea.vmem %s3835_s11, 2048  ;;  %s3632_s18 = smov [#allocation3]  }
  0x68   : > { %p3516_p0 = scmp.ne.s32.totalorder %s3835_s11, %s3515_s17  ;;  %s3520_s19 = sshll.u32 %s3632_s18, 4  ;;  %s3521_s19 = int_to_ptr.vmem [resolvable:$false] %s3520_s19 }
  0x69   : > { %s3522_s2 = scalar_lea.vmem %s3521_s19, 4096  ;;  %p3523_p4 = scmp.lt.s32.totalorder %s3835_s11, %s3521_s19 }
  0x6a   : > { %p3518_p1 = pnand %p3516_p0, %p3502_p2  ;;  %p3524_p6 = scmp.lt.s32.totalorder %s3522_s2, %s3515_s17 }
  0x6c   : > { %p3519_p9 = pneg %p3518_p1  ;;  %p3525_p10 = por %p3524_p6, %p3523_p4 }
  0x6e   : > { %p3526_p3 = pnand %p3525_p10, %p3519_p9 }
  0x70   : > { %3529 = shalt.err (!%p3526_p3)
}
  0x71   : > { %s3633_s28 = smov 128   ;;  %s3634_s16 = smov 8  }
  0x72   : > { %3176 = dma.hbm_to_vmem [thread:$0]  (!%p3831_p12), %s3826_s20, 2048, %s3835_s11, %s3837_s15, %s3633_s28, %s3633_s28, %s3634_s16  }
  0x73   : > { %s4805_s9 = sshll.u32 %s3622_s25, 11  ;;  %s281_s2 = scalar_lea.vmem [#allocation6], %s3815_s12 }
  0x74   : > { %s3873_s19 = scalar_lea.hbm %s4779_s1, %s4805_s9  ;;  %s288_s0 = sshll.u32 %s281_s2, 4  ;;  %s3877_s0 = int_to_ptr.vmem [resolvable:$true] %s288_s0 }
  0x75   : > { %s277_s3 = sand.u32 1, %s3626_s26   ;;  %s3530_s8 = scalar_lea.hbm %s3873_s19, 2048 }
  0x76   : > { %s3879_s14 = scalar_lea.sflag [#allocation7], %s277_s3  ;;  %p3531_p4 = scmp.ne.s32.totalorder %s3873_s19, %s3530_s8 }
  0x77   : > { %s3535_s15 = scalar_lea.hbm %s4779_s1, 4096  ;;  %p3536_p5 = scmp.lt.u32.totalorder %s3873_s19, %s4779_s1 }
  0x78   : > { %p3533_p9 = pnand %p3531_p4, %p3502_p2  ;;  %p3537_p7 = scmp.lt.u32.totalorder %s3535_s15, %s3530_s8 }
  0x79   : > { %p3539_p0 = scmp.lt.u32.totalorder %s3530_s8, %s3873_s19 }
  0x7a   : > { %p3534_p13 = pneg %p3533_p9  ;;  %p3538_p11 = por %p3537_p7, %p3536_p5 }
  0x7c   : > { %p3540_p1 = por %p3539_p0, %p3538_p11 }
  0x7e   : > { %p3541_p6 = pnand %p3540_p1, %p3534_p13 }
  0x80   : > { %3544 = shalt.err (!%p3541_p6)
}
  0x81   : > { %s3545_s3 = scalar_lea.vmem %s3877_s0, 2048  ;;  %s3635_s12 = smov [#allocation6]  }
  0x82   : > { %p3546_p10 = scmp.ne.s32.totalorder %s3877_s0, %s3545_s3  ;;  %s3550_s18 = sshll.u32 %s3635_s12, 4  ;;  %s3551_s18 = int_to_ptr.vmem [resolvable:$false] %s3550_s18 }
  0x83   : > { %s3552_s2 = scalar_lea.vmem %s3551_s18, 4096  ;;  %p3553_p9 = scmp.lt.s32.totalorder %s3877_s0, %s3551_s18 }
  0x84   : > { %p3548_p3 = pnand %p3546_p10, %p3502_p2  ;;  %p3554_p5 = scmp.lt.s32.totalorder %s3552_s2, %s3545_s3 }
  0x86   : > { %p3549_p4 = pneg %p3548_p3  ;;  %p3555_p7 = por %p3554_p5, %p3553_p9 }
  0x88   : > { %p3556_p11 = pnand %p3555_p7, %p3549_p4 }
  0x8a   : > { %3559 = shalt.err (!%p3556_p11)
}
  0x8b   : > { %3179 = dma.hbm_to_vmem [thread:$0]  (!%p3831_p12), %s3873_s19, 2048, %s3877_s0, %s3879_s14, %s3633_s28, %s3633_s28, %s3634_s16  }
  0x8c   : > { %300 = sbr.rel (%p3729_p8) target bundleno = 1111 (0x457), region = 44  ;;  %s3911_s8 = sand.u32 (!%p3729_p8), 1, %s3610_s22  }
  0x8d   : > { %s2438_s20 = sshll.u32 (!%p3729_p8), %s3911_s8, 7  ;;  %s303_s11 = scalar_lea.sflag (!%p3729_p8), [#allocation4], %s3911_s8 }
  0x8e   : > { %s3915_s15 = scalar_lea.vmem (!%p3729_p8), [#allocation3], %s2438_s20  ;;  %p4806_p2 = scmp.ne.s32.totalorder (!%p3729_p8), %s4793_s29, 0 }
  0x93   : > { %3585 = dma.done.wait (%p4806_p2), %s303_s11, 2048  }
  0x94   : > { %3587 = vsyncadd (%p4806_p2), %s303_s11, 4294965248  ;;  %s311_s0 = sand.u32 1, %s3710_s27   ;;  %s3922_s14 = scalar_lea.vmem [#allocation6], %s2438_s20 }
  0x95   : > { %s312_s7 = scalar_lea.sflag [#allocation7], %s311_s0 }
  0x96   : > { %3589 = dma.done.wait (%p4806_p2), %s312_s7, 2048  }
  0x97   : > { %3591 = vsyncadd (%p4806_p2), %s312_s7, 4294965248  ;;  %p4807_p8 = scmp.eq.s32.totalorder %s3710_s27, 0 }
  0x99   : > { %3593 = dma.done.wait (%p4807_p8), [#allocation7], 6144   ;;  %p4808_p12 = pmov %p4807_p8 }
  0x9a   : > { %p4809_p13 = pmov %p4807_p8 }
  0x9b   : > { %3595 = vsyncadd (%p4808_p12), [#allocation7], 4294961152 }
  0x9c   : > { %3597 = dma.done.wait (%p4809_p13), [#allocation10], 6144   ;;  %p4810_p0 = pmov %p4807_p8 }
  0x9d   : > { %v3636_v0 = vmov 0.0   ;;  %v380_v1 = vld [vmem:[#allocation9 + $0x8] sm:$0xff]  ;;  %v383_v2 = vld [vmem:[#allocation9 + $0x20] sm:$0xff]  ;;  %v382_v5 = vld [vmem:[#allocation9 + $0x18] sm:$0xff]  ;;  %s3145_s16 = smul.u32 384, %s3911_s8  ;;  %s2252_s9 = scalar_lea.sflag [#allocation5], %s3911_s8 }
  0x9e   : > { %3599 = vsyncadd (%p4810_p0), [#allocation10], 4294961152  ;;  %508 = vmatprep.mubr.f32.mxu0 %v3636_v0  ;;  %v379_v3 = vld [vmem:[#allocation9] sm:$0xff]  ;;  %v2921_v4 = vpack.c.bf16 %v383_v2, %v380_v1  ;;  %v386_v6 = vld [vmem:[#allocation9 + $0x38] sm:$0xff] }
  0x9f   : > { %v389_v7 = vld [vmem:[#allocation9 + $0x50] sm:$0xff]  ;;  %v2923_v8 = vpack.c.bf16 %v382_v5, %v379_v3  ;;  %v388_v11 = vld [vmem:[#allocation9 + $0x48] sm:$0xff]  ;;  %v395_v13 = vld [vmem:[#allocation9 + $0x80] sm:$0xff]  ;;  %s4638_s19 = scalar_lea.vmem [#allocation11], %s3145_s16 }
  0xa0   : > { %v2925_v9 = vpack.c.bf16 %v389_v7, %v386_v6  ;;  %v385_v10 = vld [vmem:[#allocation9 + $0x30] sm:$0xff]  ;;  %v392_v12 = vld [vmem:[#allocation9 + $0x68] sm:$0xff]  ;;  %2922 = vmatprep.subr.bf16.mxu0 %v2921_v4  ;;  %v391_v16 = vld [vmem:[#allocation9 + $0x60] sm:$0xff] }
  0xa1   : > { %2924 = vmatpush1.bf16.msra.mxu0 %v2923_v8  ;;  %v2927_v14 = vpack.c.bf16 %v388_v11, %v385_v10  ;;  %v2929_v15 = vpack.c.bf16 %v395_v13, %v392_v12  ;;  %v394_v17 = vld [vmem:[#allocation9 + $0x78] sm:$0xff]  ;;  %v401_v19 = vld [vmem:[#allocation9 + $0xb0] sm:$0xff]  ;;  %v400_v23 = vld [vmem:[#allocation9 + $0xa8] sm:$0xff] }
  0xa2   : > { %2926 = vmatprep.subr.bf16.mxu0 %v2925_v9  ;;  %v398_v18 = vld [vmem:[#allocation9 + $0x98] sm:$0xff]  ;;  %v2931_v20 = vpack.c.bf16 %v394_v17, %v391_v16  ;;  %v397_v22 = vld [vmem:[#allocation9 + $0x90] sm:$0xff]  ;;  %v404_v24 = vld [vmem:[#allocation9 + $0xc8] sm:$0xff] }
  0xa3   : > { %v2933_v21 = vpack.c.bf16 %v401_v19, %v398_v18  ;;  %v407_v25 = vld [vmem:[#allocation9 + $0xe0] sm:$0xff]  ;;  %v381_v26 = vld [vmem:[#allocation9 + $0x10] sm:$0xff]  ;;  %v384_v27 = vld [vmem:[#allocation9 + $0x28] sm:$0xff]  ;;  %v2935_v30 = vpack.c.bf16 %v400_v23, %v397_v22 }
  0xa4   : > { %v3938_v28 = vld [vmem:[%s3922_s14] sm:$0xff]  ;;  %v2953_v32 = vpack.c.bf16 %v384_v27, %v381_v26  ;;  %v390_v33 = vld [vmem:[#allocation9 + $0x58] sm:$0xff]  ;;  %v2937_v34 = vpack.c.bf16 %v407_v25, %v404_v24  ;;  %v393_v37 = vld [vmem:[#allocation9 + $0x70] sm:$0xff] }
  0xa5   : > { %2928 = vmatpush1.bf16.msra.mxu0 %v2927_v14  ;;  %v387_v29 = vld [vmem:[#allocation9 + $0x40] sm:$0xff]  ;;  %2673 = vmatprep.mubr.f32.mxu1 %v3938_v28  ;;  %v406_v35 = vld [vmem:[#allocation9 + $0xd8] sm:$0xff]  ;;  %v396_v38 = vld [vmem:[#allocation9 + $0x88] sm:$0xff] }
  0xa6   : > { %2930 = vmatprep.subr.bf16.mxu0 %v2929_v15  ;;  %v403_v31 = vld [vmem:[#allocation9 + $0xc0] sm:$0xff]  ;;  %v2957_v36 = vpack.c.bf16 %v390_v33, %v387_v29  ;;  %v410_v39 = vld [vmem:[#allocation9 + $0xf8] sm:$0xff]  ;;  %v413_v40 = vld [vmem:[#allocation9 + $0x110] sm:$0xff]  ;;  %2954 = vmatprep.subr.bf16.mxu1 %v2953_v32  ;;  %v2961_v43 = vpack.c.bf16 %v396_v38, %v393_v37 }
  0xa7   : > { %2956 = vmatpush3.bf16.msra.mxu1 %v2953_v32  ;;  %v2939_v41 = vpack.c.bf16 %v406_v35, %v403_v31  ;;  %v409_v42 = vld [vmem:[#allocation9 + $0xf0] sm:$0xff]  ;;  %v2941_v44 = vpack.c.bf16 %v413_v40, %v410_v39  ;;  %v412_v45 = vld [vmem:[#allocation9 + $0x108] sm:$0xff]  ;;  %v399_v46 = vld [vmem:[#allocation9 + $0xa0] sm:$0xff] }
  0xa8   : > { %2958 = vmatprep.subr.bf16.mxu1 %v2957_v36  ;;  %v402_v47 = vld [vmem:[#allocation9 + $0xb8] sm:$0xff]  ;;  %v416_v48 = vld [vmem:[#allocation9 + $0x128] sm:$0xff]  ;;  %v419_v49 = vld [vmem:[#allocation9 + $0x140] sm:$0xff]  ;;  %v2943_v50 = vpack.c.bf16 %v412_v45, %v409_v42 }
  0xa9   : > { %2932 = vmatpush1.bf16.msra.mxu0 %v2931_v20  ;;  %v415_v51 = vld [vmem:[#allocation9 + $0x120] sm:$0xff]  ;;  %v2965_v52 = vpack.c.bf16 %v402_v47, %v399_v46  ;;  %v2945_v53 = vpack.c.bf16 %v419_v49, %v416_v48  ;;  %v418_v54 = vld [vmem:[#allocation9 + $0x138] sm:$0xff]  ;;  %v405_v55 = vld [vmem:[#allocation9 + $0xd0] sm:$0xff] }
  0xaa   : > { %2934 = vmatprep.subr.bf16.mxu0 %v2933_v21  ;;  %v408_v56 = vld [vmem:[#allocation9 + $0xe8] sm:$0xff]  ;;  %v422_v57 = vld [vmem:[#allocation9 + $0x158] sm:$0xff]  ;;  %v425_v58 = vld [vmem:[#allocation9 + $0x170] sm:$0xff]  ;;  %v2947_v59 = vpack.c.bf16 %v418_v54, %v415_v51 }
  0xab   : > { %2960 = vmatpush3.bf16.msra.mxu1 %v2957_v36  ;;  %v421_v60 = vld [vmem:[#allocation9 + $0x150] sm:$0xff]  ;;  %v2969_v61 = vpack.c.bf16 %v408_v56, %v405_v55  ;;  %v2949_v62 = vpack.c.bf16 %v425_v58, %v422_v57  ;;  %v424_v63 = vld [vmem:[#allocation9 + $0x168] sm:$0xff]  ;;  %v411_v1 = vld [vmem:[#allocation9 + $0x100] sm:$0xff] }
  0xac   : > { %2962 = vmatprep.subr.bf16.mxu1 %v2961_v43  ;;  %v414_v2 = vld [vmem:[#allocation9 + $0x118] sm:$0xff]  ;;  %v2951_v3 = vpack.c.bf16 %v424_v63, %v421_v60  ;;  %v417_v5 = vld [vmem:[#allocation9 + $0x130] sm:$0xff]  ;;  %v420_v6 = vld [vmem:[#allocation9 + $0x148] sm:$0xff] }
  0xad   : > { %2936 = vmatpush1.bf16.msra.mxu0 %v2935_v30  ;;  %v2973_v4 = vpack.c.bf16 %v414_v2, %v411_v1  ;;  %v2977_v7 = vpack.c.bf16 %v420_v6, %v417_v5  ;;  %v423_v8 = vld [vmem:[#allocation9 + $0x160] sm:$0xff]  ;;  %v426_v9 = vld [vmem:[#allocation9 + $0x178] sm:$0xff]  ;;  %v816_v10 = vld [vmem:[#allocation8 + $0x10] sm:$0xff] }
  0xae   : > { %2938 = vmatprep.subr.bf16.mxu0 %v2937_v34  ;;  %v819_v11 = vld [vmem:[#allocation8 + $0x28] sm:$0xff]  ;;  %v822_v13 = vld [vmem:[#allocation8 + $0x40] sm:$0xff]  ;;  %v825_v14 = vld [vmem:[#allocation8 + $0x58] sm:$0xff]  ;;  %v2981_v16 = vpack.c.bf16 %v426_v9, %v423_v8 }
  0xaf   : > { %2964 = vmatpush3.bf16.msra.mxu1 %v2961_v43  ;;  %v3017_v12 = vpack.c.bf16 %v819_v11, %v816_v10  ;;  %v364_v15 = vld [vmem:[%s3922_s14 + $0x8] sm:$0xff]  ;;  %v818_v18 = vld [vmem:[#allocation8 + $0x20] sm:$0xff]  ;;  %v3021_v19 = vpack.c.bf16 %v825_v14, %v822_v13  ;;  %v828_v20 = vld [vmem:[#allocation8 + $0x70] sm:$0xff] }
  0xb0   : > { %2966 = vmatprep.subr.bf16.mxu1 %v2965_v52  ;;  %v815_v17 = vld [vmem:[#allocation8 + $0x8] sm:$0xff]  ;;  %v365_v22 = vld [vmem:[%s3922_s14 + $0x10] sm:$0xff]  ;;  %v814_v24 = vld [vmem:[#allocation8] sm:$0xff] }
  0xb1   : > { %2940 = vmatpush1.bf16.msra.mxu0 %v2939_v41  ;;  %v831_v21 = vld [vmem:[#allocation8 + $0x88] sm:$0xff]  ;;  %v2985_v23 = vpack.c.bf16 %v818_v18, %v815_v17  ;;  %v817_v25 = vld [vmem:[#allocation8 + $0x18] sm:$0xff]  ;;  %v834_v29 = vld [vmem:[#allocation8 + $0xa0] sm:$0xff] }
  0xb2   : > { %2942 = vmatprep.subr.bf16.mxu0 %v2941_v44  ;;  %v821_v26 = vld [vmem:[#allocation8 + $0x38] sm:$0xff]  ;;  %v3025_v27 = vpack.c.bf16 %v831_v21, %v828_v20  ;;  %v2987_v31 = vpack.c.bf16 %v817_v25, %v814_v24  ;;  %v820_v33 = vld [vmem:[#allocation8 + $0x30] sm:$0xff]  ;;  %v823_v34 = vld [vmem:[#allocation8 + $0x48] sm:$0xff] }
  0xb3   : > { %2968 = vmatpush3.bf16.msra.mxu1 %v2965_v52  ;;  %v837_v30 = vld [vmem:[#allocation8 + $0xb8] sm:$0xff]  ;;  %v827_v36 = vld [vmem:[#allocation8 + $0x68] sm:$0xff]  ;;  %v830_v38 = vld [vmem:[#allocation8 + $0x80] sm:$0xff]  ;;  %v2991_v41 = vpack.c.bf16 %v823_v34, %v820_v33 }
  0xb4   : > { %2970 = vmatprep.subr.bf16.mxu1 %v2969_v61  ;;  %v366_v32 = vld [vmem:[%s3922_s14 + $0x18] sm:$0xff]  ;;  %v3029_v37 = vpack.c.bf16 %v837_v30, %v834_v29  ;;  %v840_v39 = vld [vmem:[#allocation8 + $0xd0] sm:$0xff]  ;;  %v843_v40 = vld [vmem:[#allocation8 + $0xe8] sm:$0xff]  ;;  %v2993_v45 = vpack.c.bf16 %v830_v38, %v827_v36 }
  0xb5   : > { %2944 = vmatpush1.bf16.msra.mxu0 %v2943_v50  ;;  %v367_v42 = vld [vmem:[%s3922_s14 + $0x20] sm:$0xff]  ;;  %v829_v44 = vld [vmem:[#allocation8 + $0x78] sm:$0xff]  ;;  %v3033_v47 = vpack.c.bf16 %v843_v40, %v840_v39  ;;  %v836_v48 = vld [vmem:[#allocation8 + $0xb0] sm:$0xff] }
  0xb6   : > { %2946 = vmatprep.subr.bf16.mxu0 %v2945_v53  ;;  %v826_v43 = vld [vmem:[#allocation8 + $0x60] sm:$0xff]  ;;  %v833_v46 = vld [vmem:[#allocation8 + $0x98] sm:$0xff]  ;;  %v368_v52 = vld [vmem:[%s3922_s14 + $0x28] sm:$0xff] }
  0xb7   : > { %2972 = vmatpush3.bf16.msra.mxu1 %v2969_v61  ;;  %v846_v49 = vld [vmem:[#allocation8 + $0x100] sm:$0xff]  ;;  %v849_v50 = vld [vmem:[#allocation8 + $0x118] sm:$0xff]  ;;  %v2995_v51 = vpack.c.bf16 %v829_v44, %v826_v43  ;;  %v832_v53 = vld [vmem:[#allocation8 + $0x90] sm:$0xff]  ;;  %v2997_v55 = vpack.c.bf16 %v836_v48, %v833_v46 }
  0xb8   : > { %2974 = vmatprep.subr.bf16.mxu1 %v2973_v4  ;;  %v835_v54 = vld [vmem:[#allocation8 + $0xa8] sm:$0xff]  ;;  %v3037_v57 = vpack.c.bf16 %v849_v50, %v846_v49  ;;  %v842_v58 = vld [vmem:[#allocation8 + $0xe0] sm:$0xff]  ;;  %v369_v61 = vld [vmem:[%s3922_s14 + $0x30] sm:$0xff] }
  0xb9   : > { %2948 = vmatpush1.bf16.msra.mxu0 %v2947_v59  ;;  %v839_v56 = vld [vmem:[#allocation8 + $0xc8] sm:$0xff]  ;;  %v852_v59 = vld [vmem:[#allocation8 + $0x130] sm:$0xff]  ;;  %v838_v63 = vld [vmem:[#allocation8 + $0xc0] sm:$0xff] }
  0xba   : > { %2950 = vmatprep.subr.bf16.mxu0 %v2949_v62  ;;  %v855_v60 = vld [vmem:[#allocation8 + $0x148] sm:$0xff]  ;;  %v2999_v62 = vpack.c.bf16 %v835_v54, %v832_v53  ;;  %v841_v1 = vld [vmem:[#allocation8 + $0xd8] sm:$0xff]  ;;  %v848_v6 = vld [vmem:[#allocation8 + $0x110] sm:$0xff] }
  0xbb   : > { %2976 = vmatpush3.bf16.msra.mxu1 %v2973_v4  ;;  %v370_v2 = vld [vmem:[%s3922_s14 + $0x38] sm:$0xff]  ;;  %v3041_v5 = vpack.c.bf16 %v855_v60, %v852_v59  ;;  %v371_v9 = vld [vmem:[%s3922_s14 + $0x40] sm:$0xff]  ;;  %v3003_v10 = vpack.c.bf16 %v841_v1, %v838_v63  ;;  %v844_v11 = vld [vmem:[#allocation8 + $0xf0] sm:$0xff] }
  0xbc   : > { %2978 = vmatprep.subr.bf16.mxu1 %v2977_v7  ;;  %v845_v4 = vld [vmem:[#allocation8 + $0xf8] sm:$0xff]  ;;  %v372_v13 = vld [vmem:[%s3922_s14 + $0x48] sm:$0xff]  ;;  %v854_v17 = vld [vmem:[#allocation8 + $0x140] sm:$0xff] }
  0xbd   : > { %2952 = vmatpush1.bf16.msra.mxu0 %v2951_v3  ;;  %v3001_v3 = vpack.c.bf16 %v842_v58, %v839_v56  ;;  %v861_v8 = vld [vmem:[#allocation8 + $0x178] sm:$0xff]  ;;  %v3005_v14 = vpack.c.bf16 %v848_v6, %v845_v4  ;;  %v373_v18 = vld [vmem:[%s3922_s14 + $0x50] sm:$0xff]  ;;  %v850_v20 = vld [vmem:[#allocation8 + $0x120] sm:$0xff] }
  0xbe   : > { %3018 = vmatprep.subr.bf16.mxu0 %v3017_v12  ;;  %v853_v21 = vld [vmem:[#allocation8 + $0x138] sm:$0xff]  ;;  %v860_v25 = vld [vmem:[#allocation8 + $0x170] sm:$0xff]  ;;  %v859_v29 = vld [vmem:[#allocation8 + $0x168] sm:$0xff] }
  0xbf   : > { %2980 = vmatpush3.bf16.msra.mxu1 %v2977_v7  ;;  %v858_v7 = vld [vmem:[#allocation8 + $0x160] sm:$0xff]  ;;  %v857_v24 = vld [vmem:[#allocation8 + $0x158] sm:$0xff]  ;;  %v376_v30 = vld [vmem:[%s3922_s14 + $0x68] sm:$0xff] }
  0xc0   : > { %509 = vmatmul.mubr.f32.vlgmr.msra.gmra.mrb[0].mxu0 %v3938_v28  ;;  %2982 = vmatprep.subr.bf16.mxu1 %v2981_v16  ;;  %v824_v28 = vld [vmem:[#allocation8 + $0x50] sm:$0xff]  ;;  %v378_v33 = vld [vmem:[%s3922_s14 + $0x78] sm:$0xff]  ;;  %v799_v36 = vld [vmem:[%s3915_s15 + $0x8] sm:$0xff] }
  0xc1   : > { %514 = vmatprep.mubr.f32.mxu0 %v3636_v0  ;;  %3020 = vmatpush3.bf16.msra.mxu0 %v3017_v12  ;;  %v2989_v35 = vpack.c.bf16 %v824_v28, %v821_v26  ;;  %v847_v12 = vld [vmem:[#allocation8 + $0x108] sm:$0xff]  ;;  %v375_v26 = vld [vmem:[%s3922_s14 + $0x60] sm:$0xff]  ;;  %v856_v28 = vld [vmem:[#allocation8 + $0x150] sm:$0xff] }
  0xc2   : > { %3022 = vmatprep.subr.bf16.mxu0 %v3021_v19  ;;  %v3015_v34 = vpack.c.bf16 %v859_v29, %v856_v28  ;;  %v801_v38 = vld [vmem:[%s3915_s15 + $0x18] sm:$0xff]  ;;  %v802_v39 = vld [vmem:[%s3915_s15 + $0x20] sm:$0xff]  ;;  %v803_v40 = vld [vmem:[%s3915_s15 + $0x28] sm:$0xff] }
  0xc3   : > { %2984 = vmatpush3.bf16.msra.mxu1 %v2981_v16  ;;  %v851_v16 = vld [vmem:[#allocation8 + $0x128] sm:$0xff]  ;;  %v806_v43 = vld [vmem:[%s3915_s15 + $0x40] sm:$0xff]  ;;  %v809_v46 = vld [vmem:[%s3915_s15 + $0x58] sm:$0xff] }
  0xc4   : > { %515 = vmatmul.mubr.f32.gmra.mrb[2].mxu0 %v364_v15  ;;  %2986 = vmatprep.subr.bf16.mxu1 %v2985_v23  ;;  %v3009_v23 = vpack.c.bf16 %v854_v17, %v851_v16  ;;  %v807_v44 = vld [vmem:[%s3915_s15 + $0x48] sm:$0xff]  ;;  %v812_v49 = vld [vmem:[%s3915_s15 + $0x70] sm:$0xff]  ;;  %v813_v50 = vld [vmem:[%s3915_s15 + $0x78] sm:$0xff] }
  0xc5   : > { %520 = vmatprep.mubr.f32.mxu0 %v3636_v0  ;;  %3024 = vmatpush3.bf16.msra.mxu0 %v3021_v19  ;;  %v3007_v19 = vpack.c.bf16 %v847_v12, %v844_v11  ;;  %v811_v48 = vld [vmem:[%s3915_s15 + $0x68] sm:$0xff]  ;;  %v427_v54 = vld [vmem:[%s4783_s5] sm:$0x7] }
  0xc6   : > { %3026 = vmatprep.subr.bf16.mxu0 %v3025_v27  ;;  %2674 = vmatmul.mubr.f32.vlgmr.msra.gmra.mrb[0].mxu1 %v364_v15  ;;  %v3045_v15 = vpack.c.bf16 %v861_v8, %v858_v7 }
  0xc7   : > { %2988 = vmatpush1.bf16.msra.mxu1 %v2987_v31  ;;  %2676 = vmatprep.mubr.f32.mxu1 %v365_v22  ;;  %v3013_v31 = vpack.c.bf16 %v860_v25, %v857_v24 }
  0xc8   : > { %521 = vmatmul.mubr.f32.gmra.mrb[4].mxu0 %v365_v22  ;;  %2990 = vmatprep.subr.bf16.mxu1 %v2989_v35  ;;  %v374_v22 = vld [vmem:[%s3922_s14 + $0x58] sm:$0xff]  ;;  %v798_v35 = vld [vmem:[%s3915_s15] sm:$0xff] }
  0xc9   : > { %526 = vmatprep.mubr.f32.mxu0 %v3636_v0  ;;  %3028 = vmatpush3.bf16.msra.mxu0 %v3025_v27  ;;  %v3011_v27 = vpack.c.bf16 %v853_v21, %v850_v20 }
  0xca   : > { %3030 = vmatprep.subr.bf16.mxu0 %v3029_v37  ;;  %2677 = vmatmul.mubr.f32.gmra.mrb[2].mxu1 %v366_v32 }
  0xcb   : > { %2992 = vmatpush1.bf16.msra.mxu1 %v2991_v41  ;;  %2679 = vmatprep.mubr.f32.mxu1 %v367_v42  ;;  %v804_v41 = vld [vmem:[%s3915_s15 + $0x30] sm:$0xff] }
  0xcc   : > { %527 = vmatmul.mubr.f32.gmra.mrb[6].mxu0 %v366_v32  ;;  %2994 = vmatprep.subr.bf16.mxu1 %v2993_v45  ;;  %v377_v32 = vld [vmem:[%s3922_s14 + $0x70] sm:$0xff] }
  0xcd   : > { %532 = vmatprep.mubr.f32.mxu0 %v3636_v0  ;;  %3032 = vmatpush3.bf16.msra.mxu0 %v3029_v37  ;;  %v800_v37 = vld [vmem:[%s3915_s15 + $0x10] sm:$0xff] }
  0xce   : > { %3034 = vmatprep.subr.bf16.mxu0 %v3033_v47  ;;  %2680 = vmatmul.mubr.f32.gmra.mrb[4].mxu1 %v368_v52  ;;  %v808_v45 = vld [vmem:[%s3915_s15 + $0x50] sm:$0xff] }
  0xcf   : > { %2996 = vmatpush1.bf16.msra.mxu1 %v2995_v51  ;;  %2682 = vmatprep.mubr.f32.mxu1 %v369_v61  ;;  %v429_v51 = vlaneseq }
  0xd0   : > { %533 = vmatmul.mubr.f32.gmra.mrb[8].mxu0 %v367_v42  ;;  %2998 = vmatprep.subr.bf16.mxu1 %v2997_v55  ;;  %v805_v42 = vld [vmem:[%s3915_s15 + $0x38] sm:$0xff] }
  0xd1   : > { %538 = vmatprep.mubr.f32.mxu0 %v3636_v0  ;;  %3036 = vmatpush3.bf16.msra.mxu0 %v3033_v47  ;;  %v810_v47 = vld [vmem:[%s3915_s15 + $0x60] sm:$0xff] }
  0xd2   : > { %3038 = vmatprep.subr.bf16.mxu0 %v3037_v57  ;;  %2683 = vmatmul.mubr.f32.gmra.mrb[6].mxu1 %v370_v2 }
  0xd3   : > { %3000 = vmatpush1.bf16.msra.mxu1 %v2999_v62  ;;  %2685 = vmatprep.mubr.f32.mxu1 %v371_v9 }
  0xd4   : > { %539 = vmatmul.mubr.f32.gmra.mrb[10].mxu0 %v368_v52  ;;  %3002 = vmatprep.subr.bf16.mxu1 %v3001_v3  ;;  %v4005_v52 = vshrl.u32 %v429_v51, 7 }
  0xd5   : > { %544 = vmatprep.mubr.f32.mxu0 %v3636_v0  ;;  %3040 = vmatpush3.bf16.msra.mxu0 %v3037_v57 }
  0xd6   : > { %3042 = vmatprep.subr.bf16.mxu0 %v3041_v5  ;;  %2686 = vmatmul.mubr.f32.gmra.mrb[8].mxu1 %v372_v13  ;;  %v431_v53 = vsub.s32 0, %v4005_v52  ;;  %v435_v55 = vsub.s32 1, %v4005_v52  ;;  %v439_v60 = vsub.s32 2, %v4005_v52 }
  0xd7   : > { %3004 = vmatpush1.bf16.msra.mxu1 %v3003_v10  ;;  %2688 = vmatprep.mubr.f32.mxu1 %v373_v18 }
  0xd8   : > { %545 = vmatmul.mubr.f32.gmra.mrb[12].mxu0 %v369_v61  ;;  %3006 = vmatprep.subr.bf16.mxu1 %v3005_v14  ;;  %v4014_v57 = vrot.slane %v427_v54, %v431_v53  ;;  %v4027_v6 = vrot.slane %v427_v54, %v439_v60 }
  0xd9   : > { %550 = vmatprep.mubr.f32.mxu0 %v3636_v0  ;;  %3044 = vmatpush3.bf16.msra.mxu0 %v3041_v5 }
  0xda   : > { %3046 = vmatprep.subr.bf16.mxu0 %v3045_v15  ;;  %2689 = vmatmul.mubr.f32.gmra.mrb[10].mxu1 %v374_v22 }
  0xdb   : > { %3008 = vmatpush1.bf16.msra.mxu1 %v3007_v19  ;;  %2691 = vmatprep.mubr.f32.mxu1 %v375_v26 }
  0xdc   : > { %551 = vmatmul.mubr.f32.gmra.mrb[14].mxu0 %v370_v2  ;;  %3010 = vmatprep.subr.bf16.mxu1 %v3009_v23 }
  0xdd   : > { %556 = vmatprep.mubr.f32.mxu0 %v3636_v0  ;;  %3048 = vmatpush3.bf16.msra.mxu0 %v3045_v15 }
  0xde   : > { %2692 = vmatmul.mubr.f32.gmra.mrb[12].mxu1 %v376_v30 }
  0xdf   : > { %3012 = vmatpush1.bf16.msra.mxu1 %v3011_v27  ;;  %2694 = vmatprep.mubr.f32.mxu1 %v377_v32 }
  0xe0   : > { %557 = vmatmul.mubr.f32.gmra.mrb[16].mxu0 %v371_v9  ;;  %3014 = vmatprep.subr.bf16.mxu1 %v3013_v31 }
  0xe1   : > { %562 = vmatprep.mubr.f32.mxu0 %v3636_v0 }
  0xe2   : > { %2695 = vmatmul.mubr.f32.gmra.mrb[14].mxu1 %v378_v33 }
  0xe3   : > { %3016 = vmatpush1.bf16.msra.mxu1 %v3015_v34  ;;  %943 = vmatprep.mubr.f32.mxu1 %v3636_v0 }
  0xe4   : > { %563 = vmatmul.mubr.f32.gmra.mrb[18].mxu0 %v372_v13 }
  0xe5   : > { %568 = vmatprep.mubr.f32.mxu0 %v3636_v0 }
  0xe6   : > { %944 = vmatmul.mubr.f32.vlgmr.msra.gmra.mrb[16].mxu1 %v798_v35 }
  0xe7   : > { %949 = vmatprep.mubr.f32.mxu1 %v3636_v0 }
  0xe8   : > { %569 = vmatmul.mubr.f32.gmra.mrb[20].mxu0 %v373_v18 }
  0xe9   : > { %574 = vmatprep.mubr.f32.mxu0 %v3636_v0 }
  0xea   : > { %950 = vmatmul.mubr.f32.gmra.mrb[18].mxu1 %v799_v36 }
  0xeb   : > { %955 = vmatprep.mubr.f32.mxu1 %v3636_v0 }
  0xec   : > { %575 = vmatmul.mubr.f32.gmra.mrb[22].mxu0 %v374_v22 }
  0xed   : > { %580 = vmatprep.mubr.f32.mxu0 %v3636_v0 }
  0xee   : > { %956 = vmatmul.mubr.f32.gmra.mrb[20].mxu1 %v800_v37 }
  0xef   : > { %961 = vmatprep.mubr.f32.mxu1 %v3636_v0 }
  0xf0   : > { %581 = vmatmul.mubr.f32.gmra.mrb[24].mxu0 %v375_v26 }
  0xf1   : > { %586 = vmatprep.mubr.f32.mxu0 %v3636_v0 }
  0xf2   : > { %962 = vmatmul.mubr.f32.gmra.mrb[22].mxu1 %v801_v38 }
  0xf3   : > { %967 = vmatprep.mubr.f32.mxu1 %v3636_v0 }
  0xf4   : > { %587 = vmatmul.mubr.f32.gmra.mrb[26].mxu0 %v376_v30 }
  0xf5   : > { %592 = vmatprep.mubr.f32.mxu0 %v3636_v0 }
  0xf6   : > { %968 = vmatmul.mubr.f32.gmra.mrb[24].mxu1 %v802_v39 }
  0xf7   : > { %973 = vmatprep.mubr.f32.mxu1 %v3636_v0 }
  0xf8   : > { %593 = vmatmul.mubr.f32.gmra.mrb[28].mxu0 %v377_v32 }
  0xf9   : > { %598 = vmatprep.mubr.f32.mxu0 %v3636_v0 }
  0xfa   : > { %974 = vmatmul.mubr.f32.gmra.mrb[26].mxu1 %v803_v40 }
  0xfb   : > { %979 = vmatprep.mubr.f32.mxu1 %v3636_v0 }
  0xfc   : > { %599 = vmatmul.mubr.f32.gmra.mrb[30].mxu0 %v378_v33 }
  0xfd   : > { %2729 = vmatprep.mubr.f32.mxu0 %v798_v35 }
  0xfe   : > { %980 = vmatmul.mubr.f32.gmra.mrb[28].mxu1 %v804_v41 }
  0xff   : > { %985 = vmatprep.mubr.f32.mxu1 %v3636_v0 }
 0x100   : > { %2730 = vmatmul.mubr.f32.vlgmr.msra.gmra.mrb[32].mxu0 %v799_v36 }
 0x101   : > { %2732 = vmatprep.mubr.f32.mxu0 %v800_v37 }
 0x102   : > { %986 = vmatmul.mubr.f32.gmra.mrb[30].mxu1 %v805_v42 }
 0x103   : > { %991 = vmatprep.mubr.f32.mxu1 %v3636_v0 }
 0x104   : > { %2733 = vmatmul.mubr.f32.gmra.mrb[34].mxu0 %v801_v38 }
 0x105   : > { %2735 = vmatprep.mubr.f32.mxu0 %v802_v39 }
 0x106   : > { %992 = vmatmul.mubr.f32.gmra.mrb[32].mxu1 %v806_v43 }
 0x107   : > { %997 = vmatprep.mubr.f32.mxu1 %v3636_v0 }
 0x108   : > { %2736 = vmatmul.mubr.f32.gmra.mrb[36].mxu0 %v803_v40 }
 0x109   : > { %2738 = vmatprep.mubr.f32.mxu0 %v804_v41 }
 0x10a   : > { %998 = vmatmul.mubr.f32.gmra.mrb[34].mxu1 %v807_v44 }
 0x10b   : > { %1003 = vmatprep.mubr.f32.mxu1 %v3636_v0 }
 0x10c   : > { %2739 = vmatmul.mubr.f32.gmra.mrb[38].mxu0 %v805_v42 }
 0x10d   : > { %2741 = vmatprep.mubr.f32.mxu0 %v806_v43 }
 0x10e   : > { %1004 = vmatmul.mubr.f32.gmra.mrb[36].mxu1 %v808_v45 }
 0x10f   : > { %1009 = vmatprep.mubr.f32.mxu1 %v3636_v0 }
 0x110   : > { %2742 = vmatmul.mubr.f32.gmra.mrb[40].mxu0 %v807_v44 }
 0x111   : > { %2744 = vmatprep.mubr.f32.mxu0 %v808_v45 }
 0x112   : > { %1010 = vmatmul.mubr.f32.gmra.mrb[38].mxu1 %v809_v46 }
 0x113   : > { %1015 = vmatprep.mubr.f32.mxu1 %v3636_v0 }
 0x114   : > { %2745 = vmatmul.mubr.f32.gmra.mrb[42].mxu0 %v809_v46 }
 0x115   : > { %2747 = vmatprep.mubr.f32.mxu0 %v810_v47 }
 0x116   : > { %1016 = vmatmul.mubr.f32.gmra.mrb[40].mxu1 %v810_v47 }
 0x117   : > { %1021 = vmatprep.mubr.f32.mxu1 %v3636_v0 }
 0x118   : > { %2748 = vmatmul.mubr.f32.gmra.mrb[44].mxu0 %v811_v48 }
 0x119   : > { %2750 = vmatprep.mubr.f32.mxu0 %v812_v49 }
 0x11a   : > { %1022 = vmatmul.mubr.f32.gmra.mrb[42].mxu1 %v811_v48 }
 0x11b   : > { %1027 = vmatprep.mubr.f32.mxu1 %v3636_v0 }
 0x11c   : > { %2751 = vmatmul.mubr.f32.gmra.mrb[46].mxu0 %v813_v50 }
 0x11e   : > { %1028 = vmatmul.mubr.f32.gmra.mrb[44].mxu1 %v812_v49 }
 0x11f   : > { %1033 = vmatprep.mubr.f32.mxu1 %v3636_v0  ;;  %v4018_v0 = vrot.slane %v427_v54, %v435_v55 }
 0x122   : > { %1034 = vmatmul.mubr.f32.gmra.mrb[46].mxu1 %v813_v50 }
 0x193   : > { %v510_v56 = vpop.f32.mrb[0].mxu0 }
 0x194   : > { %v512_v58 = vpop.f32.mrb[1].mxu0  ;;  %v511_v61 = vadd.f32 %v510_v56, %v4014_v57 }
 0x195   : > { %v513_v1 = vadd.f32 %v512_v58, %v4018_v0 }
 0x197   : > { %v516_v59 = vpop.f32.mrb[2].mxu0 }
 0x198   : > { %v517_v62 = vadd.f32 %v516_v59, %v4014_v57  ;;  %v518_v63 = vpop.f32.mrb[3].mxu0 }
 0x199   : > { %v519_v2 = vadd.f32 %v518_v63, %v4018_v0  ;;  %v2675_v8 = vpop.f32.mrb[0].mxu1 }
 0x19a   : > { %v3049_v3 = vpack.c.bf16 %v517_v62, %v511_v61  ;;  %v677_v10 = vadd.f32 %v2675_v8, %v4027_v6  ;;  %v671_v11 = vpop.f32.mrb[1].mxu1 }
 0x19b   : > { %v3081_v4 = vpack.c.bf16 %v519_v2, %v513_v1  ;;  %v522_v5 = vpop.f32.mrb[4].mxu0  ;;  %v672_v15 = vadd.f32 %v671_v11, %v4027_v6 }
 0x19c   : > { %v524_v7 = vpop.f32.mrb[5].mxu0  ;;  %3050 = vmatprep.subr.bf16.mxu1 %v3049_v3  ;;  %v523_v12 = vadd.f32 %v522_v5, %v4014_v57 }
 0x19d   : > { %3052 = vmatpush3.bf16.xpose.msra.mxu1 %v3049_v3  ;;  %3082 = vmatprep.subr.bf16.mxu0 %v3081_v4  ;;  %v525_v16 = vadd.f32 %v524_v7, %v4018_v0  ;;  %v4035_v19 = vpack.c.bf16 %v677_v10, %v672_v15  ;;  %v2678_v20 = vpop.f32.mrb[2].mxu1 }
 0x19e   : > { %3084 = vmatpush3.bf16.xpose.msra.mxu0 %v3081_v4  ;;  %v687_v23 = vadd.f32 %v2678_v20, %v4027_v6  ;;  %v681_v24 = vpop.f32.mrb[3].mxu1 }
 0x19f   : > { %v528_v9 = vpop.f32.mrb[6].mxu0  ;;  %v682_v26 = vadd.f32 %v681_v24, %v4027_v6 }
 0x1a0   : > { %v529_v13 = vadd.f32 %v528_v9, %v4014_v57  ;;  %v530_v14 = vpop.f32.mrb[7].mxu0 }
 0x1a1   : > { %v531_v17 = vadd.f32 %v530_v14, %v4018_v0  ;;  %v4039_v27 = vpack.c.bf16 %v687_v23, %v682_v26  ;;  %v2681_v28 = vpop.f32.mrb[4].mxu1 }
 0x1a2   : > { %v3053_v18 = vpack.c.bf16 %v529_v13, %v523_v12  ;;  %v697_v30 = vadd.f32 %v2681_v28, %v4027_v6  ;;  %v691_v31 = vpop.f32.mrb[5].mxu1 }
 0x1a3   : > { %v3085_v21 = vpack.c.bf16 %v531_v17, %v525_v16  ;;  %v534_v22 = vpop.f32.mrb[8].mxu0  ;;  %v692_v35 = vadd.f32 %v691_v31, %v4027_v6 }
 0x1a4   : > { %v536_v25 = vpop.f32.mrb[9].mxu0  ;;  %3054 = vmatprep.subr.bf16.mxu1 %v3053_v18  ;;  %v535_v32 = vadd.f32 %v534_v22, %v4014_v57 }
 0x1a5   : > { %3056 = vmatpush3.bf16.xpose.msra.mxu1 %v3053_v18  ;;  %3086 = vmatprep.subr.bf16.mxu0 %v3085_v21  ;;  %v537_v36 = vadd.f32 %v536_v25, %v4018_v0  ;;  %v4047_v39 = vpack.c.bf16 %v697_v30, %v692_v35  ;;  %v2684_v40 = vpop.f32.mrb[6].mxu1 }
 0x1a6   : > { %3088 = vmatpush3.bf16.xpose.msra.mxu0 %v3085_v21  ;;  %v707_v43 = vadd.f32 %v2684_v40, %v4027_v6  ;;  %v701_v44 = vpop.f32.mrb[7].mxu1  ;;  %v4072_v21 = vld [vmem:[%s4782_s4] sm:$0x7] }
 0x1a7   : > { %v540_v29 = vpop.f32.mrb[10].mxu0  ;;  %v702_v46 = vadd.f32 %v701_v44, %v4027_v6  ;;  %v4088_v35 = vrot.slane %v4072_v21, %v435_v55 }
 0x1a8   : > { %v541_v33 = vadd.f32 %v540_v29, %v4014_v57  ;;  %v542_v34 = vpop.f32.mrb[11].mxu0 }
 0x1a9   : > { %v543_v37 = vadd.f32 %v542_v34, %v4018_v0  ;;  %v4051_v47 = vpack.c.bf16 %v707_v43, %v702_v46  ;;  %v2687_v48 = vpop.f32.mrb[8].mxu1 }
 0x1aa   : > { %v3057_v38 = vpack.c.bf16 %v541_v33, %v535_v32  ;;  %v717_v50 = vadd.f32 %v2687_v48, %v4027_v6  ;;  %v711_v54 = vpop.f32.mrb[9].mxu1  ;;  %v4082_v32 = vrot.slane %v4072_v21, %v431_v53 }
 0x1ab   : > { %v3089_v41 = vpack.c.bf16 %v543_v37, %v537_v36  ;;  %v546_v42 = vpop.f32.mrb[12].mxu0  ;;  %v712_v61 = vadd.f32 %v711_v54, %v4027_v6 }
 0x1ac   : > { %v548_v45 = vpop.f32.mrb[13].mxu0  ;;  %3058 = vmatprep.subr.bf16.mxu1 %v3057_v38  ;;  %v547_v56 = vadd.f32 %v546_v42, %v4014_v57 }
 0x1ad   : > { %3060 = vmatpush3.bf16.xpose.msra.mxu1 %v3057_v38  ;;  %3090 = vmatprep.subr.bf16.mxu0 %v3089_v41  ;;  %v549_v62 = vadd.f32 %v548_v45, %v4018_v0  ;;  %v4059_v2 = vpack.c.bf16 %v717_v50, %v712_v61  ;;  %v2690_v3 = vpop.f32.mrb[10].mxu1 }
 0x1ae   : > { %3092 = vmatpush3.bf16.xpose.msra.mxu0 %v3089_v41  ;;  %v727_v7 = vadd.f32 %v2690_v3, %v4027_v6  ;;  %v721_v8 = vpop.f32.mrb[11].mxu1 }
 0x1af   : > { %v552_v49 = vpop.f32.mrb[14].mxu0  ;;  %v722_v10 = vadd.f32 %v721_v8, %v4027_v6 }
 0x1b0   : > { %v553_v58 = vadd.f32 %v552_v49, %v4014_v57  ;;  %v554_v59 = vpop.f32.mrb[15].mxu0 }
 0x1b1   : > { %v555_v63 = vadd.f32 %v554_v59, %v4018_v0  ;;  %v4063_v11 = vpack.c.bf16 %v727_v7, %v722_v10  ;;  %v2693_v12 = vpop.f32.mrb[12].mxu1 }
 0x1b2   : > { %v3061_v1 = vpack.c.bf16 %v553_v58, %v547_v56  ;;  %v737_v14 = vadd.f32 %v2693_v12, %v4027_v6  ;;  %v731_v15 = vpop.f32.mrb[13].mxu1 }
 0x1b3   : > { %v3093_v4 = vpack.c.bf16 %v555_v63, %v549_v62  ;;  %v558_v5 = vpop.f32.mrb[16].mxu0  ;;  %v732_v20 = vadd.f32 %v731_v15, %v4027_v6 }
 0x1b4   : > { %v560_v9 = vpop.f32.mrb[17].mxu0  ;;  %3062 = vmatprep.subr.bf16.mxu1 %v3061_v1  ;;  %v559_v16 = vadd.f32 %v558_v5, %v4014_v57 }
 0x1b5   : > { %3064 = vmatpush3.bf16.xpose.msra.mxu1 %v3061_v1  ;;  %3094 = vmatprep.subr.bf16.mxu0 %v3093_v4  ;;  %v561_v22 = vadd.f32 %v560_v9, %v4018_v0  ;;  %v4076_v25 = vpack.c.bf16 %v737_v14, %v732_v20  ;;  %v2696_v26 = vpop.f32.mrb[14].mxu1 }
 0x1b6   : > { %3096 = vmatpush3.bf16.xpose.msra.mxu0 %v3093_v4  ;;  %v747_v30 = vadd.f32 %v2696_v26, %v4027_v6  ;;  %v741_v31 = vpop.f32.mrb[15].mxu1 }
 0x1b7   : > { %v564_v13 = vpop.f32.mrb[18].mxu0  ;;  %v742_v34 = vadd.f32 %v741_v31, %v4027_v6 }
 0x1b8   : > { %v565_v17 = vadd.f32 %v564_v13, %v4014_v57  ;;  %v566_v18 = vpop.f32.mrb[19].mxu0 }
 0x1b9   : > { %v567_v23 = vadd.f32 %v566_v18, %v4018_v0  ;;  %v4090_v36 = vpack.c.bf16 %v747_v30, %v742_v34  ;;  %v945_v37 = vpop.f32.mrb[16].mxu1 }
 0x1ba   : > { %v3065_v24 = vpack.c.bf16 %v565_v17, %v559_v16  ;;  %v946_v40 = vadd.f32 %v945_v37, %v4082_v32  ;;  %v947_v53 = vpop.f32.mrb[17].mxu1 }
 0x1bb   : > { %v3097_v28 = vpack.c.bf16 %v567_v23, %v561_v22  ;;  %v570_v29 = vpop.f32.mrb[20].mxu0  ;;  %v948_v43 = vadd.f32 %v947_v53, %v4088_v35 }
 0x1bc   : > { %v572_v33 = vpop.f32.mrb[21].mxu0  ;;  %3066 = vmatprep.subr.bf16.mxu1 %v3065_v24  ;;  %v571_v41 = vadd.f32 %v570_v29, %v4014_v57  ;;  %2785 = vmatprep.mubr.f32.mxu1 %v946_v40 }
 0x1bd   : > { %3068 = vmatpush3.bf16.xpose.msra.mxu1 %v3065_v24  ;;  %3098 = vmatprep.subr.bf16.mxu0 %v3097_v28  ;;  %v573_v55 = vadd.f32 %v572_v33, %v4018_v0  ;;  %v951_v46 = vpop.f32.mrb[18].mxu1 }
 0x1be   : > { %3100 = vmatpush3.bf16.xpose.msra.mxu0 %v3097_v28  ;;  %2841 = vmatprep.mubr.f32.mxu0 %v948_v43  ;;  %v953_v50 = vpop.f32.mrb[19].mxu1 }
 0x1bf   : > { %v576_v38 = vpop.f32.mrb[22].mxu0  ;;  %v954_v34 = vadd.f32 %v953_v50, %v4088_v35 }
 0x1c0   : > { %v577_v42 = vadd.f32 %v576_v38, %v4014_v57  ;;  %v578_v6 = vpop.f32.mrb[23].mxu0 }
 0x1c1   : > { %v579_v44 = vadd.f32 %v578_v6, %v4018_v0  ;;  %v957_v56 = vpop.f32.mrb[20].mxu1 }
 0x1c2   : > { %v3069_v45 = vpack.c.bf16 %v577_v42, %v571_v41  ;;  %v959_v59 = vpop.f32.mrb[21].mxu1  ;;  %v958_v37 = vadd.f32 %v957_v56, %v4082_v32 }
 0x1c3   : > { %v3101_v48 = vpack.c.bf16 %v579_v44, %v573_v55  ;;  %v582_v49 = vpop.f32.mrb[24].mxu0  ;;  %v960_v40 = vadd.f32 %v959_v59, %v4088_v35 }
 0x1c4   : > { %v584_v54 = vpop.f32.mrb[25].mxu0  ;;  %3070 = vmatprep.subr.bf16.mxu1 %v3069_v45  ;;  %v583_v61 = vadd.f32 %v582_v49, %v4014_v57 }
 0x1c5   : > { %3072 = vmatpush3.bf16.xpose.msra.mxu1 %v3069_v45  ;;  %3102 = vmatprep.subr.bf16.mxu0 %v3101_v48  ;;  %v585_v1 = vadd.f32 %v584_v54, %v4018_v0  ;;  %v963_v5 = vpop.f32.mrb[22].mxu1 }
 0x1c6   : > { %3104 = vmatpush3.bf16.xpose.msra.mxu0 %v3101_v48  ;;  %v965_v9 = vpop.f32.mrb[23].mxu1  ;;  %v964_v42 = vadd.f32 %v963_v5, %v4082_v32 }
 0x1c7   : > { %v588_v58 = vpop.f32.mrb[26].mxu0  ;;  %v966_v43 = vadd.f32 %v965_v9, %v4088_v35 }
 0x1c8   : > { %v589_v62 = vadd.f32 %v588_v58, %v4014_v57  ;;  %v590_v63 = vpop.f32.mrb[27].mxu0 }
 0x1c9   : > { %v591_v3 = vadd.f32 %v590_v63, %v4018_v0  ;;  %v969_v12 = vpop.f32.mrb[24].mxu1 }
 0x1ca   : > { %v3073_v4 = vpack.c.bf16 %v589_v62, %v583_v61  ;;  %v971_v14 = vpop.f32.mrb[25].mxu1  ;;  %v970_v55 = vadd.f32 %v969_v12, %v4082_v32 }
 0x1cb   : > { %v3105_v7 = vpack.c.bf16 %v591_v3, %v585_v1  ;;  %v594_v8 = vpop.f32.mrb[28].mxu0  ;;  %v972_v44 = vadd.f32 %v971_v14, %v4088_v35 }
 0x1cc   : > { %v596_v10 = vpop.f32.mrb[29].mxu0  ;;  %3074 = vmatprep.subr.bf16.mxu1 %v3073_v4  ;;  %v595_v15 = vadd.f32 %v594_v8, %v4014_v57 }
 0x1cd   : > { %3076 = vmatpush3.bf16.xpose.msra.mxu1 %v3073_v4  ;;  %3106 = vmatprep.subr.bf16.mxu0 %v3105_v7  ;;  %v597_v18 = vadd.f32 %v596_v10, %v4018_v0  ;;  %v975_v23 = vpop.f32.mrb[26].mxu1 }
 0x1ce   : > { %3108 = vmatpush3.bf16.xpose.msra.mxu0 %v3105_v7  ;;  %v977_v26 = vpop.f32.mrb[27].mxu1  ;;  %v976_v49 = vadd.f32 %v975_v23, %v4082_v32 }
 0x1cf   : > { %v600_v13 = vpop.f32.mrb[30].mxu0 }
 0x1d0   : > { %v601_v16 = vadd.f32 %v600_v13, %v4014_v57  ;;  %v602_v17 = vpop.f32.mrb[31].mxu0 }
 0x1d1   : > { %v603_v20 = vadd.f32 %v602_v17, %v4018_v0  ;;  %v981_v57 = vpop.f32.mrb[28].mxu1  ;;  %v952_v0 = vadd.f32 %v951_v46, %v4082_v32 }
 0x1d2   : > { %v3077_v22 = vpack.c.bf16 %v601_v16, %v595_v15  ;;  %v983_v30 = vpop.f32.mrb[29].mxu1  ;;  %v982_v54 = vadd.f32 %v981_v57, %v4082_v32 }
 0x1d3   : > { %v3109_v24 = vpack.c.bf16 %v603_v20, %v597_v18  ;;  %v4106_v28 = vpop.f32.mrb[32].mxu0  ;;  %v984_v58 = vadd.f32 %v983_v30, %v4088_v35 }
 0x1d4   : > { %3078 = vmatprep.subr.bf16.mxu1 %v3077_v22  ;;  %v4108_v29 = vpop.f32.mrb[33].mxu0 }
 0x1d5   : > { %3080 = vmatpush3.bf16.xpose.msra.mxu1 %v3077_v22  ;;  %3110 = vmatprep.subr.bf16.mxu0 %v3109_v24  ;;  %v987_v38 = vpop.f32.mrb[30].mxu1 }
 0x1d6   : > { %3112 = vmatpush3.bf16.xpose.msra.mxu0 %v3109_v24  ;;  %3114 = vmatprep.subr.bf16.mxu1 %v4035_v19  ;;  %v989_v53 = vpop.f32.mrb[31].mxu1  ;;  %v988_v62 = vadd.f32 %v987_v38, %v4082_v32 }
 0x1d7   : > { %v4111_v31 = vpop.f32.mrb[34].mxu0  ;;  %v990_v1 = vadd.f32 %v989_v53, %v4088_v35 }
 0x1d8   : > { %v4114_v33 = vpop.f32.mrb[35].mxu0 }
 0x1d9   : > { %v993_v45 = vpop.f32.mrb[32].mxu1 }
 0x1da   : > { %v995_v46 = vpop.f32.mrb[33].mxu1  ;;  %v994_v3 = vadd.f32 %v993_v45, %v4082_v32 }
 0x1db   : > { %v4119_v41 = vpop.f32.mrb[36].mxu0  ;;  %v996_v4 = vadd.f32 %v995_v46, %v4088_v35 }
 0x1dc   : > { %2786 = vmatmul.mubr.f32.vlgmr.msra.gmra.mrb[48].mxu1 %v952_v0  ;;  %v4122_v6 = vpop.f32.mrb[37].mxu0 }
 0x1dd   : > { %2842 = vmatmul.mubr.f32.vlgmr.msra.gmra.mrb[48].mxu0 %v954_v34  ;;  %3116 = vmatpush3.bf16.xpose.msra.mxu1 %v4035_v19  ;;  %v978_v19 = vadd.f32 %v977_v26, %v4088_v35  ;;  %v999_v56 = vpop.f32.mrb[34].mxu1 }
 0x1de   : > { %3118 = vmatprep.subr.bf16.mxu1 %v4039_v27  ;;  %2788 = vmatprep.mubr.f32.mxu1 %v958_v37  ;;  %v1001_v59 = vpop.f32.mrb[35].mxu1  ;;  %v1000_v9 = vadd.f32 %v999_v56, %v4082_v32 }
 0x1df   : > { %2844 = vmatprep.mubr.f32.mxu0 %v960_v40  ;;  %v4129_v48 = vpop.f32.mrb[38].mxu0 }
 0x1e0   : > { %2789 = vmatmul.mubr.f32.gmra.mrb[50].mxu1 %v964_v42  ;;  %v4132_v50 = vpop.f32.mrb[39].mxu0  ;;  %v875_v42 = vrot.slane %v4072_v21, %v439_v60 }
 0x1e1   : > { %2845 = vmatmul.mubr.f32.gmra.mrb[50].mxu0 %v966_v43  ;;  %2791 = vmatprep.mubr.f32.mxu1 %v970_v55  ;;  %v1005_v5 = vpop.f32.mrb[36].mxu1 }
 0x1e2   : > { %2847 = vmatprep.mubr.f32.mxu0 %v972_v44  ;;  %v1007_v7 = vpop.f32.mrb[37].mxu1  ;;  %v1006_v12 = vadd.f32 %v1005_v5, %v4082_v32  ;;  %v1107_v45 = vadd.f32 %v4108_v29, %v875_v42  ;;  %v1112_v52 = vadd.f32 %v4106_v28, %v875_v42  ;;  %v1117_v60 = vadd.f32 %v4114_v33, %v875_v42 }
 0x1e3   : > { %v4137_v61 = vpop.f32.mrb[40].mxu0  ;;  %v1008_v14 = vadd.f32 %v1007_v7, %v4088_v35  ;;  %v1127_v21 = vadd.f32 %v4122_v6, %v875_v42 }
 0x1e4   : > { %2792 = vmatmul.mubr.f32.gmra.mrb[52].mxu1 %v976_v49  ;;  %v4140_v63 = vpop.f32.mrb[41].mxu0 }
 0x1e5   : > { %3120 = vmatpush3.bf16.xpose.msra.mxu1 %v4039_v27  ;;  %2848 = vmatmul.mubr.f32.gmra.mrb[52].mxu0 %v978_v19  ;;  %v1002_v27 = vadd.f32 %v1001_v59, %v4088_v35  ;;  %v1011_v13 = vpop.f32.mrb[38].mxu1 }
 0x1e6   : > { %3122 = vmatprep.subr.bf16.mxu1 %v4047_v39  ;;  %2794 = vmatprep.mubr.f32.mxu1 %v982_v54  ;;  %v1013_v15 = vpop.f32.mrb[39].mxu1  ;;  %v1012_v17 = vadd.f32 %v1011_v13, %v4082_v32 }
 0x1e7   : > { %2850 = vmatprep.mubr.f32.mxu0 %v984_v58  ;;  %v4147_v8 = vpop.f32.mrb[42].mxu0  ;;  %v1014_v20 = vadd.f32 %v1013_v15, %v4088_v35 }
 0x1e8   : > { %2795 = vmatmul.mubr.f32.gmra.mrb[54].mxu1 %v988_v62  ;;  %v4150_v10 = vpop.f32.mrb[43].mxu0  ;;  %v1162_v29 = vadd.f32 %v4147_v8, %v875_v42 }
 0x1e9   : > { %2851 = vmatmul.mubr.f32.gmra.mrb[54].mxu0 %v990_v1  ;;  %2797 = vmatprep.mubr.f32.mxu1 %v994_v3  ;;  %v1017_v22 = vpop.f32.mrb[40].mxu1  ;;  %v1157_v28 = vadd.f32 %v4150_v10, %v875_v42 }
 0x1ea   : > { %2853 = vmatprep.mubr.f32.mxu0 %v996_v4  ;;  %v1018_v23 = vadd.f32 %v1017_v22, %v4082_v32  ;;  %v1019_v24 = vpop.f32.mrb[41].mxu1 }
 0x1eb   : > { %v4155_v16 = vpop.f32.mrb[44].mxu0  ;;  %v1020_v57 = vadd.f32 %v1019_v24, %v4088_v35 }
 0x1ec   : > { %2798 = vmatmul.mubr.f32.gmra.mrb[56].mxu1 %v1000_v9  ;;  %v4158_v18 = vpop.f32.mrb[45].mxu0  ;;  %v1172_v33 = vadd.f32 %v4155_v16, %v875_v42 }
 0x1ed   : > { %3124 = vmatpush3.bf16.xpose.msra.mxu1 %v4047_v39  ;;  %2854 = vmatmul.mubr.f32.gmra.mrb[56].mxu0 %v1002_v27  ;;  %v1023_v39 = vpop.f32.mrb[42].mxu1 }
 0x1ee   : > { %3126 = vmatprep.subr.bf16.mxu1 %v4051_v47  ;;  %2800 = vmatprep.mubr.f32.mxu1 %v1006_v12  ;;  %v1024_v0 = vadd.f32 %v1023_v39, %v4082_v32  ;;  %v1025_v34 = vpop.f32.mrb[43].mxu1 }
 0x1ef   : > { %2856 = vmatprep.mubr.f32.mxu0 %v1008_v14  ;;  %v4164_v26 = vpop.f32.mrb[46].mxu0  ;;  %v1026_v37 = vadd.f32 %v1025_v34, %v4088_v35 }
 0x1f0   : > { %2801 = vmatmul.mubr.f32.gmra.mrb[58].mxu1 %v1012_v17  ;;  %v1176_v30 = vpop.f32.mrb[47].mxu0  ;;  %v1182_v6 = vadd.f32 %v4164_v26, %v875_v42 }
 0x1f1   : > { %2857 = vmatmul.mubr.f32.gmra.mrb[58].mxu0 %v1014_v20  ;;  %2803 = vmatprep.mubr.f32.mxu1 %v1018_v23  ;;  %v1029_v38 = vpop.f32.mrb[44].mxu1 }
 0x1f2   : > { %2859 = vmatprep.mubr.f32.mxu0 %v1020_v57  ;;  %v1030_v40 = vadd.f32 %v1029_v38, %v4082_v32  ;;  %v1031_v53 = vpop.f32.mrb[45].mxu1 }
 0x1f3   : > { %v1032_v43 = vadd.f32 %v1031_v53, %v4088_v35 }
 0x1f4   : > { %2804 = vmatmul.mubr.f32.gmra.mrb[60].mxu1 %v1024_v0 }
 0x1f5   : > { %3128 = vmatpush3.bf16.xpose.msra.mxu1 %v4051_v47  ;;  %2860 = vmatmul.mubr.f32.gmra.mrb[60].mxu0 %v1026_v37  ;;  %v1035_v55 = vpop.f32.mrb[46].mxu1 }
 0x1f6   : > { %3130 = vmatprep.subr.bf16.mxu1 %v4059_v2  ;;  %2806 = vmatprep.mubr.f32.mxu1 %v1030_v40  ;;  %v1036_v44 = vadd.f32 %v1035_v55, %v4082_v32  ;;  %v1037_v47 = vpop.f32.mrb[47].mxu1  ;;  %v1142_v32 = vadd.f32 %v4129_v48, %v875_v42  ;;  %v4201_v48 = vand.u32 127, %v429_v51 }
 0x1f7   : > { %2862 = vmatprep.mubr.f32.mxu0 %v1032_v43  ;;  %v1038_v46 = vadd.f32 %v1037_v47, %v4088_v35  ;;  %v1147_v35 = vadd.f32 %v4140_v63, %v875_v42 }
 0x1f8   : > { %2807 = vmatmul.mubr.f32.gmra.mrb[62].mxu1 %v1036_v44  ;;  %vm1187_vm0 = vcmp.lt.s32.totalorder %v4201_v48, 8 }
 0x1f9   : > { %2863 = vmatmul.mubr.f32.gmra.mrb[62].mxu0 %v1038_v46  ;;  %2897 = vmatprep.mubr.f32.mxu1 %v1107_v45 }
 0x1fd   : > { %3132 = vmatpush3.bf16.xpose.msra.mxu1 %v4059_v2  ;;  %v1122_v2 = vadd.f32 %v4111_v31, %v875_v42  ;;  %v1167_v31 = vadd.f32 %v4158_v18, %v875_v42 }
 0x1fe   : > { %3134 = vmatprep.subr.bf16.mxu1 %v4063_v11 }
 0x205   : > { %3136 = vmatpush3.bf16.xpose.msra.mxu1 %v4063_v11  ;;  %v1132_v11 = vadd.f32 %v4119_v41, %v875_v42  ;;  %v1177_v41 = vadd.f32 %v1176_v30, %v875_v42 }
 0x206   : > { %3138 = vmatprep.subr.bf16.mxu1 %v4076_v25 }
 0x20d   : > { %3140 = vmatpush3.bf16.xpose.msra.mxu1 %v4076_v25  ;;  %v1137_v25 = vadd.f32 %v4132_v50, %v875_v42 }
 0x20e   : > { %3142 = vmatprep.subr.bf16.mxu1 %v4090_v36 }
 0x215   : > { %3144 = vmatpush3.bf16.xpose.msra.mxu1 %v4090_v36  ;;  %v1152_v36 = vadd.f32 %v4137_v61, %v875_v42 }
 0x21c   : > { %2898 = vmatmul.mubr.f32.vlgmr.msra.gmra.mrb[64].mxu1 %v1112_v52 }
 0x21d   : > { %2900 = vmatprep.mubr.f32.mxu1 %v1117_v60 }
 0x220   : > { %2901 = vmatmul.mubr.f32.gmra.mrb[66].mxu1 %v1122_v2 }
 0x221   : > { %2903 = vmatprep.mubr.f32.mxu1 %v1127_v21 }
 0x224   : > { %2904 = vmatmul.mubr.f32.gmra.mrb[68].mxu1 %v1132_v11 }
 0x225   : > { %2906 = vmatprep.mubr.f32.mxu1 %v1137_v25 }
 0x228   : > { %2907 = vmatmul.mubr.f32.gmra.mrb[70].mxu1 %v1142_v32 }
 0x229   : > { %2909 = vmatprep.mubr.f32.mxu1 %v1147_v35 }
 0x22c   : > { %2910 = vmatmul.mubr.f32.gmra.mrb[72].mxu1 %v1152_v36 }
 0x22d   : > { %2912 = vmatprep.mubr.f32.mxu1 %v1157_v28 }
 0x230   : > { %2913 = vmatmul.mubr.f32.gmra.mrb[74].mxu1 %v1162_v29 }
 0x231   : > { %2915 = vmatprep.mubr.f32.mxu1 %v1167_v31 }
 0x234   : > { %2916 = vmatmul.mubr.f32.gmra.mrb[76].mxu1 %v1172_v33 }
 0x235   : > { %2918 = vmatprep.mubr.f32.mxu1 %v1177_v41 }
 0x238   : > { %2919 = vmatmul.mubr.f32.gmra.mrb[78].mxu1 %v1182_v6 }
 0x2af   : > { %v2787_v49 = vpop.f32.mrb[48].mxu1 }
 0x2b0   : > { %v1350_v50 = vmul.f32 0.17677669, %v2787_v49  ;;  %v1270_v19 = vpop.f32.mrb[49].mxu1  ;;  %v2843_v54 = vpop.f32.mrb[48].mxu0 }
 0x2b1   : > { %v1705_v56 = vmul.f32 0.17677669, %v2843_v54  ;;  %v1625_v58 = vpop.f32.mrb[49].mxu0  ;;  %v1349_v59 = vmul.f32 0.17677669, %v1270_v19 }
 0x2b2   : > { %v4206_v61 = vsel %vm1187_vm0, %v1350_v50, -1e+30  ;;  %v1704_v7 = vmul.f32 0.17677669, %v1625_v58 }
 0x2b3   : > { %1385 = vmax.xlane.f32.xlu0 %v4206_v61  ;;  %v4211_v62 = vsel %vm1187_vm0, %v1705_v56, -1e+30  ;;  %v2790_v51 = vpop.f32.mrb[50].mxu1  ;;  %v4216_v8 = vsel %vm1187_vm0, %v1349_v59, -1e+30 }
 0x2b4   : > { %1738 = vmax.xlane.f32.xlu1 %v4211_v62  ;;  %v1352_v63 = vmul.f32 0.17677669, %v2790_v51  ;;  %v2846_v1 = vpop.f32.mrb[50].mxu0  ;;  %v1280_v3 = vpop.f32.mrb[51].mxu1  ;;  %v4230_v16 = vsel %vm1187_vm0, %v1704_v7, -1e+30 }
 0x2b5   : > { %v1635_v4 = vpop.f32.mrb[51].mxu0  ;;  %v1351_v5 = vmul.f32 0.17677669, %v1280_v3  ;;  %v1707_v17 = vmul.f32 0.17677669, %v2846_v1 }
 0x2b6   : > { %v4220_v9 = vsel %vm1187_vm0, %v1352_v63, -1e+30  ;;  %v1706_v15 = vmul.f32 0.17677669, %v1635_v4 }
 0x2b7   : > { %1383 = vmax.xlane.f32.xlu0 %v4216_v8  ;;  %v2793_v10 = vpop.f32.mrb[52].mxu1  ;;  %v4226_v13 = vsel %vm1187_vm0, %v1351_v5, -1e+30  ;;  %v4241_v30 = vsel %vm1187_vm0, %v1707_v17, -1e+30 }
 0x2b8   : > { %1389 = vmax.xlane.f32.xlu1 %v4220_v9  ;;  %v1290_v27 = vpop.f32.mrb[53].mxu1  ;;  %v2849_v12 = vpop.f32.mrb[52].mxu0  ;;  %v1354_v24 = vmul.f32 0.17677669, %v2793_v10  ;;  %v4236_v57 = vsel %vm1187_vm0, %v1706_v15, -1e+30 }
 0x2b9   : > { %v1645_v14 = vpop.f32.mrb[53].mxu0  ;;  %v1353_v20 = vmul.f32 0.17677669, %v1290_v27  ;;  %v1709_v42 = vmul.f32 0.17677669, %v2849_v12 }
 0x2ba   : > { %v1708_v0 = vmul.f32 0.17677669, %v1645_v14  ;;  %v4250_v40 = vsel %vm1187_vm0, %v1354_v24, -1e+30 }
 0x2bb   : > { %1736 = vmax.xlane.f32.xlu0 %v4230_v16  ;;  %v2796_v18 = vpop.f32.mrb[54].mxu1  ;;  %v4246_v34 = vsel %vm1187_vm0, %v1353_v20, -1e+30  ;;  %v4261_v60 = vsel %vm1187_vm0, %v1709_v42, -1e+30 }
 0x2bc   : > { %1387 = vmax.xlane.f32.xlu1 %v4226_v13  ;;  %v1300_v22 = vpop.f32.mrb[55].mxu1  ;;  %v2852_v23 = vpop.f32.mrb[54].mxu0  ;;  %v4256_v55 = vsel %vm1187_vm0, %v1708_v0, -1e+30  ;;  %v1356_v46 = vmul.f32 0.17677669, %v2796_v18 }
 0x2bd   : > { %v1655_v26 = vpop.f32.mrb[55].mxu0  ;;  %v1355_v44 = vmul.f32 0.17677669, %v1300_v22  ;;  %v1711_v36 = vmul.f32 0.17677669, %v2852_v23 }
 0x2be   : > { %v1710_v2 = vmul.f32 0.17677669, %v1655_v26  ;;  %v4270_v11 = vsel %vm1187_vm0, %v1356_v46, -1e+30 }
 0x2bf   : > { %1740 = vmax.xlane.f32.xlu0 %v4236_v57  ;;  %v2799_v39 = vpop.f32.mrb[56].mxu1  ;;  %v4266_v21 = vsel %vm1187_vm0, %v1355_v44, -1e+30  ;;  %v4281_v41 = vsel %vm1187_vm0, %v1711_v36, -1e+30 }
 0x2c0   : > { %1742 = vmax.xlane.f32.xlu1 %v4241_v30  ;;  %v1310_v37 = vpop.f32.mrb[57].mxu1  ;;  %v2855_v38 = vpop.f32.mrb[56].mxu0  ;;  %v4276_v29 = vsel %vm1187_vm0, %v1710_v2, -1e+30  ;;  %v1358_v33 = vmul.f32 0.17677669, %v2799_v39 }
 0x2c1   : > { %v1665_v53 = vpop.f32.mrb[57].mxu0  ;;  %v1357_v31 = vmul.f32 0.17677669, %v1310_v37  ;;  %v1713_v58 = vmul.f32 0.17677669, %v2855_v38 }
 0x2c2   : > { %v1712_v6 = vmul.f32 0.17677669, %v1665_v53  ;;  %v4290_v50 = vsel %vm1187_vm0, %v1358_v33, -1e+30 }
 0x2c3   : > { %1391 = vmax.xlane.f32.xlu0 %v4246_v34  ;;  %v2802_v43 = vpop.f32.mrb[58].mxu1  ;;  %v4286_v49 = vsel %vm1187_vm0, %v1357_v31, -1e+30  ;;  %v4301_v3 = vsel %vm1187_vm0, %v1713_v58, -1e+30 }
 0x2c4   : > { %1393 = vmax.xlane.f32.xlu1 %v4250_v40  ;;  %v1320_v47 = vpop.f32.mrb[59].mxu1  ;;  %v2858_v45 = vpop.f32.mrb[58].mxu0  ;;  %v4296_v51 = vsel %vm1187_vm0, %v1712_v6, -1e+30  ;;  %v1360_v1 = vmul.f32 0.17677669, %v2802_v43 }
 0x2c5   : > { %v1675_v52 = vpop.f32.mrb[59].mxu0  ;;  %v1359_v63 = vmul.f32 0.17677669, %v1320_v47  ;;  %v1715_v10 = vmul.f32 0.17677669, %v2858_v45 }
 0x2c6   : > { %v1714_v4 = vmul.f32 0.17677669, %v1675_v52  ;;  %v4310_v7 = vsel %vm1187_vm0, %v1360_v1, -1e+30 }
 0x2c7   : > { %1744 = vmax.xlane.f32.xlu0 %v4256_v55  ;;  %v2805_v25 = vpop.f32.mrb[60].mxu1  ;;  %v4306_v5 = vsel %vm1187_vm0, %v1359_v63, -1e+30  ;;  %v4321_v15 = vsel %vm1187_vm0, %v1715_v10, -1e+30 }
 0x2c8   : > { %1746 = vmax.xlane.f32.xlu1 %v4261_v60  ;;  %v1330_v32 = vpop.f32.mrb[61].mxu1  ;;  %v2861_v35 = vpop.f32.mrb[60].mxu0  ;;  %v4316_v27 = vsel %vm1187_vm0, %v1714_v4, -1e+30  ;;  %v1362_v14 = vmul.f32 0.17677669, %v2805_v25 }
 0x2c9   : > { %v1685_v28 = vpop.f32.mrb[61].mxu0  ;;  %v1361_v12 = vmul.f32 0.17677669, %v1330_v32  ;;  %v1717_v22 = vmul.f32 0.17677669, %v2861_v35 }
 0x2ca   : > { %v1716_v17 = vmul.f32 0.17677669, %v1685_v28  ;;  %v4330_v20 = vsel %vm1187_vm0, %v1362_v14, -1e+30 }
 0x2cb   : > { %1395 = vmax.xlane.f32.xlu0 %v4266_v21  ;;  %v2808_v19 = vpop.f32.mrb[62].mxu1  ;;  %v4326_v18 = vsel %vm1187_vm0, %v1361_v12, -1e+30  ;;  %v4341_v39 = vsel %vm1187_vm0, %v1717_v22, -1e+30 }
 0x2cc   : > { %1397 = vmax.xlane.f32.xlu1 %v4270_v11  ;;  %v1340_v54 = vpop.f32.mrb[63].mxu1  ;;  %v2864_v56 = vpop.f32.mrb[62].mxu0  ;;  %v4336_v23 = vsel %vm1187_vm0, %v1716_v17, -1e+30  ;;  %v1364_v26 = vmul.f32 0.17677669, %v2808_v19 }
 0x2cd   : > { %v1695_v59 = vpop.f32.mrb[63].mxu0  ;;  %v1363_v24 = vmul.f32 0.17677669, %v1340_v54  ;;  %v1719_v53 = vmul.f32 0.17677669, %v2864_v56 }
 0x2ce   : > { %v1718_v0 = vmul.f32 0.17677669, %v1695_v59  ;;  %v4350_v38 = vsel %vm1187_vm0, %v1364_v26, -1e+30 }
 0x2cf   : > { %1748 = vmax.xlane.f32.xlu0 %v4276_v29  ;;  %v4346_v37 = vsel %vm1187_vm0, %v1363_v24, -1e+30  ;;  %v4361_v44 = vsel %vm1187_vm0, %v1719_v53, -1e+30 }
 0x2d0   : > { %1750 = vmax.xlane.f32.xlu1 %v4281_v41  ;;  %v4356_v42 = vsel %vm1187_vm0, %v1718_v0, -1e+30 }
 0x2d3   : > { %1399 = vmax.xlane.f32.xlu0 %v4286_v49 }
 0x2d4   : > { %1401 = vmax.xlane.f32.xlu1 %v4290_v50 }
 0x2d7   : > { %1752 = vmax.xlane.f32.xlu0 %v4296_v51 }
 0x2d8   : > { %1754 = vmax.xlane.f32.xlu1 %v4301_v3 }
 0x2db   : > { %1403 = vmax.xlane.f32.xlu0 %v4306_v5 }
 0x2dc   : > { %1405 = vmax.xlane.f32.xlu1 %v4310_v7 }
 0x2df   : > { %1756 = vmax.xlane.f32.xlu0 %v4316_v27 }
 0x2e0   : > { %1758 = vmax.xlane.f32.xlu1 %v4321_v15 }
 0x2e3   : > { %1407 = vmax.xlane.f32.xlu0 %v4326_v18 }
 0x2e4   : > { %1409 = vmax.xlane.f32.xlu1 %v4330_v20 }
 0x2e7   : > { %1760 = vmax.xlane.f32.xlu0 %v4336_v23 }
 0x2e8   : > { %1762 = vmax.xlane.f32.xlu1 %v4341_v39 }
 0x2eb   : > { %1411 = vmax.xlane.f32.xlu0 %v4346_v37 }
 0x2ec   : > { %1413 = vmax.xlane.f32.xlu1 %v4350_v38 }
 0x2ef   : > { %v2899_v43 = vpop.f32.mrb[64].mxu1  ;;  %1764 = vmax.xlane.f32.xlu0 %v4356_v42 }
 0x2f0   : > { %v2059_v47 = vmul.f32 0.17677669, %v2899_v43  ;;  %1766 = vmax.xlane.f32.xlu1 %v4361_v44  ;;  %v1979_v45 = vpop.f32.mrb[65].mxu1 }
 0x2f1   : > { %v2058_v46 = vmul.f32 0.17677669, %v1979_v45 }
 0x2f2   : > { %v4366_v52 = vsel %vm1187_vm0, %v2059_v47, -1e+30 }
 0x2f3   : > { %v2902_v2 = vpop.f32.mrb[66].mxu1  ;;  %v4370_v25 = vsel %vm1187_vm0, %v2058_v46, -1e+30 }
 0x2f4   : > { %v2061_v32 = vmul.f32 0.17677669, %v2902_v2  ;;  %2092 = vmax.xlane.f32.xlu1 %v4366_v52  ;;  %v1989_v35 = vpop.f32.mrb[67].mxu1  ;;  %2090 = vmax.xlane.f32.xlu0 %v4370_v25 }
 0x2f5   : > { %v2060_v36 = vmul.f32 0.17677669, %v1989_v35 }
 0x2f6   : > { %v4376_v28 = vsel %vm1187_vm0, %v2061_v32, -1e+30 }
 0x2f7   : > { %v2905_v31 = vpop.f32.mrb[68].mxu1  ;;  %v4380_v33 = vsel %vm1187_vm0, %v2060_v36, -1e+30 }
 0x2f8   : > { %v2063_v6 = vmul.f32 0.17677669, %v2905_v31  ;;  %2096 = vmax.xlane.f32.xlu1 %v4376_v28  ;;  %v1999_v19 = vpop.f32.mrb[69].mxu1  ;;  %2094 = vmax.xlane.f32.xlu0 %v4380_v33 }
 0x2f9   : > { %v2062_v54 = vmul.f32 0.17677669, %v1999_v19 }
 0x2fa   : > { %v4386_v56 = vsel %vm1187_vm0, %v2063_v6, -1e+30 }
 0x2fb   : > { %v2908_v58 = vpop.f32.mrb[70].mxu1  ;;  %v4390_v59 = vsel %vm1187_vm0, %v2062_v54, -1e+30 }
 0x2fc   : > { %v2065_v63 = vmul.f32 0.17677669, %v2908_v58  ;;  %2100 = vmax.xlane.f32.xlu1 %v4386_v56  ;;  %v2009_v1 = vpop.f32.mrb[71].mxu1  ;;  %2098 = vmax.xlane.f32.xlu0 %v4390_v59 }
 0x2fd   : > { %v2064_v4 = vmul.f32 0.17677669, %v2009_v1 }
 0x2fe   : > { %v4396_v10 = vsel %vm1187_vm0, %v2065_v63, -1e+30 }
 0x2ff   : > { %v2911_v12 = vpop.f32.mrb[72].mxu1  ;;  %v4400_v14 = vsel %vm1187_vm0, %v2064_v4, -1e+30 }
 0x300   : > { %v2067_v17 = vmul.f32 0.17677669, %v2911_v12  ;;  %2104 = vmax.xlane.f32.xlu1 %v4396_v10  ;;  %v2019_v22 = vpop.f32.mrb[73].mxu1  ;;  %2102 = vmax.xlane.f32.xlu0 %v4400_v14 }
 0x301   : > { %v2066_v24 = vmul.f32 0.17677669, %v2019_v22 }
 0x302   : > { %v4406_v26 = vsel %vm1187_vm0, %v2067_v17, -1e+30 }
 0x303   : > { %v2914_v0 = vpop.f32.mrb[74].mxu1  ;;  %v4410_v53 = vsel %vm1187_vm0, %v2066_v24, -1e+30 }
 0x304   : > { %v2069_v43 = vmul.f32 0.17677669, %v2914_v0  ;;  %2108 = vmax.xlane.f32.xlu1 %v4406_v26  ;;  %v2029_v47 = vpop.f32.mrb[75].mxu1  ;;  %2106 = vmax.xlane.f32.xlu0 %v4410_v53 }
 0x305   : > { %v2068_v45 = vmul.f32 0.17677669, %v2029_v47 }
 0x306   : > { %v4416_v46 = vsel %vm1187_vm0, %v2069_v43, -1e+30 }
 0x307   : > { %v2917_v2 = vpop.f32.mrb[76].mxu1  ;;  %v4420_v32 = vsel %vm1187_vm0, %v2068_v45, -1e+30 }
 0x308   : > { %v2071_v35 = vmul.f32 0.17677669, %v2917_v2  ;;  %2112 = vmax.xlane.f32.xlu1 %v4416_v46  ;;  %v2039_v36 = vpop.f32.mrb[77].mxu1  ;;  %2110 = vmax.xlane.f32.xlu0 %v4420_v32 }
 0x309   : > { %v2070_v31 = vmul.f32 0.17677669, %v2039_v36 }
 0x30a   : > { %v4426_v6 = vsel %vm1187_vm0, %v2071_v35, -1e+30 }
 0x30b   : > { %v2920_v19 = vpop.f32.mrb[78].mxu1  ;;  %v4430_v54 = vsel %vm1187_vm0, %v2070_v31, -1e+30 }
 0x30c   : > { %v2073_v58 = vmul.f32 0.17677669, %v2920_v19  ;;  %2116 = vmax.xlane.f32.xlu1 %v4426_v6  ;;  %v2049_v63 = vpop.f32.mrb[79].mxu1  ;;  %2114 = vmax.xlane.f32.xlu0 %v4430_v54 }
 0x30d   : > { %v2072_v1 = vmul.f32 0.17677669, %v2049_v63 }
 0x30e   : > { %v4436_v4 = vsel %vm1187_vm0, %v2073_v58, -1e+30 }
 0x30f   : > { %v4440_v12 = vsel %vm1187_vm0, %v2072_v1, -1e+30 }
 0x310   : > { %2120 = vmax.xlane.f32.xlu1 %v4436_v4  ;;  %2118 = vmax.xlane.f32.xlu0 %v4440_v12 }
 0x340   : > { %v1386_v17 = vpop.xlane.xlu0 %1385 }
 0x341   : > { %v1416_v22 = vsub.f32 %v4206_v61, %v1386_v17  ;;  %v1739_v24 = vpop.xlane.xlu1 %1738 }
 0x342   : > { %v1769_v0 = vsub.f32 %v4211_v62, %v1739_v24 }
 0x343   : > { %v1433_v43 = vmul.f32 1.442695, %v1416_v22 }
 0x344   : > { %v1786_v47 = vmul.f32 1.442695, %v1769_v0  ;;  %v1384_v45 = vpop.xlane.xlu0 %1383 }
 0x345   : > { %3252 = vpow2.f32 %v1433_v43  ;;  %v1415_v2 = vsub.f32 %v4216_v8, %v1384_v45  ;;  %v1390_v35 = vpop.xlane.xlu1 %1389 }
 0x346   : > { %v1418_v48 = vsub.f32 %v4220_v9, %v1390_v35  ;;  %3254 = vpow2.f32 %v1786_v47 }
 0x347   : > { %v1431_v36 = vmul.f32 1.442695, %v1415_v2 }
 0x348   : > { %v1437_v31 = vmul.f32 1.442695, %v1418_v48  ;;  %v1737_v19 = vpop.xlane.xlu0 %1736 }
 0x349   : > { %3256 = vpow2.f32 %v1431_v36  ;;  %v1768_v58 = vsub.f32 %v4230_v16, %v1737_v19  ;;  %v1388_v61 = vpop.xlane.xlu1 %1387 }
 0x34a   : > { %v1417_v63 = vsub.f32 %v4226_v13, %v1388_v61  ;;  %3258 = vpow2.f32 %v1437_v31 }
 0x34b   : > { %v1784_v62 = vmul.f32 1.442695, %v1768_v58 }
 0x34c   : > { %v1741_v1 = vpop.xlane.xlu0 %1740  ;;  %v1435_v17 = vmul.f32 1.442695, %v1417_v63 }
 0x34d   : > { %3260 = vpow2.f32 %v1784_v62  ;;  %v1770_v8 = vsub.f32 %v4236_v57, %v1741_v1  ;;  %v1743_v22 = vpop.xlane.xlu1 %1742 }
 0x34e   : > { %v1771_v9 = vsub.f32 %v4241_v30, %v1743_v22  ;;  %3262 = vpow2.f32 %v1435_v17 }
 0x34f   : > { %v4452_v24 = vpop.eup %3252  ;;  %v1788_v16 = vmul.f32 1.442695, %v1770_v8 }
 0x350   : > { %v1790_v0 = vmul.f32 1.442695, %v1771_v9  ;;  %v1392_v43 = vpop.xlane.xlu0 %1391  ;;  %1465 = vadd.xlane.f32.xlu1 %v4452_v24  ;;  %v4456_v45 = vpop.eup %3254 }
 0x351   : > { %v1419_v13 = vsub.f32 %v4246_v34, %v1392_v43  ;;  %v1394_v47 = vpop.xlane.xlu1 %1393 }
 0x352   : > { %3264 = vpow2.f32 %v1790_v0  ;;  %v1420_v2 = vsub.f32 %v4250_v40, %v1394_v47 }
 0x353   : > { %v4459_v57 = vpop.eup %3256  ;;  %3266 = vpow2.f32 %v1788_v16  ;;  %v1439_v48 = vmul.f32 1.442695, %v1419_v13 }
 0x354   : > { %v1441_v35 = vmul.f32 1.442695, %v1420_v2  ;;  %v1745_v30 = vpop.xlane.xlu0 %1744  ;;  %1818 = vadd.xlane.f32.xlu1 %v4456_v45  ;;  %1463 = vadd.xlane.f32.xlu0 %v4459_v57  ;;  %v4464_v34 = vpop.eup %3258 }
 0x355   : > { %v1772_v36 = vsub.f32 %v4256_v55, %v1745_v30  ;;  %v1747_v31 = vpop.xlane.xlu1 %1746 }
 0x356   : > { %3268 = vpow2.f32 %v1441_v35  ;;  %v1773_v19 = vsub.f32 %v4261_v60, %v1747_v31 }
 0x357   : > { %v4467_v58 = vpop.eup %3260  ;;  %3270 = vpow2.f32 %v1439_v48  ;;  %v1792_v63 = vmul.f32 1.442695, %v1772_v36 }
 0x358   : > { %v1794_v40 = vmul.f32 1.442695, %v1773_v19  ;;  %v1396_v61 = vpop.xlane.xlu0 %1395  ;;  %1469 = vadd.xlane.f32.xlu1 %v4464_v34  ;;  %1816 = vadd.xlane.f32.xlu0 %v4467_v58  ;;  %v4473_v17 = vpop.eup %3262 }
 0x359   : > { %v1421_v62 = vsub.f32 %v4266_v21, %v1396_v61  ;;  %v1398_v1 = vpop.xlane.xlu1 %1397 }
 0x35a   : > { %3272 = vpow2.f32 %v1794_v40  ;;  %v1422_v55 = vsub.f32 %v4270_v11, %v1398_v1 }
 0x35b   : > { %3274 = vpow2.f32 %v1792_v63  ;;  %v1443_v9 = vmul.f32 1.442695, %v1421_v62 }
 0x35c   : > { %v4475_v8 = vpop.eup %3264  ;;  %v1445_v60 = vmul.f32 1.442695, %v1422_v55  ;;  %v1749_v22 = vpop.xlane.xlu0 %1748  ;;  %1467 = vadd.xlane.f32.xlu0 %v4473_v17 }
 0x35d   : > { %v1774_v0 = vsub.f32 %v4276_v29, %v1749_v22  ;;  %v1751_v43 = vpop.xlane.xlu1 %1750  ;;  %1822 = vadd.xlane.f32.xlu1 %v4475_v8  ;;  %v4481_v16 = vpop.eup %3266 }
 0x35e   : > { %3276 = vpow2.f32 %v1445_v60  ;;  %v1775_v21 = vsub.f32 %v4281_v41, %v1751_v43 }
 0x35f   : > { %3278 = vpow2.f32 %v1443_v9  ;;  %v1796_v2 = vmul.f32 1.442695, %v1774_v0 }
 0x360   : > { %v4483_v11 = vpop.eup %3268  ;;  %v1798_v13 = vmul.f32 1.442695, %v1775_v21  ;;  %v1400_v47 = vpop.xlane.xlu0 %1399  ;;  %1820 = vadd.xlane.f32.xlu0 %v4481_v16 }
 0x361   : > { %v1423_v35 = vsub.f32 %v4286_v49, %v1400_v47  ;;  %v1402_v30 = vpop.xlane.xlu1 %1401  ;;  %1473 = vadd.xlane.f32.xlu1 %v4483_v11  ;;  %v4489_v48 = vpop.eup %3270 }
 0x362   : > { %3280 = vpow2.f32 %v1798_v13  ;;  %v1424_v29 = vsub.f32 %v4290_v50, %v1402_v30 }
 0x363   : > { %3282 = vpow2.f32 %v1796_v2  ;;  %v1447_v19 = vmul.f32 1.442695, %v1423_v35 }
 0x364   : > { %v4491_v41 = vpop.eup %3272  ;;  %v1449_v36 = vmul.f32 1.442695, %v1424_v29  ;;  %v1753_v31 = vpop.xlane.xlu0 %1752  ;;  %1471 = vadd.xlane.f32.xlu0 %v4489_v48 }
 0x365   : > { %v1776_v40 = vsub.f32 %v4296_v51, %v1753_v31  ;;  %v1755_v61 = vpop.xlane.xlu1 %1754  ;;  %1826 = vadd.xlane.f32.xlu1 %v4491_v41  ;;  %v4497_v63 = vpop.eup %3274 }
 0x366   : > { %3284 = vpow2.f32 %v1449_v36  ;;  %v1777_v49 = vsub.f32 %v4301_v3, %v1755_v61 }
 0x367   : > { %3286 = vpow2.f32 %v1447_v19  ;;  %v1800_v55 = vmul.f32 1.442695, %v1776_v40 }
 0x368   : > { %v4499_v50 = vpop.eup %3276  ;;  %v1802_v62 = vmul.f32 1.442695, %v1777_v49  ;;  %v1404_v1 = vpop.xlane.xlu0 %1403  ;;  %1824 = vadd.xlane.f32.xlu0 %v4497_v63 }
 0x369   : > { %v1425_v60 = vsub.f32 %v4306_v5, %v1404_v1  ;;  %v1406_v22 = vpop.xlane.xlu1 %1405  ;;  %1477 = vadd.xlane.f32.xlu1 %v4499_v50  ;;  %v4505_v9 = vpop.eup %3278 }
 0x36a   : > { %3288 = vpow2.f32 %v1802_v62  ;;  %v1426_v51 = vsub.f32 %v4310_v7, %v1406_v22 }
 0x36b   : > { %3290 = vpow2.f32 %v1800_v55  ;;  %v1451_v21 = vmul.f32 1.442695, %v1425_v60 }
 0x36c   : > { %v4507_v3 = vpop.eup %3280  ;;  %v1453_v0 = vmul.f32 1.442695, %v1426_v51  ;;  %v1757_v43 = vpop.xlane.xlu0 %1756  ;;  %1475 = vadd.xlane.f32.xlu0 %v4505_v9 }
 0x36d   : > { %v1778_v13 = vsub.f32 %v4316_v27, %v1757_v43  ;;  %v1759_v47 = vpop.xlane.xlu1 %1758  ;;  %1830 = vadd.xlane.f32.xlu1 %v4507_v3  ;;  %v4513_v2 = vpop.eup %3282 }
 0x36e   : > { %3292 = vpow2.f32 %v1453_v0  ;;  %v1779_v5 = vsub.f32 %v4321_v15, %v1759_v47 }
 0x36f   : > { %3294 = vpow2.f32 %v1451_v21  ;;  %v1804_v29 = vmul.f32 1.442695, %v1778_v13 }
 0x370   : > { %v4515_v7 = vpop.eup %3284  ;;  %v1806_v35 = vmul.f32 1.442695, %v1779_v5  ;;  %v1408_v30 = vpop.xlane.xlu0 %1407  ;;  %1828 = vadd.xlane.f32.xlu0 %v4513_v2 }
 0x371   : > { %v1427_v36 = vsub.f32 %v4326_v18, %v1408_v30  ;;  %v1410_v31 = vpop.xlane.xlu1 %1409  ;;  %1481 = vadd.xlane.f32.xlu1 %v4515_v7  ;;  %v4521_v19 = vpop.eup %3286 }
 0x372   : > { %3296 = vpow2.f32 %v1806_v35  ;;  %v1428_v27 = vsub.f32 %v4330_v20, %v1410_v31 }
 0x373   : > { %3298 = vpow2.f32 %v1804_v29  ;;  %v1455_v49 = vmul.f32 1.442695, %v1427_v36 }
 0x374   : > { %v4523_v15 = vpop.eup %3288  ;;  %v1457_v40 = vmul.f32 1.442695, %v1428_v27  ;;  %v1761_v61 = vpop.xlane.xlu0 %1760  ;;  %1479 = vadd.xlane.f32.xlu0 %v4521_v19 }
 0x375   : > { %v1780_v62 = vsub.f32 %v4336_v23, %v1761_v61  ;;  %v1763_v1 = vpop.xlane.xlu1 %1762  ;;  %1834 = vadd.xlane.f32.xlu1 %v4523_v15  ;;  %v4529_v55 = vpop.eup %3290 }
 0x376   : > { %3300 = vpow2.f32 %v1457_v40  ;;  %v1781_v18 = vsub.f32 %v4341_v39, %v1763_v1 }
 0x377   : > { %3302 = vpow2.f32 %v1455_v49  ;;  %v1808_v51 = vmul.f32 1.442695, %v1780_v62 }
 0x378   : > { %v4531_v20 = vpop.eup %3292  ;;  %v1810_v60 = vmul.f32 1.442695, %v1781_v18  ;;  %1832 = vadd.xlane.f32.xlu0 %v4529_v55  ;;  %v1412_v22 = vpop.xlane.xlu0 %1411 }
 0x379   : > { %v1429_v0 = vsub.f32 %v4346_v37, %v1412_v22  ;;  %v1414_v43 = vpop.xlane.xlu1 %1413  ;;  %1485 = vadd.xlane.f32.xlu1 %v4531_v20  ;;  %v4537_v21 = vpop.eup %3294 }
 0x37a   : > { %3304 = vpow2.f32 %v1810_v60  ;;  %v1430_v23 = vsub.f32 %v4350_v38, %v1414_v43 }
 0x37b   : > { %3306 = vpow2.f32 %v1808_v51  ;;  %v1459_v5 = vmul.f32 1.442695, %v1429_v0 }
 0x37c   : > { %v4539_v39 = vpop.eup %3296  ;;  %v1461_v13 = vmul.f32 1.442695, %v1430_v23  ;;  %1483 = vadd.xlane.f32.xlu0 %v4537_v21  ;;  %v1765_v47 = vpop.xlane.xlu0 %1764 }
 0x37d   : > { %v1782_v35 = vsub.f32 %v4356_v42, %v1765_v47  ;;  %v1767_v30 = vpop.xlane.xlu1 %1766  ;;  %1838 = vadd.xlane.f32.xlu1 %v4539_v39  ;;  %v4545_v29 = vpop.eup %3298 }
 0x37e   : > { %3308 = vpow2.f32 %v1461_v13  ;;  %v1783_v37 = vsub.f32 %v4361_v44, %v1767_v30 }
 0x37f   : > { %3310 = vpow2.f32 %v1459_v5  ;;  %v1812_v31 = vmul.f32 1.442695, %v1782_v35 }
 0x380   : > { %v4547_v38 = vpop.eup %3300  ;;  %v1814_v36 = vmul.f32 1.442695, %v1783_v37  ;;  %1836 = vadd.xlane.f32.xlu0 %v4545_v29 }
 0x381   : > { %v2093_v27 = vpop.xlane.xlu1 %2092  ;;  %1489 = vadd.xlane.f32.xlu1 %v4547_v38  ;;  %v2091_v40 = vpop.xlane.xlu0 %2090 }
 0x382   : > { %3312 = vpow2.f32 %v1814_v36  ;;  %v2123_v42 = vsub.f32 %v4366_v52, %v2093_v27  ;;  %v2122_v61 = vsub.f32 %v4370_v25, %v2091_v40  ;;  %v4553_v49 = vpop.eup %3302 }
 0x383   : > { %3314 = vpow2.f32 %v1812_v31 }
 0x384   : > { %v4555_v44 = vpop.eup %3304  ;;  %v2140_v62 = vmul.f32 1.442695, %v2123_v42  ;;  %1487 = vadd.xlane.f32.xlu0 %v4553_v49  ;;  %v2138_v1 = vmul.f32 1.442695, %v2122_v61 }
 0x385   : > { %v2097_v18 = vpop.xlane.xlu1 %2096  ;;  %1842 = vadd.xlane.f32.xlu1 %v4555_v44  ;;  %v2095_v60 = vpop.xlane.xlu0 %2094 }
 0x386   : > { %3316 = vpow2.f32 %v2140_v62  ;;  %v2125_v22 = vsub.f32 %v4376_v28, %v2097_v18  ;;  %v2124_v52 = vsub.f32 %v4380_v33, %v2095_v60  ;;  %v4561_v51 = vpop.eup %3306 }
 0x387   : > { %3318 = vpow2.f32 %v2138_v1 }
 0x388   : > { %v4563_v25 = vpop.eup %3308  ;;  %v2144_v0 = vmul.f32 1.442695, %v2125_v22  ;;  %1840 = vadd.xlane.f32.xlu0 %v4561_v51  ;;  %v2142_v43 = vmul.f32 1.442695, %v2124_v52 }
 0x389   : > { %v2101_v23 = vpop.xlane.xlu1 %2100  ;;  %1493 = vadd.xlane.f32.xlu1 %v4563_v25  ;;  %v2099_v13 = vpop.xlane.xlu0 %2098 }
 0x38a   : > { %3320 = vpow2.f32 %v2144_v0  ;;  %v2127_v47 = vsub.f32 %v4386_v56, %v2101_v23  ;;  %v2126_v28 = vsub.f32 %v4390_v59, %v2099_v13  ;;  %v4569_v5 = vpop.eup %3310 }
 0x38b   : > { %3322 = vpow2.f32 %v2142_v43 }
 0x38c   : > { %v4571_v33 = vpop.eup %3312  ;;  %v2148_v35 = vmul.f32 1.442695, %v2127_v47  ;;  %1491 = vadd.xlane.f32.xlu0 %v4569_v5  ;;  %v2146_v30 = vmul.f32 1.442695, %v2126_v28 }
 0x38d   : > { %v2105_v37 = vpop.xlane.xlu1 %2104  ;;  %1846 = vadd.xlane.f32.xlu1 %v4571_v33  ;;  %v2103_v36 = vpop.xlane.xlu0 %2102 }
 0x38e   : > { %3324 = vpow2.f32 %v2148_v35  ;;  %v2129_v31 = vsub.f32 %v4396_v10, %v2105_v37  ;;  %v2128_v56 = vsub.f32 %v4400_v14, %v2103_v36  ;;  %v4577_v27 = vpop.eup %3314 }
 0x38f   : > { %3326 = vpow2.f32 %v2146_v30 }
 0x390   : > { %v4579_v59 = vpop.eup %3316  ;;  %v2152_v40 = vmul.f32 1.442695, %v2129_v31  ;;  %1844 = vadd.xlane.f32.xlu0 %v4577_v27  ;;  %v2150_v42 = vmul.f32 1.442695, %v2128_v56 }
 0x391   : > { %v2109_v61 = vpop.xlane.xlu1 %2108  ;;  %2172 = vadd.xlane.f32.xlu1 %v4579_v59  ;;  %v2107_v62 = vpop.xlane.xlu0 %2106 }
 0x392   : > { %3328 = vpow2.f32 %v2152_v40  ;;  %v2131_v1 = vsub.f32 %v4406_v26, %v2109_v61  ;;  %v2130_v10 = vsub.f32 %v4410_v53, %v2107_v62  ;;  %v4585_v18 = vpop.eup %3318 }
 0x393   : > { %3330 = vpow2.f32 %v2150_v42 }
 0x394   : > { %v4587_v14 = vpop.eup %3320  ;;  %v2156_v60 = vmul.f32 1.442695, %v2131_v1  ;;  %2170 = vadd.xlane.f32.xlu0 %v4585_v18  ;;  %v2154_v22 = vmul.f32 1.442695, %v2130_v10 }
 0x395   : > { %v2113_v52 = vpop.xlane.xlu1 %2112  ;;  %2176 = vadd.xlane.f32.xlu1 %v4587_v14  ;;  %v2111_v0 = vpop.xlane.xlu0 %2110 }
 0x396   : > { %3332 = vpow2.f32 %v2156_v60  ;;  %v2133_v43 = vsub.f32 %v4416_v46, %v2113_v52  ;;  %v2132_v26 = vsub.f32 %v4420_v32, %v2111_v0  ;;  %v4593_v23 = vpop.eup %3322 }
 0x397   : > { %3334 = vpow2.f32 %v2154_v22 }
 0x398   : > { %v4595_v53 = vpop.eup %3324  ;;  %v2160_v13 = vmul.f32 1.442695, %v2133_v43  ;;  %2174 = vadd.xlane.f32.xlu0 %v4593_v23  ;;  %v2158_v47 = vmul.f32 1.442695, %v2132_v26 }
 0x399   : > { %v2117_v28 = vpop.xlane.xlu1 %2116  ;;  %2180 = vadd.xlane.f32.xlu1 %v4595_v53  ;;  %v2115_v35 = vpop.xlane.xlu0 %2114 }
 0x39a   : > { %3336 = vpow2.f32 %v2160_v13  ;;  %v2135_v30 = vsub.f32 %v4426_v6, %v2117_v28  ;;  %v2134_v46 = vsub.f32 %v4430_v54, %v2115_v35  ;;  %v4601_v37 = vpop.eup %3326 }
 0x39b   : > { %3338 = vpow2.f32 %v2158_v47 }
 0x39c   : > { %v4603_v32 = vpop.eup %3328  ;;  %v2164_v36 = vmul.f32 1.442695, %v2135_v30  ;;  %2178 = vadd.xlane.f32.xlu0 %v4601_v37  ;;  %v2162_v31 = vmul.f32 1.442695, %v2134_v46 }
 0x39d   : > { %2184 = vadd.xlane.f32.xlu1 %v4603_v32  ;;  %v2121_v56 = vpop.xlane.xlu1 %2120  ;;  %v2119_v40 = vpop.xlane.xlu0 %2118 }
 0x39e   : > { %3340 = vpow2.f32 %v2164_v36  ;;  %v2137_v42 = vsub.f32 %v4436_v4, %v2121_v56  ;;  %v2136_v6 = vsub.f32 %v4440_v12, %v2119_v40  ;;  %v4609_v61 = vpop.eup %3330 }
 0x39f   : > { %3342 = vpow2.f32 %v2162_v31 }
 0x3a0   : > { %v4611_v54 = vpop.eup %3332  ;;  %v2168_v62 = vmul.f32 1.442695, %v2137_v42  ;;  %2182 = vadd.xlane.f32.xlu0 %v4609_v61  ;;  %v2166_v1 = vmul.f32 1.442695, %v2136_v6 }
 0x3a1   : > { %2188 = vadd.xlane.f32.xlu1 %v4611_v54  ;;  %v4615_v10 = vpop.eup %3334 }
 0x3a2   : > { %3344 = vpow2.f32 %v2168_v62 }
 0x3a3   : > { %3346 = vpow2.f32 %v2166_v1 }
 0x3a4   : > { %v4617_v60 = vpop.eup %3336  ;;  %2186 = vadd.xlane.f32.xlu0 %v4615_v10 }
 0x3a5   : > { %2192 = vadd.xlane.f32.xlu1 %v4617_v60  ;;  %v4621_v4 = vpop.eup %3338 }
 0x3a8   : > { %v4623_v12 = vpop.eup %3340  ;;  %2190 = vadd.xlane.f32.xlu0 %v4621_v4 }
 0x3a9   : > { %2196 = vadd.xlane.f32.xlu1 %v4623_v12  ;;  %v4627_v22 = vpop.eup %3342 }
 0x3ac   : > { %v4629_v52 = vpop.eup %3344  ;;  %2194 = vadd.xlane.f32.xlu0 %v4627_v22 }
 0x3ad   : > { %2200 = vadd.xlane.f32.xlu1 %v4629_v52  ;;  %v4633_v0 = vpop.eup %3346 }
 0x3b0   : > { %2198 = vadd.xlane.f32.xlu0 %v4633_v0 }
 0x3dd   : > { %v1466_v43 = vpop.xlane.xlu1 %1465 }
 0x3de   : > { %3348 = vrcp.f32 %v1466_v43 }
 0x3e1   : > { %v1819_v26 = vpop.xlane.xlu1 %1818  ;;  %v1464_v13 = vpop.xlane.xlu0 %1463 }
 0x3e2   : > { %3350 = vrcp.f32 %v1819_v26 }
 0x3e3   : > { %3352 = vrcp.f32 %v1464_v13 }
 0x3e5   : > { %v1470_v47 = vpop.xlane.xlu1 %1469  ;;  %v1817_v28 = vpop.xlane.xlu0 %1816 }
 0x3e6   : > { %3354 = vrcp.f32 %v1470_v47 }
 0x3e7   : > { %3356 = vrcp.f32 %v1817_v28 }
 0x3e8   : > { %v3349_v35 = vpop.eup %3348 }
 0x3e9   : > { %v1512_v30 = vmul.f32 %v3349_v35, %v4452_v24  ;;  %v1468_v46 = vpop.xlane.xlu0 %1467 }
 0x3ea   : > { %3358 = vrcp.f32 %v1468_v46  ;;  %v1823_v36 = vpop.xlane.xlu1 %1822 }
 0x3eb   : > { %1528 = vst [vmem:[%s4638_s19 + $0x8] sm:$0xff] %v1512_v30  ;;  %3360 = vrcp.f32 %v1823_v36 }
 0x3ec   : > { %v3351_v31 = vpop.eup %3350 }
 0x3ed   : > { %v3353_v56 = vpop.eup %3352  ;;  %v1865_v40 = vmul.f32 %v3351_v31, %v4456_v45  ;;  %v1821_v42 = vpop.xlane.xlu0 %1820 }
 0x3ee   : > { %v1511_v6 = vmul.f32 %v3353_v56, %v4459_v57  ;;  %3362 = vrcp.f32 %v1821_v42  ;;  %v1474_v24 = vpop.xlane.xlu1 %1473 }
 0x3ef   : > { %2443 = vst [vmem:[%s4638_s19 + $0x88] sm:$0xff] %v1865_v40  ;;  %3364 = vrcp.f32 %v1474_v24 }
 0x3f0   : > { %v3355_v62 = vpop.eup %3354  ;;  %1527 = vst [vmem:[%s4638_s19] sm:$0xff] %v1511_v6 }
 0x3f1   : > { %v3357_v1 = vpop.eup %3356  ;;  %v1514_v43 = vmul.f32 %v3355_v62, %v4464_v34  ;;  %v1472_v26 = vpop.xlane.xlu0 %1471 }
 0x3f2   : > { %v1864_v13 = vmul.f32 %v3357_v1, %v4467_v58  ;;  %3366 = vrcp.f32 %v1472_v26  ;;  %v1827_v45 = vpop.xlane.xlu1 %1826 }
 0x3f3   : > { %1530 = vst [vmem:[%s4638_s19 + $0x18] sm:$0xff] %v1514_v43  ;;  %3368 = vrcp.f32 %v1827_v45 }
 0x3f4   : > { %v3359_v57 = vpop.eup %3358  ;;  %2442 = vst [vmem:[%s4638_s19 + $0x80] sm:$0xff] %v1864_v13 }
 0x3f5   : > { %v3361_v47 = vpop.eup %3360  ;;  %v1513_v28 = vmul.f32 %v3359_v57, %v4473_v17  ;;  %v1825_v35 = vpop.xlane.xlu0 %1824 }
 0x3f6   : > { %v1867_v30 = vmul.f32 %v3361_v47, %v4475_v8  ;;  %3370 = vrcp.f32 %v1825_v35  ;;  %v1478_v34 = vpop.xlane.xlu1 %1477 }
 0x3f7   : > { %1529 = vst [vmem:[%s4638_s19 + $0x10] sm:$0xff] %v1513_v28  ;;  %3372 = vrcp.f32 %v1478_v34 }
 0x3f8   : > { %v3363_v58 = vpop.eup %3362  ;;  %2445 = vst [vmem:[%s4638_s19 + $0x98] sm:$0xff] %v1867_v30 }
 0x3f9   : > { %v3365_v46 = vpop.eup %3364  ;;  %v1866_v36 = vmul.f32 %v3363_v58, %v4481_v16  ;;  %v1476_v31 = vpop.xlane.xlu0 %1475 }
 0x3fa   : > { %v1516_v56 = vmul.f32 %v3365_v46, %v4483_v11  ;;  %3374 = vrcp.f32 %v1476_v31  ;;  %v1831_v17 = vpop.xlane.xlu1 %1830 }
 0x3fb   : > { %2444 = vst [vmem:[%s4638_s19 + $0x90] sm:$0xff] %v1866_v36  ;;  %3376 = vrcp.f32 %v1831_v17 }
 0x3fc   : > { %v3367_v8 = vpop.eup %3366  ;;  %1532 = vst [vmem:[%s4638_s19 + $0x28] sm:$0xff] %v1516_v56 }
 0x3fd   : > { %v3369_v40 = vpop.eup %3368  ;;  %v1515_v42 = vmul.f32 %v3367_v8, %v4489_v48  ;;  %v1829_v6 = vpop.xlane.xlu0 %1828 }
 0x3fe   : > { %v1869_v24 = vmul.f32 %v3369_v40, %v4491_v41  ;;  %3378 = vrcp.f32 %v1829_v6  ;;  %v1482_v16 = vpop.xlane.xlu1 %1481 }
 0x3ff   : > { %1531 = vst [vmem:[%s4638_s19 + $0x20] sm:$0xff] %v1515_v42  ;;  %3380 = vrcp.f32 %v1482_v16 }
 0x400   : > { %v3371_v11 = vpop.eup %3370  ;;  %2447 = vst [vmem:[%s4638_s19 + $0xa8] sm:$0xff] %v1869_v24 }
 0x401   : > { %v3373_v62 = vpop.eup %3372  ;;  %v1868_v1 = vmul.f32 %v3371_v11, %v4497_v63  ;;  %v1480_v43 = vpop.xlane.xlu0 %1479 }
 0x402   : > { %v1518_v26 = vmul.f32 %v3373_v62, %v4499_v50  ;;  %3382 = vrcp.f32 %v1480_v43  ;;  %v1835_v48 = vpop.xlane.xlu1 %1834 }
 0x403   : > { %2446 = vst [vmem:[%s4638_s19 + $0xa0] sm:$0xff] %v1868_v1  ;;  %3384 = vrcp.f32 %v1835_v48 }
 0x404   : > { %v3375_v41 = vpop.eup %3374  ;;  %1534 = vst [vmem:[%s4638_s19 + $0x38] sm:$0xff] %v1518_v26 }
 0x405   : > { %v3377_v13 = vpop.eup %3376  ;;  %v1517_v45 = vmul.f32 %v3375_v41, %v4505_v9  ;;  %v1833_v57 = vpop.xlane.xlu0 %1832 }
 0x406   : > { %v1871_v47 = vmul.f32 %v3377_v13, %v4507_v3  ;;  %3386 = vrcp.f32 %v1833_v57  ;;  %v1486_v63 = vpop.xlane.xlu1 %1485 }
 0x407   : > { %1533 = vst [vmem:[%s4638_s19 + $0x30] sm:$0xff] %v1517_v45  ;;  %3388 = vrcp.f32 %v1486_v63 }
 0x408   : > { %v3379_v50 = vpop.eup %3378  ;;  %2449 = vst [vmem:[%s4638_s19 + $0xb8] sm:$0xff] %v1871_v47 }
 0x409   : > { %v3381_v28 = vpop.eup %3380  ;;  %v1870_v35 = vmul.f32 %v3379_v50, %v4513_v2  ;;  %v1484_v30 = vpop.xlane.xlu0 %1483 }
 0x40a   : > { %v1520_v34 = vmul.f32 %v3381_v28, %v4515_v7  ;;  %3390 = vrcp.f32 %v1484_v30  ;;  %v1839_v9 = vpop.xlane.xlu1 %1838 }
 0x40b   : > { %2448 = vst [vmem:[%s4638_s19 + $0xb0] sm:$0xff] %v1870_v35  ;;  %3392 = vrcp.f32 %v1839_v9 }
 0x40c   : > { %v3383_v3 = vpop.eup %3382  ;;  %1536 = vst [vmem:[%s4638_s19 + $0x48] sm:$0xff] %v1520_v34 }
 0x40d   : > { %v3385_v58 = vpop.eup %3384  ;;  %v1519_v46 = vmul.f32 %v3383_v3, %v4521_v19  ;;  %v1837_v36 = vpop.xlane.xlu0 %1836 }
 0x40e   : > { %v1873_v31 = vmul.f32 %v3385_v58, %v4523_v15  ;;  %3394 = vrcp.f32 %v1837_v36  ;;  %v1490_v2 = vpop.xlane.xlu1 %1489 }
 0x40f   : > { %1535 = vst [vmem:[%s4638_s19 + $0x40] sm:$0xff] %v1519_v46  ;;  %3396 = vrcp.f32 %v1490_v2 }
 0x410   : > { %v3387_v7 = vpop.eup %3386  ;;  %2451 = vst [vmem:[%s4638_s19 + $0xc8] sm:$0xff] %v1873_v31 }
 0x411   : > { %v3389_v56 = vpop.eup %3388  ;;  %v1872_v17 = vmul.f32 %v3387_v7, %v4529_v55  ;;  %v1488_v8 = vpop.xlane.xlu0 %1487 }
 0x412   : > { %v1522_v40 = vmul.f32 %v3389_v56, %v4531_v20  ;;  %3398 = vrcp.f32 %v1488_v8  ;;  %v1843_v19 = vpop.xlane.xlu1 %1842 }
 0x413   : > { %2450 = vst [vmem:[%s4638_s19 + $0xc0] sm:$0xff] %v1872_v17  ;;  %3400 = vrcp.f32 %v1843_v19 }
 0x414   : > { %v3391_v15 = vpop.eup %3390  ;;  %1538 = vst [vmem:[%s4638_s19 + $0x58] sm:$0xff] %v1522_v40 }
 0x415   : > { %v3393_v42 = vpop.eup %3392  ;;  %v1521_v6 = vmul.f32 %v3391_v15, %v4537_v21  ;;  %v1841_v24 = vpop.xlane.xlu0 %1840 }
 0x416   : > { %v1875_v16 = vmul.f32 %v3393_v42, %v4539_v39  ;;  %3402 = vrcp.f32 %v1841_v24  ;;  %v1494_v55 = vpop.xlane.xlu1 %1493 }
 0x417   : > { %1537 = vst [vmem:[%s4638_s19 + $0x50] sm:$0xff] %v1521_v6  ;;  %3404 = vrcp.f32 %v1494_v55 }
 0x418   : > { %v3395_v20 = vpop.eup %3394  ;;  %2453 = vst [vmem:[%s4638_s19 + $0xd8] sm:$0xff] %v1875_v16 }
 0x419   : > { %v3397_v11 = vpop.eup %3396  ;;  %v1874_v62 = vmul.f32 %v3395_v20, %v4545_v29  ;;  %v1492_v1 = vpop.xlane.xlu0 %1491 }
 0x41a   : > { %v1524_v43 = vmul.f32 %v3397_v11, %v4547_v38  ;;  %3406 = vrcp.f32 %v1492_v1  ;;  %v1847_v21 = vpop.xlane.xlu1 %1846 }
 0x41b   : > { %2452 = vst [vmem:[%s4638_s19 + $0xd0] sm:$0xff] %v1874_v62  ;;  %3408 = vrcp.f32 %v1847_v21 }
 0x41c   : > { %v3399_v39 = vpop.eup %3398  ;;  %1540 = vst [vmem:[%s4638_s19 + $0x68] sm:$0xff] %v1524_v43 }
 0x41d   : > { %v3401_v26 = vpop.eup %3400  ;;  %v1523_v48 = vmul.f32 %v3399_v39, %v4553_v49  ;;  %v1845_v41 = vpop.xlane.xlu0 %1844 }
 0x41e   : > { %v1877_v13 = vmul.f32 %v3401_v26, %v4555_v44  ;;  %3410 = vrcp.f32 %v1845_v41  ;;  %v2173_v29 = vpop.xlane.xlu1 %2172 }
 0x41f   : > { %1539 = vst [vmem:[%s4638_s19 + $0x60] sm:$0xff] %v1523_v48  ;;  %3412 = vrcp.f32 %v2173_v29 }
 0x420   : > { %v3403_v38 = vpop.eup %3402  ;;  %2455 = vst [vmem:[%s4638_s19 + $0xe8] sm:$0xff] %v1877_v13 }
 0x421   : > { %v3405_v45 = vpop.eup %3404  ;;  %v1876_v57 = vmul.f32 %v3403_v38, %v4561_v51  ;;  %v2171_v47 = vpop.xlane.xlu0 %2170 }
 0x422   : > { %v1526_v63 = vmul.f32 %v3405_v45, %v4563_v25  ;;  %3414 = vrcp.f32 %v2171_v47  ;;  %v2177_v49 = vpop.xlane.xlu1 %2176 }
 0x423   : > { %2454 = vst [vmem:[%s4638_s19 + $0xe0] sm:$0xff] %v1876_v57  ;;  %3416 = vrcp.f32 %v2177_v49 }
 0x424   : > { %v3407_v44 = vpop.eup %3406  ;;  %1542 = vst [vmem:[%s4638_s19 + $0x78] sm:$0xff] %v1526_v63 }
 0x425   : > { %v3409_v50 = vpop.eup %3408  ;;  %v1525_v28 = vmul.f32 %v3407_v44, %v4569_v5  ;;  %v2175_v35 = vpop.xlane.xlu0 %2174 }
 0x426   : > { %v1879_v30 = vmul.f32 %v3409_v50, %v4571_v33  ;;  %3418 = vrcp.f32 %v2175_v35  ;;  %v2181_v51 = vpop.xlane.xlu1 %2180 }
 0x427   : > { %1541 = vst [vmem:[%s4638_s19 + $0x70] sm:$0xff] %v1525_v28  ;;  %3420 = vrcp.f32 %v2181_v51 }
 0x428   : > { %v3411_v25 = vpop.eup %3410  ;;  %2457 = vst [vmem:[%s4638_s19 + $0xf8] sm:$0xff] %v1879_v30 }
 0x429   : > { %v3413_v34 = vpop.eup %3412  ;;  %v1878_v9 = vmul.f32 %v3411_v25, %v4577_v27  ;;  %v2179_v3 = vpop.xlane.xlu0 %2178 }
 0x42a   : > { %v2219_v58 = vmul.f32 %v3413_v34, %v4579_v59  ;;  %3422 = vrcp.f32 %v2179_v3  ;;  %v2185_v5 = vpop.xlane.xlu1 %2184 }
 0x42b   : > { %2456 = vst [vmem:[%s4638_s19 + $0xf0] sm:$0xff] %v1878_v9  ;;  %3424 = vrcp.f32 %v2185_v5 }
 0x42c   : > { %v3415_v33 = vpop.eup %3414  ;;  %2459 = vst [vmem:[%s4638_s19 + $0x108] sm:$0xff] %v2219_v58 }
 0x42d   : > { %v3417_v46 = vpop.eup %3416  ;;  %v2218_v36 = vmul.f32 %v3415_v33, %v4585_v18  ;;  %v2183_v31 = vpop.xlane.xlu0 %2182 }
 0x42e   : > { %v2221_v2 = vmul.f32 %v3417_v46, %v4587_v14  ;;  %3426 = vrcp.f32 %v2183_v31  ;;  %v2189_v27 = vpop.xlane.xlu1 %2188 }
 0x42f   : > { %2458 = vst [vmem:[%s4638_s19 + $0x100] sm:$0xff] %v2218_v36  ;;  %3428 = vrcp.f32 %v2189_v27 }
 0x430   : > { %v3419_v59 = vpop.eup %3418  ;;  %2461 = vst [vmem:[%s4638_s19 + $0x118] sm:$0xff] %v2221_v2 }
 0x431   : > { %v3421_v7 = vpop.eup %3420  ;;  %v2220_v56 = vmul.f32 %v3419_v59, %v4593_v23  ;;  %v2187_v17 = vpop.xlane.xlu0 %2186 }
 0x432   : > { %v2223_v8 = vmul.f32 %v3421_v7, %v4595_v53  ;;  %3430 = vrcp.f32 %v2187_v17  ;;  %v2193_v18 = vpop.xlane.xlu1 %2192 }
 0x433   : > { %2460 = vst [vmem:[%s4638_s19 + $0x110] sm:$0xff] %v2220_v56  ;;  %3432 = vrcp.f32 %v2193_v18 }
 0x434   : > { %v3423_v14 = vpop.eup %3422  ;;  %2463 = vst [vmem:[%s4638_s19 + $0x128] sm:$0xff] %v2223_v8 }
 0x435   : > { %v3425_v40 = vpop.eup %3424  ;;  %v2222_v19 = vmul.f32 %v3423_v14, %v4601_v37  ;;  %v2191_v15 = vpop.xlane.xlu0 %2190 }
 0x436   : > { %v2225_v42 = vmul.f32 %v3425_v40, %v4603_v32  ;;  %3434 = vrcp.f32 %v2191_v15  ;;  %v2197_v23 = vpop.xlane.xlu1 %2196 }
 0x437   : > { %2462 = vst [vmem:[%s4638_s19 + $0x120] sm:$0xff] %v2222_v19  ;;  %3436 = vrcp.f32 %v2197_v23 }
 0x438   : > { %v3427_v53 = vpop.eup %3426  ;;  %2465 = vst [vmem:[%s4638_s19 + $0x138] sm:$0xff] %v2225_v42 }
 0x439   : > { %v3429_v6 = vpop.eup %3428  ;;  %v2224_v24 = vmul.f32 %v3427_v53, %v4609_v61  ;;  %v2195_v16 = vpop.xlane.xlu0 %2194 }
 0x43a   : > { %v2227_v55 = vmul.f32 %v3429_v6, %v4611_v54  ;;  %3438 = vrcp.f32 %v2195_v16  ;;  %v2201_v37 = vpop.xlane.xlu1 %2200 }
 0x43b   : > { %2464 = vst [vmem:[%s4638_s19 + $0x130] sm:$0xff] %v2224_v24  ;;  %3440 = vrcp.f32 %v2201_v37 }
 0x43c   : > { %v3431_v32 = vpop.eup %3430  ;;  %2467 = vst [vmem:[%s4638_s19 + $0x148] sm:$0xff] %v2227_v55 }
 0x43d   : > { %v3433_v20 = vpop.eup %3432  ;;  %v2226_v11 = vmul.f32 %v3431_v32, %v4615_v10  ;;  %v2199_v62 = vpop.xlane.xlu0 %2198 }
 0x43e   : > { %v2229_v1 = vmul.f32 %v3433_v20, %v4617_v60  ;;  %3442 = vrcp.f32 %v2199_v62 }
 0x43f   : > { %2466 = vst [vmem:[%s4638_s19 + $0x140] sm:$0xff] %v2226_v11 }
 0x440   : > { %v3435_v61 = vpop.eup %3434  ;;  %2469 = vst [vmem:[%s4638_s19 + $0x158] sm:$0xff] %v2229_v1 }
 0x441   : > { %v3437_v54 = vpop.eup %3436  ;;  %v2228_v43 = vmul.f32 %v3435_v61, %v4621_v4 }
 0x442   : > { %v2231_v21 = vmul.f32 %v3437_v54, %v4623_v12 }
 0x443   : > { %2468 = vst [vmem:[%s4638_s19 + $0x150] sm:$0xff] %v2228_v43 }
 0x444   : > { %v3439_v39 = vpop.eup %3438  ;;  %2471 = vst [vmem:[%s4638_s19 + $0x168] sm:$0xff] %v2231_v21 }
 0x445   : > { %v3441_v10 = vpop.eup %3440  ;;  %v2230_v26 = vmul.f32 %v3439_v39, %v4627_v22 }
 0x446   : > { %v2233_v60 = vmul.f32 %v3441_v10, %v4629_v52 }
 0x447   : > { %2470 = vst [vmem:[%s4638_s19 + $0x160] sm:$0xff] %v2230_v26 }
 0x448   : > { %v3443_v48 = vpop.eup %3442  ;;  %2473 = vst [vmem:[%s4638_s19 + $0x178] sm:$0xff] %v2233_v60 }
 0x449   : > { %v2232_v41 = vmul.f32 %v3443_v48, %v4633_v0 }
 0x44b   : > { %2472 = vst [vmem:[%s4638_s19 + $0x170] sm:$0xff] %v2232_v41 }
 0x44c   : > { %s2480_s17 = sshll.u32 %s3618_s24, 11  ;;  %s2283_s3 = sshll.u32 %s4638_s19, 4  ;;  %s2284_s3 = int_to_ptr.vmem [resolvable:$true] %s2283_s3 }
 0x44d   : > { %s2266_s2 = scalar_lea.hbm %s4784_s6, %s2480_s17  ;;  %s3637_s20 = smov 2048  }
 0x44e   : > { %p4811_p1 = scmp.ne.s32.totalorder %s4801_s10, 0  ;;  %s3638_s8 = smov 4096  }
 0x44f   : > { %s3639_s11 = smov 16   ;;  %s3640_s15 = smov 128  }
 0x450   : > { %3158 = sst [smem:[#allocation13]] (%p4811_p1), %s3637_s20  ;;  %s3641_s24 = smov 8  }
 0x451   : > { %3159 = sst [smem:[#allocation13 + $0x1]] (%p4811_p1), %s3638_s8  ;;  %s3642_s0 = smov [#allocation12]  }
 0x452   : > { %3160 = sst [smem:[#allocation13 + $0x2]] (%p4811_p1), %s3639_s11  ;;  %s3643_s7 = smov 0  }
 0x453   : > { %3161 = sst [smem:[#allocation13 + $0x3]] (%p4811_p1), %s3640_s15 }
 0x454   : > { %3162 = sst [smem:[#allocation13 + $0x4]] (%p4811_p1), %s3640_s15 }
 0x455   : > { %3163 = sst [smem:[#allocation13 + $0x5]] (%p4811_p1), %s3641_s24 }
 0x456   : > { %3164 = dma.general (%p4811_p1), %s2284_s3, 6144, %s2266_s2, %s2252_s9, %s3642_s0, [#allocation13], %s3643_s7, 0  }
 0x457 PF: > { %s2311_s14 = sand.u32 1, %s3606_s21   ;;  %p4812_p6 = scmp.ne.s32.totalorder %s4794_s30, 0 }
 0x458   : > { %p4813_p10 = scmp.ge.s32.totalorder %s3626_s26, 2  ;;  %s2312_s27 = scalar_lea.sflag [#allocation5], %s2311_s14 }
 0x45a   : > { %p3181_p3 = pnand %p4813_p10, %p4812_p6 }
 0x45c   : > { %3601 = dma.done.wait (!%p3181_p3), %s2312_s27, 6144  }
 0x45d   : > { %3603 = vsyncadd (!%p3181_p3), %s2312_s27, 4294961152  ;;  %s26_s26 = sadd.s32 1, %s3626_s26   ;;  %s4814_s29 = sld [smem:[#allocation20_spill]] }
 0x45e   : > { %p23_p4 = scmp.ge.s32.totalorder %s26_s26, 4   ;;  %s4815_s10 = sld [smem:[#allocation19_spill]] }
 0x45f   : > { %s4816_s21 = smov %s3610_s22  ;;  %s4817_s22 = smov %s3614_s23 }
 0x460   : > { %s4819_s24 = smov %s3622_s25  ;;  %25 = sbr.rel (!%p23_p4) target bundleno = 13 (0xd), region = 121 }
 0x463   : > { %s4818_s23 = smov %s4814_s29 }
 0x464   : > { %s4820_s25 = smov %s4815_s10 }
 0x467   :  { %2317 = vsyncpa [#allocation4], 1 }
 0x468   :  { %2319 = vsyncpa [#allocation4 + $0x1], 1 }
 0x469   :  { %2320 = vsyncpa [#allocation7], 1 }
 0x46a   :  { %2322 = vsyncpa [#allocation7 + $0x1], 1 }
 0x46b   :  { %2323 = vsyncpa [#allocation10], 1 }
 0x46c   :  { %2324 = vsyncpa [#allocation5], 1 }
 0x46d   :  { %2326 = vsyncpa [#allocation5 + $0x1], 1 }

// kernel: tpu_custom_call.1
= control target key start
LH: loop header
LB: loop body
LE: loop exit
PB: predicated region body
PF: predicated region fallthrough
CT: control target
= control target key end

     0   :  { %s4778_s0 = inlined_call_operand.hbm [shape: f32[2,128,128], index: 0, kind: input, shape index: {}]   ;;  %s4779_s1 = inlined_call_operand.hbm [shape: f32[2,128,128], index: 1, kind: input, shape index: {}]   ;;  %s4780_s2 = inlined_call_operand.hbm [shape: f32[128,384], index: 2, kind: input, shape index: {}]   ;;  %s4781_s3 = inlined_call_operand.hbm [shape: f32[128,384], index: 3, kind: input, shape index: {}]   ;;  %s4782_s4 = inlined_call_operand.vmem [shape: f32[1,384], index: 4, kind: input, shape index: {}]   ;;  %s4783_s5 = inlined_call_operand.vmem [shape: f32[1,384], index: 5, kind: input, shape index: {}]   ;;  %s4784_s6 = inlined_call_operand.hbm [shape: f32[3,2,128,128], index: 6, kind: output, shape index: {}]  }
   0x1   :  { %4790 = sst [smem:[#allocation21_spill]] %s4778_s0 }
   0x2   :  { %4791 = sst [smem:[#allocation22_spill]] %s4780_s2 }
   0x3   :  { %4792 = sst [smem:[#allocation23_spill]] %s4781_s3 }
   0x4   :  { %11 = vsyncpa [#allocation4], 0 }
   0x5   :  { %13 = vsyncpa [#allocation4 + $0x1], 0 }
   0x6   :  { %14 = vsyncpa [#allocation7], 0 }
   0x7   :  { %16 = vsyncpa [#allocation7 + $0x1], 0 }
   0x8   :  { %17 = vsyncpa [#allocation10], 0 }
   0x9   :  { %18 = vsyncpa [#allocation5], 0 }
   0xa   :  { %20 = vsyncpa [#allocation5 + $0x1], 0  ;;  %s3679_s21 = smov 0   ;;  %s3681_s22 = smov 0  }
   0xb   :  { %s3683_s23 = smov 0   ;;  %s3685_s24 = smov 0  }
   0xc   :  { %s3687_s25 = smov 0   ;;  %s3689_s26 = smov 0  }
   0xd LB: > { %s3710_s27 = sadd.s32 4294967295, %s3626_s26   ;;  %s2426_s28 = sadd.s32 4294967294, %s3626_s26   ;;  %s3626_s26 = sphi %s3689_s26, %s26_s26   ;;  %s3622_s25 = sphi %s3687_s25, %s4820_s25   ;;  %s3618_s24 = sphi %s3685_s24, %s4819_s24   ;;  %s3614_s23 = sphi %s3683_s23, %s4818_s23   ;;  %s3610_s22 = sphi %s3681_s22, %s4817_s22   ;;  %s3606_s21 = sphi %s3679_s21, %s4816_s21  }
   0xe   : > { %p60_p0 = scmp.ne.s32.totalorder %s3610_s22, %s3606_s21  ;;  %p4785_p1 = scmp.eq.s32.totalorder %s3710_s27, 0 }
   0xf   : > { %p202_p3 = scmp.eq.s32.totalorder %s2426_s28, 1  ;;  %p2427_p5 = scmp.ge.s32.totalorder %s3626_s26, 1 }
  0x10   : > { %p3719_p4 = por %p4785_p1, %p60_p0  ;;  %p209_p7 = scmp.lt.s32.totalorder %s3626_s26, 3 }
  0x11   : > { %p3724_p6 = por %p202_p3, %p60_p0  ;;  %s3628_s8 = smov [#allocation8]  }
  0x12   : > { %s4793_s29 = scalar_select %p3719_p4, 1, 0 }
  0x13   : > { %s4794_s30 = scalar_select %p3724_p6, 1, 0 }
  0x14   : > { %p3729_p8 = pnand %p2427_p5, %p209_p7  ;;  %s221_s9 = sshll.u32 %s3628_s8, 4  ;;  %s3733_s9 = int_to_ptr.vmem [resolvable:$true] %s221_s9 }
  0x15   : > { %s3629_s11 = smov [#allocation9]   ;;  %s4797_s2 = sld [smem:[#allocation22_spill]] }
  0x16   : > { %p3166_p9 = pneg %p3729_p8  ;;  %s234_s12 = sshll.u32 %s3629_s11, 4  ;;  %s3744_s12 = int_to_ptr.vmem [resolvable:$true] %s234_s12 }
  0x18   : > { %p3740_p11 = pnand %p3166_p9, %p4785_p1 }
  0x1a   : > { %p3446_p13 = pneg %p3740_p11 }
  0x1b   : > { %s3444_s15 = scalar_lea.hbm %s4797_s2, 6144 }
  0x1c   : > { %p3445_p12 = scmp.ne.s32.totalorder %s4797_s2, %s3444_s15  ;;  %p3451_p5 = scmp.lt.u32.totalorder %s3444_s15, %s4797_s2 }
  0x1e   : > { %p3447_p0 = pnand %p3446_p13, %p3445_p12 }
  0x20   : > { %p3448_p3 = pneg %p3447_p0 }
  0x22   : > { %p3453_p7 = pnand %p3451_p5, %p3448_p3 }
  0x24   : > { %3456 = shalt.err (!%p3453_p7)
}
  0x25   : > { %s3457_s20 = scalar_lea.vmem %s3733_s9, 6144  ;;  %p3465_p2 = scmp.lt.s32.totalorder %s3733_s9, %s3733_s9 }
  0x26   : > { %p3458_p9 = scmp.ne.s32.totalorder %s3733_s9, %s3457_s20  ;;  %p3466_p12 = scmp.lt.s32.totalorder %s3457_s20, %s3457_s20 }
  0x28   : > { %p3460_p10 = pnand %p3458_p9, %p3446_p13  ;;  %p3467_p0 = por %p3466_p12, %p3465_p2 }
  0x2a   : > { %p3461_p1 = pneg %p3460_p10 }
  0x2c   : > { %p3468_p6 = pnand %p3467_p0, %p3461_p1 }
  0x2e   : > { %3471 = shalt.err (!%p3468_p6)
}
  0x2f   : > { %s3630_s28 = smov 384   ;;  %s3631_s8 = smov 24  }
  0x30   : > { %3169 = dma.hbm_to_vmem [thread:$0]  (!%p3740_p11), %s4797_s2, 6144, %s3733_s9, [#allocation7], %s3630_s28, %s3630_s28, %s3631_s8  }
  0x31   : > { %s4798_s3 = sld [smem:[#allocation23_spill]] }
  0x37   : > { %s3472_s16 = scalar_lea.hbm %s4798_s3, 6144 }
  0x38   : > { %p3473_p2 = scmp.ne.s32.totalorder %s4798_s3, %s3472_s16  ;;  %p3479_p10 = scmp.lt.u32.totalorder %s3472_s16, %s4798_s3 }
  0x3a   : > { %p3475_p1 = pnand %p3473_p2, %p3446_p13 }
  0x3c   : > { %p3476_p6 = pneg %p3475_p1 }
  0x3e   : > { %p3481_p3 = pnand %p3479_p10, %p3476_p6 }
  0x40   : > { %3484 = shalt.err (!%p3481_p3)
}
  0x41   : > { %s3485_s9 = scalar_lea.vmem %s3744_s12, 6144  ;;  %p3493_p12 = scmp.lt.s32.totalorder %s3744_s12, %s3744_s12 }
  0x42   : > { %p3486_p5 = scmp.ne.s32.totalorder %s3744_s12, %s3485_s9  ;;  %p3494_p0 = scmp.lt.s32.totalorder %s3485_s9, %s3485_s9 }
  0x44   : > { %p3488_p7 = pnand %p3486_p5, %p3446_p13  ;;  %p3495_p2 = por %p3494_p0, %p3493_p12 }
  0x46   : > { %p3489_p9 = pneg %p3488_p7 }
  0x48   : > { %p3496_p1 = pnand %p3495_p2, %p3489_p9 }
  0x4a   : > { %3499 = shalt.err (!%p3496_p1)
}
  0x4b   : > { %3172 = dma.hbm_to_vmem [thread:$0]  (!%p3740_p11), %s4798_s3, 6144, %s3744_s12, [#allocation10], %s3630_s28, %s3630_s28, %s3631_s8  }
  0x4c   : > { %s38_s14 = sadd.s32 1, %s3622_s25  ;;  %s47_s15 = sadd.s32 1, %s3614_s23 }
  0x4d   : > { %p40_p13 = scmp.ge.s32.totalorder %s38_s14, 2  ;;  %p54_p6 = scmp.ne.s32.totalorder %s3614_s23, %s3610_s22 }
  0x4e   : > { %p55_p10 = scmp.eq.s32.totalorder %s3626_s26, 0  ;;  %p3186_p3 = scmp.lt.s32.totalorder %s3626_s26, 2 }
  0x4f   : > { %s4822_s14 = smov (%p40_p13, %s38_s14), 0  ;;  %p4800_p7 = scmp.eq.s32.totalorder %s3710_s27, 1 }
  0x50   : > { %4799 = sst [smem:[#allocation19_spill]] %s4822_s14  ;;  %p56_p5 = por %p55_p10, %p54_p6 }
  0x51   : > { %p3808_p9 = por %p4800_p7, %p54_p6  ;;  %s42_s16 = ssub.s32 %s3622_s25, %s4822_s14 }
  0x52   : > { %s254_s17 = sand.u32 1, %s3614_s23   ;;  %p45_p11 = scmp.eq.s32.totalorder %s42_s16, 0 }
  0x53   : > { %s4801_s10 = scalar_select %p3808_p9, 1, 0 }
  0x54   : > { %s3815_s12 = sshll.u32 %s254_s17, 7  ;;  %s4786_s28 = sshll.u32 %s3622_s25, 11 }
  0x55   : > { %s3819_s8 = scalar_select %p45_p11, %s3614_s23, %s47_s15  }
  0x56   : > { %s4803_s0 = sld [smem:[#allocation21_spill]]  ;;  %s258_s9 = scalar_lea.vmem [#allocation3], %s3815_s12 }
  0x57   : > { %4802 = sst [smem:[#allocation20_spill]] %s3819_s8  ;;  %s267_s11 = sshll.u32 %s258_s9, 4  ;;  %s3835_s11 = int_to_ptr.vmem [resolvable:$true] %s267_s11 }
  0x58   : > { %p3831_p12 = pnand %p3186_p3, %p56_p5  ;;  %s3837_s15 = scalar_lea.sflag [#allocation4], %s254_s17 }
  0x5a   : > { %p3502_p2 = pneg %p3831_p12 }
  0x5c   : > { %s3826_s20 = scalar_lea.hbm %s4803_s0, %s4786_s28  ;;  %s3505_s9 = scalar_lea.hbm %s4803_s0, 4096 }
  0x5d   : > { %s3500_s16 = scalar_lea.hbm %s3826_s20, 2048  ;;  %p3506_p6 = scmp.lt.u32.totalorder %s3826_s20, %s4803_s0 }
  0x5e   : > { %p3501_p0 = scmp.ne.s32.totalorder %s3826_s20, %s3500_s16  ;;  %p3507_p10 = scmp.lt.u32.totalorder %s3505_s9, %s3500_s16 }
  0x5f   : > { %p3509_p5 = scmp.lt.u32.totalorder %s3500_s16, %s3826_s20 }
  0x60   : > { %p3503_p1 = pnand %p3502_p2, %p3501_p0  ;;  %p3508_p3 = por %p3507_p10, %p3506_p6 }
  0x62   : > { %p3504_p13 = pneg %p3503_p1  ;;  %p3510_p7 = por %p3509_p5, %p3508_p3 }
  0x64   : > { %p3511_p11 = pnand %p3510_p7, %p3504_p13 }
  0x66   : > { %3514 = shalt.err (!%p3511_p11)
}
  0x67   : > { %s3515_s17 = scalar_lea.vmem %s3835_s11, 2048  ;;  %s3632_s18 = smov [#allocation3]  }
  0x68   : > { %p3516_p0 = scmp.ne.s32.totalorder %s3835_s11, %s3515_s17  ;;  %s3520_s19 = sshll.u32 %s3632_s18, 4  ;;  %s3521_s19 = int_to_ptr.vmem [resolvable:$false] %s3520_s19 }
  0x69   : > { %s3522_s2 = scalar_lea.vmem %s3521_s19, 4096  ;;  %p3523_p4 = scmp.lt.s32.totalorder %s3835_s11, %s3521_s19 }
  0x6a   : > { %p3518_p1 = pnand %p3516_p0, %p3502_p2  ;;  %p3524_p6 = scmp.lt.s32.totalorder %s3522_s2, %s3515_s17 }
  0x6c   : > { %p3519_p9 = pneg %p3518_p1  ;;  %p3525_p10 = por %p3524_p6, %p3523_p4 }
  0x6e   : > { %p3526_p3 = pnand %p3525_p10, %p3519_p9 }
  0x70   : > { %3529 = shalt.err (!%p3526_p3)
}
  0x71   : > { %s3633_s28 = smov 128   ;;  %s3634_s16 = smov 8  }
  0x72   : > { %3176 = dma.hbm_to_vmem [thread:$0]  (!%p3831_p12), %s3826_s20, 2048, %s3835_s11, %s3837_s15, %s3633_s28, %s3633_s28, %s3634_s16  }
  0x73   : > { %s4805_s9 = sshll.u32 %s3622_s25, 11  ;;  %s281_s2 = scalar_lea.vmem [#allocation6], %s3815_s12 }
  0x74   : > { %s3873_s19 = scalar_lea.hbm %s4779_s1, %s4805_s9  ;;  %s288_s0 = sshll.u32 %s281_s2, 4  ;;  %s3877_s0 = int_to_ptr.vmem [resolvable:$true] %s288_s0 }
  0x75   : > { %s277_s3 = sand.u32 1, %s3626_s26   ;;  %s3530_s8 = scalar_lea.hbm %s3873_s19, 2048 }
  0x76   : > { %s3879_s14 = scalar_lea.sflag [#allocation7], %s277_s3  ;;  %p3531_p4 = scmp.ne.s32.totalorder %s3873_s19, %s3530_s8 }
  0x77   : > { %s3535_s15 = scalar_lea.hbm %s4779_s1, 4096  ;;  %p3536_p5 = scmp.lt.u32.totalorder %s3873_s19, %s4779_s1 }
  0x78   : > { %p3533_p9 = pnand %p3531_p4, %p3502_p2  ;;  %p3537_p7 = scmp.lt.u32.totalorder %s3535_s15, %s3530_s8 }
  0x79   : > { %p3539_p0 = scmp.lt.u32.totalorder %s3530_s8, %s3873_s19 }
  0x7a   : > { %p3534_p13 = pneg %p3533_p9  ;;  %p3538_p11 = por %p3537_p7, %p3536_p5 }
  0x7c   : > { %p3540_p1 = por %p3539_p0, %p3538_p11 }
  0x7e   : > { %p3541_p6 = pnand %p3540_p1, %p3534_p13 }
  0x80   : > { %3544 = shalt.err (!%p3541_p6)
}
  0x81   : > { %s3545_s3 = scalar_lea.vmem %s3877_s0, 2048  ;;  %s3635_s12 = smov [#allocation6]  }
  0x82   : > { %p3546_p10 = scmp.ne.s32.totalorder %s3877_s0, %s3545_s3  ;;  %s3550_s18 = sshll.u32 %s3635_s12, 4  ;;  %s3551_s18 = int_to_ptr.vmem [resolvable:$false] %s3550_s18 }
  0x83   : > { %s3552_s2 = scalar_lea.vmem %s3551_s18, 4096  ;;  %p3553_p9 = scmp.lt.s32.totalorder %s3877_s0, %s3551_s18 }
  0x84   : > { %p3548_p3 = pnand %p3546_p10, %p3502_p2  ;;  %p3554_p5 = scmp.lt.s32.totalorder %s3552_s2, %s3545_s3 }
  0x86   : > { %p3549_p4 = pneg %p3548_p3  ;;  %p3555_p7 = por %p3554_p5, %p3553_p9 }
  0x88   : > { %p3556_p11 = pnand %p3555_p7, %p3549_p4 }
  0x8a   : > { %3559 = shalt.err (!%p3556_p11)
}
  0x8b   : > { %3179 = dma.hbm_to_vmem [thread:$0]  (!%p3831_p12), %s3873_s19, 2048, %s3877_s0, %s3879_s14, %s3633_s28, %s3633_s28, %s3634_s16  }
  0x8c   : > { %300 = sbr.rel (%p3729_p8) target bundleno = 1111 (0x457), region = 44  ;;  %s3911_s8 = sand.u32 (!%p3729_p8), 1, %s3610_s22  }
  0x8d   : > { %s2438_s20 = sshll.u32 (!%p3729_p8), %s3911_s8, 7  ;;  %s303_s11 = scalar_lea.sflag (!%p3729_p8), [#allocation4], %s3911_s8 }
  0x8e   : > { %s3915_s15 = scalar_lea.vmem (!%p3729_p8), [#allocation3], %s2438_s20  ;;  %p4806_p2 = scmp.ne.s32.totalorder (!%p3729_p8), %s4793_s29, 0 }
  0x93   : > { %3585 = dma.done.wait (%p4806_p2), %s303_s11, 2048  }
  0x94   : > { %3587 = vsyncadd (%p4806_p2), %s303_s11, 4294965248  ;;  %s311_s0 = sand.u32 1, %s3710_s27   ;;  %s3922_s14 = scalar_lea.vmem [#allocation6], %s2438_s20 }
  0x95   : > { %s312_s7 = scalar_lea.sflag [#allocation7], %s311_s0 }
  0x96   : > { %3589 = dma.done.wait (%p4806_p2), %s312_s7, 2048  }
  0x97   : > { %3591 = vsyncadd (%p4806_p2), %s312_s7, 4294965248  ;;  %p4807_p8 = scmp.eq.s32.totalorder %s3710_s27, 0 }
  0x99   : > { %3593 = dma.done.wait (%p4807_p8), [#allocation7], 6144   ;;  %p4808_p12 = pmov %p4807_p8 }
  0x9a   : > { %p4809_p13 = pmov %p4807_p8 }
  0x9b   : > { %3595 = vsyncadd (%p4808_p12), [#allocation7], 4294961152 }
  0x9c   : > { %3597 = dma.done.wait (%p4809_p13), [#allocation10], 6144   ;;  %p4810_p0 = pmov %p4807_p8 }
  0x9d   : > { %v3636_v0 = vmov 0.0   ;;  %v380_v1 = vld [vmem:[#allocation9 + $0x8] sm:$0xff]  ;;  %v383_v2 = vld [vmem:[#allocation9 + $0x20] sm:$0xff]  ;;  %v382_v5 = vld [vmem:[#allocation9 + $0x18] sm:$0xff]  ;;  %s3145_s16 = smul.u32 384, %s3911_s8  ;;  %s2252_s9 = scalar_lea.sflag [#allocation5], %s3911_s8 }
  0x9e   : > { %3599 = vsyncadd (%p4810_p0), [#allocation10], 4294961152  ;;  %508 = vmatprep.mubr.f32.mxu0 %v3636_v0  ;;  %v379_v3 = vld [vmem:[#allocation9] sm:$0xff]  ;;  %v2921_v4 = vpack.c.bf16 %v383_v2, %v380_v1  ;;  %v386_v6 = vld [vmem:[#allocation9 + $0x38] sm:$0xff] }
  0x9f   : > { %v389_v7 = vld [vmem:[#allocation9 + $0x50] sm:$0xff]  ;;  %v2923_v8 = vpack.c.bf16 %v382_v5, %v379_v3  ;;  %v388_v11 = vld [vmem:[#allocation9 + $0x48] sm:$0xff]  ;;  %v395_v13 = vld [vmem:[#allocation9 + $0x80] sm:$0xff]  ;;  %s4638_s19 = scalar_lea.vmem [#allocation11], %s3145_s16 }
  0xa0   : > { %v2925_v9 = vpack.c.bf16 %v389_v7, %v386_v6  ;;  %v385_v10 = vld [vmem:[#allocation9 + $0x30] sm:$0xff]  ;;  %v392_v12 = vld [vmem:[#allocation9 + $0x68] sm:$0xff]  ;;  %2922 = vmatprep.subr.bf16.mxu0 %v2921_v4  ;;  %v391_v16 = vld [vmem:[#allocation9 + $0x60] sm:$0xff] }
  0xa1   : > { %2924 = vmatpush1.bf16.msra.mxu0 %v2923_v8  ;;  %v2927_v14 = vpack.c.bf16 %v388_v11, %v385_v10  ;;  %v2929_v15 = vpack.c.bf16 %v395_v13, %v392_v12  ;;  %v394_v17 = vld [vmem:[#allocation9 + $0x78] sm:$0xff]  ;;  %v401_v19 = vld [vmem:[#allocation9 + $0xb0] sm:$0xff]  ;;  %v400_v23 = vld [vmem:[#allocation9 + $0xa8] sm:$0xff] }
  0xa2   : > { %2926 = vmatprep.subr.bf16.mxu0 %v2925_v9  ;;  %v398_v18 = vld [vmem:[#allocation9 + $0x98] sm:$0xff]  ;;  %v2931_v20 = vpack.c.bf16 %v394_v17, %v391_v16  ;;  %v397_v22 = vld [vmem:[#allocation9 + $0x90] sm:$0xff]  ;;  %v404_v24 = vld [vmem:[#allocation9 + $0xc8] sm:$0xff] }
  0xa3   : > { %v2933_v21 = vpack.c.bf16 %v401_v19, %v398_v18  ;;  %v407_v25 = vld [vmem:[#allocation9 + $0xe0] sm:$0xff]  ;;  %v381_v26 = vld [vmem:[#allocation9 + $0x10] sm:$0xff]  ;;  %v384_v27 = vld [vmem:[#allocation9 + $0x28] sm:$0xff]  ;;  %v2935_v30 = vpack.c.bf16 %v400_v23, %v397_v22 }
  0xa4   : > { %v3938_v28 = vld [vmem:[%s3922_s14] sm:$0xff]  ;;  %v2953_v32 = vpack.c.bf16 %v384_v27, %v381_v26  ;;  %v390_v33 = vld [vmem:[#allocation9 + $0x58] sm:$0xff]  ;;  %v2937_v34 = vpack.c.bf16 %v407_v25, %v404_v24  ;;  %v393_v37 = vld [vmem:[#allocation9 + $0x70] sm:$0xff] }
  0xa5   : > { %2928 = vmatpush1.bf16.msra.mxu0 %v2927_v14  ;;  %v387_v29 = vld [vmem:[#allocation9 + $0x40] sm:$0xff]  ;;  %2673 = vmatprep.mubr.f32.mxu1 %v3938_v28  ;;  %v406_v35 = vld [vmem:[#allocation9 + $0xd8] sm:$0xff]  ;;  %v396_v38 = vld [vmem:[#allocation9 + $0x88] sm:$0xff] }
  0xa6   : > { %2930 = vmatprep.subr.bf16.mxu0 %v2929_v15  ;;  %v403_v31 = vld [vmem:[#allocation9 + $0xc0] sm:$0xff]  ;;  %v2957_v36 = vpack.c.bf16 %v390_v33, %v387_v29  ;;  %v410_v39 = vld [vmem:[#allocation9 + $0xf8] sm:$0xff]  ;;  %v413_v40 = vld [vmem:[#allocation9 + $0x110] sm:$0xff]  ;;  %2954 = vmatprep.subr.bf16.mxu1 %v2953_v32  ;;  %v2961_v43 = vpack.c.bf16 %v396_v38, %v393_v37 }
  0xa7   : > { %2956 = vmatpush3.bf16.msra.mxu1 %v2953_v32  ;;  %v2939_v41 = vpack.c.bf16 %v406_v35, %v403_v31  ;;  %v409_v42 = vld [vmem:[#allocation9 + $0xf0] sm:$0xff]  ;;  %v2941_v44 = vpack.c.bf16 %v413_v40, %v410_v39  ;;  %v412_v45 = vld [vmem:[#allocation9 + $0x108] sm:$0xff]  ;;  %v399_v46 = vld [vmem:[#allocation9 + $0xa0] sm:$0xff] }
  0xa8   : > { %2958 = vmatprep.subr.bf16.mxu1 %v2957_v36  ;;  %v402_v47 = vld [vmem:[#allocation9 + $0xb8] sm:$0xff]  ;;  %v416_v48 = vld [vmem:[#allocation9 + $0x128] sm:$0xff]  ;;  %v419_v49 = vld [vmem:[#allocation9 + $0x140] sm:$0xff]  ;;  %v2943_v50 = vpack.c.bf16 %v412_v45, %v409_v42 }
  0xa9   : > { %2932 = vmatpush1.bf16.msra.mxu0 %v2931_v20  ;;  %v415_v51 = vld [vmem:[#allocation9 + $0x120] sm:$0xff]  ;;  %v2965_v52 = vpack.c.bf16 %v402_v47, %v399_v46  ;;  %v2945_v53 = vpack.c.bf16 %v419_v49, %v416_v48  ;;  %v418_v54 = vld [vmem:[#allocation9 + $0x138] sm:$0xff]  ;;  %v405_v55 = vld [vmem:[#allocation9 + $0xd0] sm:$0xff] }
  0xaa   : > { %2934 = vmatprep.subr.bf16.mxu0 %v2933_v21  ;;  %v408_v56 = vld [vmem:[#allocation9 + $0xe8] sm:$0xff]  ;;  %v422_v57 = vld [vmem:[#allocation9 + $0x158] sm:$0xff]  ;;  %v425_v58 = vld [vmem:[#allocation9 + $0x170] sm:$0xff]  ;;  %v2947_v59 = vpack.c.bf16 %v418_v54, %v415_v51 }
  0xab   : > { %2960 = vmatpush3.bf16.msra.mxu1 %v2957_v36  ;;  %v421_v60 = vld [vmem:[#allocation9 + $0x150] sm:$0xff]  ;;  %v2969_v61 = vpack.c.bf16 %v408_v56, %v405_v55  ;;  %v2949_v62 = vpack.c.bf16 %v425_v58, %v422_v57  ;;  %v424_v63 = vld [vmem:[#allocation9 + $0x168] sm:$0xff]  ;;  %v411_v1 = vld [vmem:[#allocation9 + $0x100] sm:$0xff] }
  0xac   : > { %2962 = vmatprep.subr.bf16.mxu1 %v2961_v43  ;;  %v414_v2 = vld [vmem:[#allocation9 + $0x118] sm:$0xff]  ;;  %v2951_v3 = vpack.c.bf16 %v424_v63, %v421_v60  ;;  %v417_v5 = vld [vmem:[#allocation9 + $0x130] sm:$0xff]  ;;  %v420_v6 = vld [vmem:[#allocation9 + $0x148] sm:$0xff] }
  0xad   : > { %2936 = vmatpush1.bf16.msra.mxu0 %v2935_v30  ;;  %v2973_v4 = vpack.c.bf16 %v414_v2, %v411_v1  ;;  %v2977_v7 = vpack.c.bf16 %v420_v6, %v417_v5  ;;  %v423_v8 = vld [vmem:[#allocation9 + $0x160] sm:$0xff]  ;;  %v426_v9 = vld [vmem:[#allocation9 + $0x178] sm:$0xff]  ;;  %v816_v10 = vld [vmem:[#allocation8 + $0x10] sm:$0xff] }
  0xae   : > { %2938 = vmatprep.subr.bf16.mxu0 %v2937_v34  ;;  %v819_v11 = vld [vmem:[#allocation8 + $0x28] sm:$0xff]  ;;  %v822_v13 = vld [vmem:[#allocation8 + $0x40] sm:$0xff]  ;;  %v825_v14 = vld [vmem:[#allocation8 + $0x58] sm:$0xff]  ;;  %v2981_v16 = vpack.c.bf16 %v426_v9, %v423_v8 }
  0xaf   : > { %2964 = vmatpush3.bf16.msra.mxu1 %v2961_v43  ;;  %v3017_v12 = vpack.c.bf16 %v819_v11, %v816_v10  ;;  %v364_v15 = vld [vmem:[%s3922_s14 + $0x8] sm:$0xff]  ;;  %v818_v18 = vld [vmem:[#allocation8 + $0x20] sm:$0xff]  ;;  %v3021_v19 = vpack.c.bf16 %v825_v14, %v822_v13  ;;  %v828_v20 = vld [vmem:[#allocation8 + $0x70] sm:$0xff] }
  0xb0   : > { %2966 = vmatprep.subr.bf16.mxu1 %v2965_v52  ;;  %v815_v17 = vld [vmem:[#allocation8 + $0x8] sm:$0xff]  ;;  %v365_v22 = vld [vmem:[%s3922_s14 + $0x10] sm:$0xff]  ;;  %v814_v24 = vld [vmem:[#allocation8] sm:$0xff] }
  0xb1   : > { %2940 = vmatpush1.bf16.msra.mxu0 %v2939_v41  ;;  %v831_v21 = vld [vmem:[#allocation8 + $0x88] sm:$0xff]  ;;  %v2985_v23 = vpack.c.bf16 %v818_v18, %v815_v17  ;;  %v817_v25 = vld [vmem:[#allocation8 + $0x18] sm:$0xff]  ;;  %v834_v29 = vld [vmem:[#allocation8 + $0xa0] sm:$0xff] }
  0xb2   : > { %2942 = vmatprep.subr.bf16.mxu0 %v2941_v44  ;;  %v821_v26 = vld [vmem:[#allocation8 + $0x38] sm:$0xff]  ;;  %v3025_v27 = vpack.c.bf16 %v831_v21, %v828_v20  ;;  %v2987_v31 = vpack.c.bf16 %v817_v25, %v814_v24  ;;  %v820_v33 = vld [vmem:[#allocation8 + $0x30] sm:$0xff]  ;;  %v823_v34 = vld [vmem:[#allocation8 + $0x48] sm:$0xff] }
  0xb3   : > { %2968 = vmatpush3.bf16.msra.mxu1 %v2965_v52  ;;  %v837_v30 = vld [vmem:[#allocation8 + $0xb8] sm:$0xff]  ;;  %v827_v36 = vld [vmem:[#allocation8 + $0x68] sm:$0xff]  ;;  %v830_v38 = vld [vmem:[#allocation8 + $0x80] sm:$0xff]  ;;  %v2991_v41 = vpack.c.bf16 %v823_v34, %v820_v33 }
  0xb4   : > { %2970 = vmatprep.subr.bf16.mxu1 %v2969_v61  ;;  %v366_v32 = vld [vmem:[%s3922_s14 + $0x18] sm:$0xff]  ;;  %v3029_v37 = vpack.c.bf16 %v837_v30, %v834_v29  ;;  %v840_v39 = vld [vmem:[#allocation8 + $0xd0] sm:$0xff]  ;;  %v843_v40 = vld [vmem:[#allocation8 + $0xe8] sm:$0xff]  ;;  %v2993_v45 = vpack.c.bf16 %v830_v38, %v827_v36 }
  0xb5   : > { %2944 = vmatpush1.bf16.msra.mxu0 %v2943_v50  ;;  %v367_v42 = vld [vmem:[%s3922_s14 + $0x20] sm:$0xff]  ;;  %v829_v44 = vld [vmem:[#allocation8 + $0x78] sm:$0xff]  ;;  %v3033_v47 = vpack.c.bf16 %v843_v40, %v840_v39  ;;  %v836_v48 = vld [vmem:[#allocation8 + $0xb0] sm:$0xff] }
  0xb6   : > { %2946 = vmatprep.subr.bf16.mxu0 %v2945_v53  ;;  %v826_v43 = vld [vmem:[#allocation8 + $0x60] sm:$0xff]  ;;  %v833_v46 = vld [vmem:[#allocation8 + $0x98] sm:$0xff]  ;;  %v368_v52 = vld [vmem:[%s3922_s14 + $0x28] sm:$0xff] }
  0xb7   : > { %2972 = vmatpush3.bf16.msra.mxu1 %v2969_v61  ;;  %v846_v49 = vld [vmem:[#allocation8 + $0x100] sm:$0xff]  ;;  %v849_v50 = vld [vmem:[#allocation8 + $0x118] sm:$0xff]  ;;  %v2995_v51 = vpack.c.bf16 %v829_v44, %v826_v43  ;;  %v832_v53 = vld [vmem:[#allocation8 + $0x90] sm:$0xff]  ;;  %v2997_v55 = vpack.c.bf16 %v836_v48, %v833_v46 }
  0xb8   : > { %2974 = vmatprep.subr.bf16.mxu1 %v2973_v4  ;;  %v835_v54 = vld [vmem:[#allocation8 + $0xa8] sm:$0xff]  ;;  %v3037_v57 = vpack.c.bf16 %v849_v50, %v846_v49  ;;  %v842_v58 = vld [vmem:[#allocation8 + $0xe0] sm:$0xff]  ;;  %v369_v61 = vld [vmem:[%s3922_s14 + $0x30] sm:$0xff] }
  0xb9   : > { %2948 = vmatpush1.bf16.msra.mxu0 %v2947_v59  ;;  %v839_v56 = vld [vmem:[#allocation8 + $0xc8] sm:$0xff]  ;;  %v852_v59 = vld [vmem:[#allocation8 + $0x130] sm:$0xff]  ;;  %v838_v63 = vld [vmem:[#allocation8 + $0xc0] sm:$0xff] }
  0xba   : > { %2950 = vmatprep.subr.bf16.mxu0 %v2949_v62  ;;  %v855_v60 = vld [vmem:[#allocation8 + $0x148] sm:$0xff]  ;;  %v2999_v62 = vpack.c.bf16 %v835_v54, %v832_v53  ;;  %v841_v1 = vld [vmem:[#allocation8 + $0xd8] sm:$0xff]  ;;  %v848_v6 = vld [vmem:[#allocation8 + $0x110] sm:$0xff] }
  0xbb   : > { %2976 = vmatpush3.bf16.msra.mxu1 %v2973_v4  ;;  %v370_v2 = vld [vmem:[%s3922_s14 + $0x38] sm:$0xff]  ;;  %v3041_v5 = vpack.c.bf16 %v855_v60, %v852_v59  ;;  %v371_v9 = vld [vmem:[%s3922_s14 + $0x40] sm:$0xff]  ;;  %v3003_v10 = vpack.c.bf16 %v841_v1, %v838_v63  ;;  %v844_v11 = vld [vmem:[#allocation8 + $0xf0] sm:$0xff] }
  0xbc   : > { %2978 = vmatprep.subr.bf16.mxu1 %v2977_v7  ;;  %v845_v4 = vld [vmem:[#allocation8 + $0xf8] sm:$0xff]  ;;  %v372_v13 = vld [vmem:[%s3922_s14 + $0x48] sm:$0xff]  ;;  %v854_v17 = vld [vmem:[#allocation8 + $0x140] sm:$0xff] }
  0xbd   : > { %2952 = vmatpush1.bf16.msra.mxu0 %v2951_v3  ;;  %v3001_v3 = vpack.c.bf16 %v842_v58, %v839_v56  ;;  %v861_v8 = vld [vmem:[#allocation8 + $0x178] sm:$0xff]  ;;  %v3005_v14 = vpack.c.bf16 %v848_v6, %v845_v4  ;;  %v373_v18 = vld [vmem:[%s3922_s14 + $0x50] sm:$0xff]  ;;  %v850_v20 = vld [vmem:[#allocation8 + $0x120] sm:$0xff] }
  0xbe   : > { %3018 = vmatprep.subr.bf16.mxu0 %v3017_v12  ;;  %v853_v21 = vld [vmem:[#allocation8 + $0x138] sm:$0xff]  ;;  %v860_v25 = vld [vmem:[#allocation8 + $0x170] sm:$0xff]  ;;  %v859_v29 = vld [vmem:[#allocation8 + $0x168] sm:$0xff] }
  0xbf   : > { %2980 = vmatpush3.bf16.msra.mxu1 %v2977_v7  ;;  %v858_v7 = vld [vmem:[#allocation8 + $0x160] sm:$0xff]  ;;  %v857_v24 = vld [vmem:[#allocation8 + $0x158] sm:$0xff]  ;;  %v376_v30 = vld [vmem:[%s3922_s14 + $0x68] sm:$0xff] }
  0xc0   : > { %509 = vmatmul.mubr.f32.vlgmr.msra.gmra.mrb[0].mxu0 %v3938_v28  ;;  %2982 = vmatprep.subr.bf16.mxu1 %v2981_v16  ;;  %v824_v28 = vld [vmem:[#allocation8 + $0x50] sm:$0xff]  ;;  %v378_v33 = vld [vmem:[%s3922_s14 + $0x78] sm:$0xff]  ;;  %v799_v36 = vld [vmem:[%s3915_s15 + $0x8] sm:$0xff] }
  0xc1   : > { %514 = vmatprep.mubr.f32.mxu0 %v3636_v0  ;;  %3020 = vmatpush3.bf16.msra.mxu0 %v3017_v12  ;;  %v2989_v35 = vpack.c.bf16 %v824_v28, %v821_v26  ;;  %v847_v12 = vld [vmem:[#allocation8 + $0x108] sm:$0xff]  ;;  %v375_v26 = vld [vmem:[%s3922_s14 + $0x60] sm:$0xff]  ;;  %v856_v28 = vld [vmem:[#allocation8 + $0x150] sm:$0xff] }
  0xc2   : > { %3022 = vmatprep.subr.bf16.mxu0 %v3021_v19  ;;  %v3015_v34 = vpack.c.bf16 %v859_v29, %v856_v28  ;;  %v801_v38 = vld [vmem:[%s3915_s15 + $0x18] sm:$0xff]  ;;  %v802_v39 = vld [vmem:[%s3915_s15 + $0x20] sm:$0xff]  ;;  %v803_v40 = vld [vmem:[%s3915_s15 + $0x28] sm:$0xff] }
  0xc3   : > { %2984 = vmatpush3.bf16.msra.mxu1 %v2981_v16  ;;  %v851_v16 = vld [vmem:[#allocation8 + $0x128] sm:$0xff]  ;;  %v806_v43 = vld [vmem:[%s3915_s15 + $0x40] sm:$0xff]  ;;  %v809_v46 = vld [vmem:[%s3915_s15 + $0x58] sm:$0xff] }
  0xc4   : > { %515 = vmatmul.mubr.f32.gmra.mrb[2].mxu0 %v364_v15  ;;  %2986 = vmatprep.subr.bf16.mxu1 %v2985_v23  ;;  %v3009_v23 = vpack.c.bf16 %v854_v17, %v851_v16  ;;  %v807_v44 = vld [vmem:[%s3915_s15 + $0x48] sm:$0xff]  ;;  %v812_v49 = vld [vmem:[%s3915_s15 + $0x70] sm:$0xff]  ;;  %v813_v50 = vld [vmem:[%s3915_s15 + $0x78] sm:$0xff] }
  0xc5   : > { %520 = vmatprep.mubr.f32.mxu0 %v3636_v0  ;;  %3024 = vmatpush3.bf16.msra.mxu0 %v3021_v19  ;;  %v3007_v19 = vpack.c.bf16 %v847_v12, %v844_v11  ;;  %v811_v48 = vld [vmem:[%s3915_s15 + $0x68] sm:$0xff]  ;;  %v427_v54 = vld [vmem:[%s4783_s5] sm:$0x7] }
  0xc6   : > { %3026 = vmatprep.subr.bf16.mxu0 %v3025_v27  ;;  %2674 = vmatmul.mubr.f32.vlgmr.msra.gmra.mrb[0].mxu1 %v364_v15  ;;  %v3045_v15 = vpack.c.bf16 %v861_v8, %v858_v7 }
  0xc7   : > { %2988 = vmatpush1.bf16.msra.mxu1 %v2987_v31  ;;  %2676 = vmatprep.mubr.f32.mxu1 %v365_v22  ;;  %v3013_v31 = vpack.c.bf16 %v860_v25, %v857_v24 }
  0xc8   : > { %521 = vmatmul.mubr.f32.gmra.mrb[4].mxu0 %v365_v22  ;;  %2990 = vmatprep.subr.bf16.mxu1 %v2989_v35  ;;  %v374_v22 = vld [vmem:[%s3922_s14 + $0x58] sm:$0xff]  ;;  %v798_v35 = vld [vmem:[%s3915_s15] sm:$0xff] }
  0xc9   : > { %526 = vmatprep.mubr.f32.mxu0 %v3636_v0  ;;  %3028 = vmatpush3.bf16.msra.mxu0 %v3025_v27  ;;  %v3011_v27 = vpack.c.bf16 %v853_v21, %v850_v20 }
  0xca   : > { %3030 = vmatprep.subr.bf16.mxu0 %v3029_v37  ;;  %2677 = vmatmul.mubr.f32.gmra.mrb[2].mxu1 %v366_v32 }
  0xcb   : > { %2992 = vmatpush1.bf16.msra.mxu1 %v2991_v41  ;;  %2679 = vmatprep.mubr.f32.mxu1 %v367_v42  ;;  %v804_v41 = vld [vmem:[%s3915_s15 + $0x30] sm:$0xff] }
  0xcc   : > { %527 = vmatmul.mubr.f32.gmra.mrb[6].mxu0 %v366_v32  ;;  %2994 = vmatprep.subr.bf16.mxu1 %v2993_v45  ;;  %v377_v32 = vld [vmem:[%s3922_s14 + $0x70] sm:$0xff] }
  0xcd   : > { %532 = vmatprep.mubr.f32.mxu0 %v3636_v0  ;;  %3032 = vmatpush3.bf16.msra.mxu0 %v3029_v37  ;;  %v800_v37 = vld [vmem:[%s3915_s15 + $0x10] sm:$0xff] }
  0xce   : > { %3034 = vmatprep.subr.bf16.mxu0 %v3033_v47  ;;  %2680 = vmatmul.mubr.f32.gmra.mrb[4].mxu1 %v368_v52  ;;  %v808_v45 = vld [vmem:[%s3915_s15 + $0x50] sm:$0xff] }
  0xcf   : > { %2996 = vmatpush1.bf16.msra.mxu1 %v2995_v51  ;;  %2682 = vmatprep.mubr.f32.mxu1 %v369_v61  ;;  %v429_v51 = vlaneseq }
  0xd0   : > { %533 = vmatmul.mubr.f32.gmra.mrb[8].mxu0 %v367_v42  ;;  %2998 = vmatprep.subr.bf16.mxu1 %v2997_v55  ;;  %v805_v42 = vld [vmem:[%s3915_s15 + $0x38] sm:$0xff] }
  0xd1   : > { %538 = vmatprep.mubr.f32.mxu0 %v3636_v0  ;;  %3036 = vmatpush3.bf16.msra.mxu0 %v3033_v47  ;;  %v810_v47 = vld [vmem:[%s3915_s15 + $0x60] sm:$0xff] }
  0xd2   : > { %3038 = vmatprep.subr.bf16.mxu0 %v3037_v57  ;;  %2683 = vmatmul.mubr.f32.gmra.mrb[6].mxu1 %v370_v2 }
  0xd3   : > { %3000 = vmatpush1.bf16.msra.mxu1 %v2999_v62  ;;  %2685 = vmatprep.mubr.f32.mxu1 %v371_v9 }
  0xd4   : > { %539 = vmatmul.mubr.f32.gmra.mrb[10].mxu0 %v368_v52  ;;  %3002 = vmatprep.subr.bf16.mxu1 %v3001_v3  ;;  %v4005_v52 = vshrl.u32 %v429_v51, 7 }
  0xd5   : > { %544 = vmatprep.mubr.f32.mxu0 %v3636_v0  ;;  %3040 = vmatpush3.bf16.msra.mxu0 %v3037_v57 }
  0xd6   : > { %3042 = vmatprep.subr.bf16.mxu0 %v3041_v5  ;;  %2686 = vmatmul.mubr.f32.gmra.mrb[8].mxu1 %v372_v13  ;;  %v431_v53 = vsub.s32 0, %v4005_v52  ;;  %v435_v55 = vsub.s32 1, %v4005_v52  ;;  %v439_v60 = vsub.s32 2, %v4005_v52 }
  0xd7   : > { %3004 = vmatpush1.bf16.msra.mxu1 %v3003_v10  ;;  %2688 = vmatprep.mubr.f32.mxu1 %v373_v18 }
  0xd8   : > { %545 = vmatmul.mubr.f32.gmra.mrb[12].mxu0 %v369_v61  ;;  %3006 = vmatprep.subr.bf16.mxu1 %v3005_v14  ;;  %v4014_v57 = vrot.slane %v427_v54, %v431_v53  ;;  %v4027_v6 = vrot.slane %v427_v54, %v439_v60 }
  0xd9   : > { %550 = vmatprep.mubr.f32.mxu0 %v3636_v0  ;;  %3044 = vmatpush3.bf16.msra.mxu0 %v3041_v5 }
  0xda   : > { %3046 = vmatprep.subr.bf16.mxu0 %v3045_v15  ;;  %2689 = vmatmul.mubr.f32.gmra.mrb[10].mxu1 %v374_v22 }
  0xdb   : > { %3008 = vmatpush1.bf16.msra.mxu1 %v3007_v19  ;;  %2691 = vmatprep.mubr.f32.mxu1 %v375_v26 }
  0xdc   : > { %551 = vmatmul.mubr.f32.gmra.mrb[14].mxu0 %v370_v2  ;;  %3010 = vmatprep.subr.bf16.mxu1 %v3009_v23 }
  0xdd   : > { %556 = vmatprep.mubr.f32.mxu0 %v3636_v0  ;;  %3048 = vmatpush3.bf16.msra.mxu0 %v3045_v15 }
  0xde   : > { %2692 = vmatmul.mubr.f32.gmra.mrb[12].mxu1 %v376_v30 }
  0xdf   : > { %3012 = vmatpush1.bf16.msra.mxu1 %v3011_v27  ;;  %2694 = vmatprep.mubr.f32.mxu1 %v377_v32 }
  0xe0   : > { %557 = vmatmul.mubr.f32.gmra.mrb[16].mxu0 %v371_v9  ;;  %3014 = vmatprep.subr.bf16.mxu1 %v3013_v31 }
  0xe1   : > { %562 = vmatprep.mubr.f32.mxu0 %v3636_v0 }
  0xe2   : > { %2695 = vmatmul.mubr.f32.gmra.mrb[14].mxu1 %v378_v33 }
  0xe3   : > { %3016 = vmatpush1.bf16.msra.mxu1 %v3015_v34  ;;  %943 = vmatprep.mubr.f32.mxu1 %v3636_v0 }
  0xe4   : > { %563 = vmatmul.mubr.f32.gmra.mrb[18].mxu0 %v372_v13 }
  0xe5   : > { %568 = vmatprep.mubr.f32.mxu0 %v3636_v0 }
  0xe6   : > { %944 = vmatmul.mubr.f32.vlgmr.msra.gmra.mrb[16].mxu1 %v798_v35 }
  0xe7   : > { %949 = vmatprep.mubr.f32.mxu1 %v3636_v0 }
  0xe8   : > { %569 = vmatmul.mubr.f32.gmra.mrb[20].mxu0 %v373_v18 }
  0xe9   : > { %574 = vmatprep.mubr.f32.mxu0 %v3636_v0 }
  0xea   : > { %950 = vmatmul.mubr.f32.gmra.mrb[18].mxu1 %v799_v36 }
  0xeb   : > { %955 = vmatprep.mubr.f32.mxu1 %v3636_v0 }
  0xec   : > { %575 = vmatmul.mubr.f32.gmra.mrb[22].mxu0 %v374_v22 }
  0xed   : > { %580 = vmatprep.mubr.f32.mxu0 %v3636_v0 }
  0xee   : > { %956 = vmatmul.mubr.f32.gmra.mrb[20].mxu1 %v800_v37 }
  0xef   : > { %961 = vmatprep.mubr.f32.mxu1 %v3636_v0 }
  0xf0   : > { %581 = vmatmul.mubr.f32.gmra.mrb[24].mxu0 %v375_v26 }
  0xf1   : > { %586 = vmatprep.mubr.f32.mxu0 %v3636_v0 }
  0xf2   : > { %962 = vmatmul.mubr.f32.gmra.mrb[22].mxu1 %v801_v38 }
  0xf3   : > { %967 = vmatprep.mubr.f32.mxu1 %v3636_v0 }
  0xf4   : > { %587 = vmatmul.mubr.f32.gmra.mrb[26].mxu0 %v376_v30 }
  0xf5   : > { %592 = vmatprep.mubr.f32.mxu0 %v3636_v0 }
  0xf6   : > { %968 = vmatmul.mubr.f32.gmra.mrb[24].mxu1 %v802_v39 }
  0xf7   : > { %973 = vmatprep.mubr.f32.mxu1 %v3636_v0 }
  0xf8   : > { %593 = vmatmul.mubr.f32.gmra.mrb[28].mxu0 %v377_v32 }
  0xf9   : > { %598 = vmatprep.mubr.f32.mxu0 %v3636_v0 }
  0xfa   : > { %974 = vmatmul.mubr.f32.gmra.mrb[26].mxu1 %v803_v40 }
  0xfb   : > { %979 = vmatprep.mubr.f32.mxu1 %v3636_v0 }
  0xfc   : > { %599 = vmatmul.mubr.f32.gmra.mrb[30].mxu0 %v378_v33 }
  0xfd   : > { %2729 = vmatprep.mubr.f32.mxu0 %v798_v35 }
  0xfe   : > { %980 = vmatmul.mubr.f32.gmra.mrb[28].mxu1 %v804_v41 }
  0xff   : > { %985 = vmatprep.mubr.f32.mxu1 %v3636_v0 }
 0x100   : > { %2730 = vmatmul.mubr.f32.vlgmr.msra.gmra.mrb[32].mxu0 %v799_v36 }
 0x101   : > { %2732 = vmatprep.mubr.f32.mxu0 %v800_v37 }
 0x102   : > { %986 = vmatmul.mubr.f32.gmra.mrb[30].mxu1 %v805_v42 }
 0x103   : > { %991 = vmatprep.mubr.f32.mxu1 %v3636_v0 }
 0x104   : > { %2733 = vmatmul.mubr.f32.gmra.mrb[34].mxu0 %v801_v38 }
 0x105   : > { %2735 = vmatprep.mubr.f32.mxu0 %v802_v39 }
 0x106   : > { %992 = vmatmul.mubr.f32.gmra.mrb[32].mxu1 %v806_v43 }
 0x107   : > { %997 = vmatprep.mubr.f32.mxu1 %v3636_v0 }
 0x108   : > { %2736 = vmatmul.mubr.f32.gmra.mrb[36].mxu0 %v803_v40 }
 0x109   : > { %2738 = vmatprep.mubr.f32.mxu0 %v804_v41 }
 0x10a   : > { %998 = vmatmul.mubr.f32.gmra.mrb[34].mxu1 %v807_v44 }
 0x10b   : > { %1003 = vmatprep.mubr.f32.mxu1 %v3636_v0 }
 0x10c   : > { %2739 = vmatmul.mubr.f32.gmra.mrb[38].mxu0 %v805_v42 }
 0x10d   : > { %2741 = vmatprep.mubr.f32.mxu0 %v806_v43 }
 0x10e   : > { %1004 = vmatmul.mubr.f32.gmra.mrb[36].mxu1 %v808_v45 }
 0x10f   : > { %1009 = vmatprep.mubr.f32.mxu1 %v3636_v0 }
 0x110   : > { %2742 = vmatmul.mubr.f32.gmra.mrb[40].mxu0 %v807_v44 }
 0x111   : > { %2744 = vmatprep.mubr.f32.mxu0 %v808_v45 }
 0x112   : > { %1010 = vmatmul.mubr.f32.gmra.mrb[38].mxu1 %v809_v46 }
 0x113   : > { %1015 = vmatprep.mubr.f32.mxu1 %v3636_v0 }
 0x114   : > { %2745 = vmatmul.mubr.f32.gmra.mrb[42].mxu0 %v809_v46 }
 0x115   : > { %2747 = vmatprep.mubr.f32.mxu0 %v810_v47 }
 0x116   : > { %1016 = vmatmul.mubr.f32.gmra.mrb[40].mxu1 %v810_v47 }
 0x117   : > { %1021 = vmatprep.mubr.f32.mxu1 %v3636_v0 }
 0x118   : > { %2748 = vmatmul.mubr.f32.gmra.mrb[44].mxu0 %v811_v48 }
 0x119   : > { %2750 = vmatprep.mubr.f32.mxu0 %v812_v49 }
 0x11a   : > { %1022 = vmatmul.mubr.f32.gmra.mrb[42].mxu1 %v811_v48 }
 0x11b   : > { %1027 = vmatprep.mubr.f32.mxu1 %v3636_v0 }
 0x11c   : > { %2751 = vmatmul.mubr.f32.gmra.mrb[46].mxu0 %v813_v50 }
 0x11e   : > { %1028 = vmatmul.mubr.f32.gmra.mrb[44].mxu1 %v812_v49 }
 0x11f   : > { %1033 = vmatprep.mubr.f32.mxu1 %v3636_v0  ;;  %v4018_v0 = vrot.slane %v427_v54, %v435_v55 }
 0x122   : > { %1034 = vmatmul.mubr.f32.gmra.mrb[46].mxu1 %v813_v50 }
 0x193   : > { %v510_v56 = vpop.f32.mrb[0].mxu0 }
 0x194   : > { %v512_v58 = vpop.f32.mrb[1].mxu0  ;;  %v511_v61 = vadd.f32 %v510_v56, %v4014_v57 }
 0x195   : > { %v513_v1 = vadd.f32 %v512_v58, %v4018_v0 }
 0x197   : > { %v516_v59 = vpop.f32.mrb[2].mxu0 }
 0x198   : > { %v517_v62 = vadd.f32 %v516_v59, %v4014_v57  ;;  %v518_v63 = vpop.f32.mrb[3].mxu0 }
 0x199   : > { %v519_v2 = vadd.f32 %v518_v63, %v4018_v0  ;;  %v2675_v8 = vpop.f32.mrb[0].mxu1 }
 0x19a   : > { %v3049_v3 = vpack.c.bf16 %v517_v62, %v511_v61  ;;  %v677_v10 = vadd.f32 %v2675_v8, %v4027_v6  ;;  %v671_v11 = vpop.f32.mrb[1].mxu1 }
 0x19b   : > { %v3081_v4 = vpack.c.bf16 %v519_v2, %v513_v1  ;;  %v522_v5 = vpop.f32.mrb[4].mxu0  ;;  %v672_v15 = vadd.f32 %v671_v11, %v4027_v6 }
 0x19c   : > { %v524_v7 = vpop.f32.mrb[5].mxu0  ;;  %3050 = vmatprep.subr.bf16.mxu1 %v3049_v3  ;;  %v523_v12 = vadd.f32 %v522_v5, %v4014_v57 }
 0x19d   : > { %3052 = vmatpush3.bf16.xpose.msra.mxu1 %v3049_v3  ;;  %3082 = vmatprep.subr.bf16.mxu0 %v3081_v4  ;;  %v525_v16 = vadd.f32 %v524_v7, %v4018_v0  ;;  %v4035_v19 = vpack.c.bf16 %v677_v10, %v672_v15  ;;  %v2678_v20 = vpop.f32.mrb[2].mxu1 }
 0x19e   : > { %3084 = vmatpush3.bf16.xpose.msra.mxu0 %v3081_v4  ;;  %v687_v23 = vadd.f32 %v2678_v20, %v4027_v6  ;;  %v681_v24 = vpop.f32.mrb[3].mxu1 }
 0x19f   : > { %v528_v9 = vpop.f32.mrb[6].mxu0  ;;  %v682_v26 = vadd.f32 %v681_v24, %v4027_v6 }
 0x1a0   : > { %v529_v13 = vadd.f32 %v528_v9, %v4014_v57  ;;  %v530_v14 = vpop.f32.mrb[7].mxu0 }
 0x1a1   : > { %v531_v17 = vadd.f32 %v530_v14, %v4018_v0  ;;  %v4039_v27 = vpack.c.bf16 %v687_v23, %v682_v26  ;;  %v2681_v28 = vpop.f32.mrb[4].mxu1 }
 0x1a2   : > { %v3053_v18 = vpack.c.bf16 %v529_v13, %v523_v12  ;;  %v697_v30 = vadd.f32 %v2681_v28, %v4027_v6  ;;  %v691_v31 = vpop.f32.mrb[5].mxu1 }
 0x1a3   : > { %v3085_v21 = vpack.c.bf16 %v531_v17, %v525_v16  ;;  %v534_v22 = vpop.f32.mrb[8].mxu0  ;;  %v692_v35 = vadd.f32 %v691_v31, %v4027_v6 }
 0x1a4   : > { %v536_v25 = vpop.f32.mrb[9].mxu0  ;;  %3054 = vmatprep.subr.bf16.mxu1 %v3053_v18  ;;  %v535_v32 = vadd.f32 %v534_v22, %v4014_v57 }
 0x1a5   : > { %3056 = vmatpush3.bf16.xpose.msra.mxu1 %v3053_v18  ;;  %3086 = vmatprep.subr.bf16.mxu0 %v3085_v21  ;;  %v537_v36 = vadd.f32 %v536_v25, %v4018_v0  ;;  %v4047_v39 = vpack.c.bf16 %v697_v30, %v692_v35  ;;  %v2684_v40 = vpop.f32.mrb[6].mxu1 }
 0x1a6   : > { %3088 = vmatpush3.bf16.xpose.msra.mxu0 %v3085_v21  ;;  %v707_v43 = vadd.f32 %v2684_v40, %v4027_v6  ;;  %v701_v44 = vpop.f32.mrb[7].mxu1  ;;  %v4072_v21 = vld [vmem:[%s4782_s4] sm:$0x7] }
 0x1a7   : > { %v540_v29 = vpop.f32.mrb[10].mxu0  ;;  %v702_v46 = vadd.f32 %v701_v44, %v4027_v6  ;;  %v4088_v35 = vrot.slane %v4072_v21, %v435_v55 }
 0x1a8   : > { %v541_v33 = vadd.f32 %v540_v29, %v4014_v57  ;;  %v542_v34 = vpop.f32.mrb[11].mxu0 }
 0x1a9   : > { %v543_v37 = vadd.f32 %v542_v34, %v4018_v0  ;;  %v4051_v47 = vpack.c.bf16 %v707_v43, %v702_v46  ;;  %v2687_v48 = vpop.f32.mrb[8].mxu1 }
 0x1aa   : > { %v3057_v38 = vpack.c.bf16 %v541_v33, %v535_v32  ;;  %v717_v50 = vadd.f32 %v2687_v48, %v4027_v6  ;;  %v711_v54 = vpop.f32.mrb[9].mxu1  ;;  %v4082_v32 = vrot.slane %v4072_v21, %v431_v53 }
 0x1ab   : > { %v3089_v41 = vpack.c.bf16 %v543_v37, %v537_v36  ;;  %v546_v42 = vpop.f32.mrb[12].mxu0  ;;  %v712_v61 = vadd.f32 %v711_v54, %v4027_v6 }
 0x1ac   : > { %v548_v45 = vpop.f32.mrb[13].mxu0  ;;  %3058 = vmatprep.subr.bf16.mxu1 %v3057_v38  ;;  %v547_v56 = vadd.f32 %v546_v42, %v4014_v57 }
 0x1ad   : > { %3060 = vmatpush3.bf16.xpose.msra.mxu1 %v3057_v38  ;;  %3090 = vmatprep.subr.bf16.mxu0 %v3089_v41  ;;  %v549_v62 = vadd.f32 %v548_v45, %v4018_v0  ;;  %v4059_v2 = vpack.c.bf16 %v717_v50, %v712_v61  ;;  %v2690_v3 = vpop.f32.mrb[10].mxu1 }
 0x1ae   : > { %3092 = vmatpush3.bf16.xpose.msra.mxu0 %v3089_v41  ;;  %v727_v7 = vadd.f32 %v2690_v3, %v4027_v6  ;;  %v721_v8 = vpop.f32.mrb[11].mxu1 }
 0x1af   : > { %v552_v49 = vpop.f32.mrb[14].mxu0  ;;  %v722_v10 = vadd.f32 %v721_v8, %v4027_v6 }
 0x1b0   : > { %v553_v58 = vadd.f32 %v552_v49, %v4014_v57  ;;  %v554_v59 = vpop.f32.mrb[15].mxu0 }
 0x1b1   : > { %v555_v63 = vadd.f32 %v554_v59, %v4018_v0  ;;  %v4063_v11 = vpack.c.bf16 %v727_v7, %v722_v10  ;;  %v2693_v12 = vpop.f32.mrb[12].mxu1 }
 0x1b2   : > { %v3061_v1 = vpack.c.bf16 %v553_v58, %v547_v56  ;;  %v737_v14 = vadd.f32 %v2693_v12, %v4027_v6  ;;  %v731_v15 = vpop.f32.mrb[13].mxu1 }
 0x1b3   : > { %v3093_v4 = vpack.c.bf16 %v555_v63, %v549_v62  ;;  %v558_v5 = vpop.f32.mrb[16].mxu0  ;;  %v732_v20 = vadd.f32 %v731_v15, %v4027_v6 }
 0x1b4   : > { %v560_v9 = vpop.f32.mrb[17].mxu0  ;;  %3062 = vmatprep.subr.bf16.mxu1 %v3061_v1  ;;  %v559_v16 = vadd.f32 %v558_v5, %v4014_v57 }
 0x1b5   : > { %3064 = vmatpush3.bf16.xpose.msra.mxu1 %v3061_v1  ;;  %3094 = vmatprep.subr.bf16.mxu0 %v3093_v4  ;;  %v561_v22 = vadd.f32 %v560_v9, %v4018_v0  ;;  %v4076_v25 = vpack.c.bf16 %v737_v14, %v732_v20  ;;  %v2696_v26 = vpop.f32.mrb[14].mxu1 }
 0x1b6   : > { %3096 = vmatpush3.bf16.xpose.msra.mxu0 %v3093_v4  ;;  %v747_v30 = vadd.f32 %v2696_v26, %v4027_v6  ;;  %v741_v31 = vpop.f32.mrb[15].mxu1 }
 0x1b7   : > { %v564_v13 = vpop.f32.mrb[18].mxu0  ;;  %v742_v34 = vadd.f32 %v741_v31, %v4027_v6 }
 0x1b8   : > { %v565_v17 = vadd.f32 %v564_v13, %v4014_v57  ;;  %v566_v18 = vpop.f32.mrb[19].mxu0 }
 0x1b9   : > { %v567_v23 = vadd.f32 %v566_v18, %v4018_v0  ;;  %v4090_v36 = vpack.c.bf16 %v747_v30, %v742_v34  ;;  %v945_v37 = vpop.f32.mrb[16].mxu1 }
 0x1ba   : > { %v3065_v24 = vpack.c.bf16 %v565_v17, %v559_v16  ;;  %v946_v40 = vadd.f32 %v945_v37, %v4082_v32  ;;  %v947_v53 = vpop.f32.mrb[17].mxu1 }
 0x1bb   : > { %v3097_v28 = vpack.c.bf16 %v567_v23, %v561_v22  ;;  %v570_v29 = vpop.f32.mrb[20].mxu0  ;;  %v948_v43 = vadd.f32 %v947_v53, %v4088_v35 }
 0x1bc   : > { %v572_v33 = vpop.f32.mrb[21].mxu0  ;;  %3066 = vmatprep.subr.bf16.mxu1 %v3065_v24  ;;  %v571_v41 = vadd.f32 %v570_v29, %v4014_v57  ;;  %2785 = vmatprep.mubr.f32.mxu1 %v946_v40 }
 0x1bd   : > { %3068 = vmatpush3.bf16.xpose.msra.mxu1 %v3065_v24  ;;  %3098 = vmatprep.subr.bf16.mxu0 %v3097_v28  ;;  %v573_v55 = vadd.f32 %v572_v33, %v4018_v0  ;;  %v951_v46 = vpop.f32.mrb[18].mxu1 }
 0x1be   : > { %3100 = vmatpush3.bf16.xpose.msra.mxu0 %v3097_v28  ;;  %2841 = vmatprep.mubr.f32.mxu0 %v948_v43  ;;  %v953_v50 = vpop.f32.mrb[19].mxu1 }
 0x1bf   : > { %v576_v38 = vpop.f32.mrb[22].mxu0  ;;  %v954_v34 = vadd.f32 %v953_v50, %v4088_v35 }
 0x1c0   : > { %v577_v42 = vadd.f32 %v576_v38, %v4014_v57  ;;  %v578_v6 = vpop.f32.mrb[23].mxu0 }
 0x1c1   : > { %v579_v44 = vadd.f32 %v578_v6, %v4018_v0  ;;  %v957_v56 = vpop.f32.mrb[20].mxu1 }
 0x1c2   : > { %v3069_v45 = vpack.c.bf16 %v577_v42, %v571_v41  ;;  %v959_v59 = vpop.f32.mrb[21].mxu1  ;;  %v958_v37 = vadd.f32 %v957_v56, %v4082_v32 }
 0x1c3   : > { %v3101_v48 = vpack.c.bf16 %v579_v44, %v573_v55  ;;  %v582_v49 = vpop.f32.mrb[24].mxu0  ;;  %v960_v40 = vadd.f32 %v959_v59, %v4088_v35 }
 0x1c4   : > { %v584_v54 = vpop.f32.mrb[25].mxu0  ;;  %3070 = vmatprep.subr.bf16.mxu1 %v3069_v45  ;;  %v583_v61 = vadd.f32 %v582_v49, %v4014_v57 }
 0x1c5   : > { %3072 = vmatpush3.bf16.xpose.msra.mxu1 %v3069_v45  ;;  %3102 = vmatprep.subr.bf16.mxu0 %v3101_v48  ;;  %v585_v1 = vadd.f32 %v584_v54, %v4018_v0  ;;  %v963_v5 = vpop.f32.mrb[22].mxu1 }
 0x1c6   : > { %3104 = vmatpush3.bf16.xpose.msra.mxu0 %v3101_v48  ;;  %v965_v9 = vpop.f32.mrb[23].mxu1  ;;  %v964_v42 = vadd.f32 %v963_v5, %v4082_v32 }
 0x1c7   : > { %v588_v58 = vpop.f32.mrb[26].mxu0  ;;  %v966_v43 = vadd.f32 %v965_v9, %v4088_v35 }
 0x1c8   : > { %v589_v62 = vadd.f32 %v588_v58, %v4014_v57  ;;  %v590_v63 = vpop.f32.mrb[27].mxu0 }
 0x1c9   : > { %v591_v3 = vadd.f32 %v590_v63, %v4018_v0  ;;  %v969_v12 = vpop.f32.mrb[24].mxu1 }
 0x1ca   : > { %v3073_v4 = vpack.c.bf16 %v589_v62, %v583_v61  ;;  %v971_v14 = vpop.f32.mrb[25].mxu1  ;;  %v970_v55 = vadd.f32 %v969_v12, %v4082_v32 }
 0x1cb   : > { %v3105_v7 = vpack.c.bf16 %v591_v3, %v585_v1  ;;  %v594_v8 = vpop.f32.mrb[28].mxu0  ;;  %v972_v44 = vadd.f32 %v971_v14, %v4088_v35 }
 0x1cc   : > { %v596_v10 = vpop.f32.mrb[29].mxu0  ;;  %3074 = vmatprep.subr.bf16.mxu1 %v3073_v4  ;;  %v595_v15 = vadd.f32 %v594_v8, %v4014_v57 }
 0x1cd   : > { %3076 = vmatpush3.bf16.xpose.msra.mxu1 %v3073_v4  ;;  %3106 = vmatprep.subr.bf16.mxu0 %v3105_v7  ;;  %v597_v18 = vadd.f32 %v596_v10, %v4018_v0  ;;  %v975_v23 = vpop.f32.mrb[26].mxu1 }
 0x1ce   : > { %3108 = vmatpush3.bf16.xpose.msra.mxu0 %v3105_v7  ;;  %v977_v26 = vpop.f32.mrb[27].mxu1  ;;  %v976_v49 = vadd.f32 %v975_v23, %v4082_v32 }
 0x1cf   : > { %v600_v13 = vpop.f32.mrb[30].mxu0 }
 0x1d0   : > { %v601_v16 = vadd.f32 %v600_v13, %v4014_v57  ;;  %v602_v17 = vpop.f32.mrb[31].mxu0 }
 0x1d1   : > { %v603_v20 = vadd.f32 %v602_v17, %v4018_v0  ;;  %v981_v57 = vpop.f32.mrb[28].mxu1  ;;  %v952_v0 = vadd.f32 %v951_v46, %v4082_v32 }
 0x1d2   : > { %v3077_v22 = vpack.c.bf16 %v601_v16, %v595_v15  ;;  %v983_v30 = vpop.f32.mrb[29].mxu1  ;;  %v982_v54 = vadd.f32 %v981_v57, %v4082_v32 }
 0x1d3   : > { %v3109_v24 = vpack.c.bf16 %v603_v20, %v597_v18  ;;  %v4106_v28 = vpop.f32.mrb[32].mxu0  ;;  %v984_v58 = vadd.f32 %v983_v30, %v4088_v35 }
 0x1d4   : > { %3078 = vmatprep.subr.bf16.mxu1 %v3077_v22  ;;  %v4108_v29 = vpop.f32.mrb[33].mxu0 }
 0x1d5   : > { %3080 = vmatpush3.bf16.xpose.msra.mxu1 %v3077_v22  ;;  %3110 = vmatprep.subr.bf16.mxu0 %v3109_v24  ;;  %v987_v38 = vpop.f32.mrb[30].mxu1 }
 0x1d6   : > { %3112 = vmatpush3.bf16.xpose.msra.mxu0 %v3109_v24  ;;  %3114 = vmatprep.subr.bf16.mxu1 %v4035_v19  ;;  %v989_v53 = vpop.f32.mrb[31].mxu1  ;;  %v988_v62 = vadd.f32 %v987_v38, %v4082_v32 }
 0x1d7   : > { %v4111_v31 = vpop.f32.mrb[34].mxu0  ;;  %v990_v1 = vadd.f32 %v989_v53, %v4088_v35 }
 0x1d8   : > { %v4114_v33 = vpop.f32.mrb[35].mxu0 }
 0x1d9   : > { %v993_v45 = vpop.f32.mrb[32].mxu1 }
 0x1da   : > { %v995_v46 = vpop.f32.mrb[33].mxu1  ;;  %v994_v3 = vadd.f32 %v993_v45, %v4082_v32 }
 0x1db   : > { %v4119_v41 = vpop.f32.mrb[36].mxu0  ;;  %v996_v4 = vadd.f32 %v995_v46, %v4088_v35 }
 0x1dc   : > { %2786 = vmatmul.mubr.f32.vlgmr.msra.gmra.mrb[48].mxu1 %v952_v0  ;;  %v4122_v6 = vpop.f32.mrb[37].mxu0 }
 0x1dd   : > { %2842 = vmatmul.mubr.f32.vlgmr.msra.gmra.mrb[48].mxu0 %v954_v34  ;;  %3116 = vmatpush3.bf16.xpose.msra.mxu1 %v4035_v19  ;;  %v978_v19 = vadd.f32 %v977_v26, %v4088_v35  ;;  %v999_v56 = vpop.f32.mrb[34].mxu1 }
 0x1de   : > { %3118 = vmatprep.subr.bf16.mxu1 %v4039_v27  ;;  %2788 = vmatprep.mubr.f32.mxu1 %v958_v37  ;;  %v1001_v59 = vpop.f32.mrb[35].mxu1  ;;  %v1000_v9 = vadd.f32 %v999_v56, %v4082_v32 }
 0x1df   : > { %2844 = vmatprep.mubr.f32.mxu0 %v960_v40  ;;  %v4129_v48 = vpop.f32.mrb[38].mxu0 }
 0x1e0   : > { %2789 = vmatmul.mubr.f32.gmra.mrb[50].mxu1 %v964_v42  ;;  %v4132_v50 = vpop.f32.mrb[39].mxu0  ;;  %v875_v42 = vrot.slane %v4072_v21, %v439_v60 }
 0x1e1   : > { %2845 = vmatmul.mubr.f32.gmra.mrb[50].mxu0 %v966_v43  ;;  %2791 = vmatprep.mubr.f32.mxu1 %v970_v55  ;;  %v1005_v5 = vpop.f32.mrb[36].mxu1 }
 0x1e2   : > { %2847 = vmatprep.mubr.f32.mxu0 %v972_v44  ;;  %v1007_v7 = vpop.f32.mrb[37].mxu1  ;;  %v1006_v12 = vadd.f32 %v1005_v5, %v4082_v32  ;;  %v1107_v45 = vadd.f32 %v4108_v29, %v875_v42  ;;  %v1112_v52 = vadd.f32 %v4106_v28, %v875_v42  ;;  %v1117_v60 = vadd.f32 %v4114_v33, %v875_v42 }
 0x1e3   : > { %v4137_v61 = vpop.f32.mrb[40].mxu0  ;;  %v1008_v14 = vadd.f32 %v1007_v7, %v4088_v35  ;;  %v1127_v21 = vadd.f32 %v4122_v6, %v875_v42 }
 0x1e4   : > { %2792 = vmatmul.mubr.f32.gmra.mrb[52].mxu1 %v976_v49  ;;  %v4140_v63 = vpop.f32.mrb[41].mxu0 }
 0x1e5   : > { %3120 = vmatpush3.bf16.xpose.msra.mxu1 %v4039_v27  ;;  %2848 = vmatmul.mubr.f32.gmra.mrb[52].mxu0 %v978_v19  ;;  %v1002_v27 = vadd.f32 %v1001_v59, %v4088_v35  ;;  %v1011_v13 = vpop.f32.mrb[38].mxu1 }
 0x1e6   : > { %3122 = vmatprep.subr.bf16.mxu1 %v4047_v39  ;;  %2794 = vmatprep.mubr.f32.mxu1 %v982_v54  ;;  %v1013_v15 = vpop.f32.mrb[39].mxu1  ;;  %v1012_v17 = vadd.f32 %v1011_v13, %v4082_v32 }
 0x1e7   : > { %2850 = vmatprep.mubr.f32.mxu0 %v984_v58  ;;  %v4147_v8 = vpop.f32.mrb[42].mxu0  ;;  %v1014_v20 = vadd.f32 %v1013_v15, %v4088_v35 }
 0x1e8   : > { %2795 = vmatmul.mubr.f32.gmra.mrb[54].mxu1 %v988_v62  ;;  %v4150_v10 = vpop.f32.mrb[43].mxu0  ;;  %v1162_v29 = vadd.f32 %v4147_v8, %v875_v42 }
 0x1e9   : > { %2851 = vmatmul.mubr.f32.gmra.mrb[54].mxu0 %v990_v1  ;;  %2797 = vmatprep.mubr.f32.mxu1 %v994_v3  ;;  %v1017_v22 = vpop.f32.mrb[40].mxu1  ;;  %v1157_v28 = vadd.f32 %v4150_v10, %v875_v42 }
 0x1ea   : > { %2853 = vmatprep.mubr.f32.mxu0 %v996_v4  ;;  %v1018_v23 = vadd.f32 %v1017_v22, %v4082_v32  ;;  %v1019_v24 = vpop.f32.mrb[41].mxu1 }
 0x1eb   : > { %v4155_v16 = vpop.f32.mrb[44].mxu0  ;;  %v1020_v57 = vadd.f32 %v1019_v24, %v4088_v35 }
 0x1ec   : > { %2798 = vmatmul.mubr.f32.gmra.mrb[56].mxu1 %v1000_v9  ;;  %v4158_v18 = vpop.f32.mrb[45].mxu0  ;;  %v1172_v33 = vadd.f32 %v4155_v16, %v875_v42 }
 0x1ed   : > { %3124 = vmatpush3.bf16.xpose.msra.mxu1 %v4047_v39  ;;  %2854 = vmatmul.mubr.f32.gmra.mrb[56].mxu0 %v1002_v27  ;;  %v1023_v39 = vpop.f32.mrb[42].mxu1 }
 0x1ee   : > { %3126 = vmatprep.subr.bf16.mxu1 %v4051_v47  ;;  %2800 = vmatprep.mubr.f32.mxu1 %v1006_v12  ;;  %v1024_v0 = vadd.f32 %v1023_v39, %v4082_v32  ;;  %v1025_v34 = vpop.f32.mrb[43].mxu1 }
 0x1ef   : > { %2856 = vmatprep.mubr.f32.mxu0 %v1008_v14  ;;  %v4164_v26 = vpop.f32.mrb[46].mxu0  ;;  %v1026_v37 = vadd.f32 %v1025_v34, %v4088_v35 }
 0x1f0   : > { %2801 = vmatmul.mubr.f32.gmra.mrb[58].mxu1 %v1012_v17  ;;  %v1176_v30 = vpop.f32.mrb[47].mxu0  ;;  %v1182_v6 = vadd.f32 %v4164_v26, %v875_v42 }
 0x1f1   : > { %2857 = vmatmul.mubr.f32.gmra.mrb[58].mxu0 %v1014_v20  ;;  %2803 = vmatprep.mubr.f32.mxu1 %v1018_v23  ;;  %v1029_v38 = vpop.f32.mrb[44].mxu1 }
 0x1f2   : > { %2859 = vmatprep.mubr.f32.mxu0 %v1020_v57  ;;  %v1030_v40 = vadd.f32 %v1029_v38, %v4082_v32  ;;  %v1031_v53 = vpop.f32.mrb[45].mxu1 }
 0x1f3   : > { %v1032_v43 = vadd.f32 %v1031_v53, %v4088_v35 }
 0x1f4   : > { %2804 = vmatmul.mubr.f32.gmra.mrb[60].mxu1 %v1024_v0 }
 0x1f5   : > { %3128 = vmatpush3.bf16.xpose.msra.mxu1 %v4051_v47  ;;  %2860 = vmatmul.mubr.f32.gmra.mrb[60].mxu0 %v1026_v37  ;;  %v1035_v55 = vpop.f32.mrb[46].mxu1 }
 0x1f6   : > { %3130 = vmatprep.subr.bf16.mxu1 %v4059_v2  ;;  %2806 = vmatprep.mubr.f32.mxu1 %v1030_v40  ;;  %v1036_v44 = vadd.f32 %v1035_v55, %v4082_v32  ;;  %v1037_v47 = vpop.f32.mrb[47].mxu1  ;;  %v1142_v32 = vadd.f32 %v4129_v48, %v875_v42  ;;  %v4201_v48 = vand.u32 127, %v429_v51 }
 0x1f7   : > { %2862 = vmatprep.mubr.f32.mxu0 %v1032_v43  ;;  %v1038_v46 = vadd.f32 %v1037_v47, %v4088_v35  ;;  %v1147_v35 = vadd.f32 %v4140_v63, %v875_v42 }
 0x1f8   : > { %2807 = vmatmul.mubr.f32.gmra.mrb[62].mxu1 %v1036_v44  ;;  %vm1187_vm0 = vcmp.lt.s32.totalorder %v4201_v48, 8 }
 0x1f9   : > { %2863 = vmatmul.mubr.f32.gmra.mrb[62].mxu0 %v1038_v46  ;;  %2897 = vmatprep.mubr.f32.mxu1 %v1107_v45 }
 0x1fd   : > { %3132 = vmatpush3.bf16.xpose.msra.mxu1 %v4059_v2  ;;  %v1122_v2 = vadd.f32 %v4111_v31, %v875_v42  ;;  %v1167_v31 = vadd.f32 %v4158_v18, %v875_v42 }
 0x1fe   : > { %3134 = vmatprep.subr.bf16.mxu1 %v4063_v11 }
 0x205   : > { %3136 = vmatpush3.bf16.xpose.msra.mxu1 %v4063_v11  ;;  %v1132_v11 = vadd.f32 %v4119_v41, %v875_v42  ;;  %v1177_v41 = vadd.f32 %v1176_v30, %v875_v42 }
 0x206   : > { %3138 = vmatprep.subr.bf16.mxu1 %v4076_v25 }
 0x20d   : > { %3140 = vmatpush3.bf16.xpose.msra.mxu1 %v4076_v25  ;;  %v1137_v25 = vadd.f32 %v4132_v50, %v875_v42 }
 0x20e   : > { %3142 = vmatprep.subr.bf16.mxu1 %v4090_v36 }
 0x215   : > { %3144 = vmatpush3.bf16.xpose.msra.mxu1 %v4090_v36  ;;  %v1152_v36 = vadd.f32 %v4137_v61, %v875_v42 }
 0x21c   : > { %2898 = vmatmul.mubr.f32.vlgmr.msra.gmra.mrb[64].mxu1 %v1112_v52 }
 0x21d   : > { %2900 = vmatprep.mubr.f32.mxu1 %v1117_v60 }
 0x220   : > { %2901 = vmatmul.mubr.f32.gmra.mrb[66].mxu1 %v1122_v2 }
 0x221   : > { %2903 = vmatprep.mubr.f32.mxu1 %v1127_v21 }
 0x224   : > { %2904 = vmatmul.mubr.f32.gmra.mrb[68].mxu1 %v1132_v11 }
 0x225   : > { %2906 = vmatprep.mubr.f32.mxu1 %v1137_v25 }
 0x228   : > { %2907 = vmatmul.mubr.f32.gmra.mrb[70].mxu1 %v1142_v32 }
 0x229   : > { %2909 = vmatprep.mubr.f32.mxu1 %v1147_v35 }
 0x22c   : > { %2910 = vmatmul.mubr.f32.gmra.mrb[72].mxu1 %v1152_v36 }
 0x22d   : > { %2912 = vmatprep.mubr.f32.mxu1 %v1157_v28 }
 0x230   : > { %2913 = vmatmul.mubr.f32.gmra.mrb[74].mxu1 %v1162_v29 }
 0x231   : > { %2915 = vmatprep.mubr.f32.mxu1 %v1167_v31 }
 0x234   : > { %2916 = vmatmul.mubr.f32.gmra.mrb[76].mxu1 %v1172_v33 }
 0x235   : > { %2918 = vmatprep.mubr.f32.mxu1 %v1177_v41 }
 0x238   : > { %2919 = vmatmul.mubr.f32.gmra.mrb[78].mxu1 %v1182_v6 }
 0x2af   : > { %v2787_v49 = vpop.f32.mrb[48].mxu1 }
 0x2b0   : > { %v1350_v50 = vmul.f32 0.17677669, %v2787_v49  ;;  %v1270_v19 = vpop.f32.mrb[49].mxu1  ;;  %v2843_v54 = vpop.f32.mrb[48].mxu0 }
 0x2b1   : > { %v1705_v56 = vmul.f32 0.17677669, %v2843_v54  ;;  %v1625_v58 = vpop.f32.mrb[49].mxu0  ;;  %v1349_v59 = vmul.f32 0.17677669, %v1270_v19 }
 0x2b2   : > { %v4206_v61 = vsel %vm1187_vm0, %v1350_v50, -1e+30  ;;  %v1704_v7 = vmul.f32 0.17677669, %v1625_v58 }
 0x2b3   : > { %1385 = vmax.xlane.f32.xlu0 %v4206_v61  ;;  %v4211_v62 = vsel %vm1187_vm0, %v1705_v56, -1e+30  ;;  %v2790_v51 = vpop.f32.mrb[50].mxu1  ;;  %v4216_v8 = vsel %vm1187_vm0, %v1349_v59, -1e+30 }
 0x2b4   : > { %1738 = vmax.xlane.f32.xlu1 %v4211_v62  ;;  %v1352_v63 = vmul.f32 0.17677669, %v2790_v51  ;;  %v2846_v1 = vpop.f32.mrb[50].mxu0  ;;  %v1280_v3 = vpop.f32.mrb[51].mxu1  ;;  %v4230_v16 = vsel %vm1187_vm0, %v1704_v7, -1e+30 }
 0x2b5   : > { %v1635_v4 = vpop.f32.mrb[51].mxu0  ;;  %v1351_v5 = vmul.f32 0.17677669, %v1280_v3  ;;  %v1707_v17 = vmul.f32 0.17677669, %v2846_v1 }
 0x2b6   : > { %v4220_v9 = vsel %vm1187_vm0, %v1352_v63, -1e+30  ;;  %v1706_v15 = vmul.f32 0.17677669, %v1635_v4 }
 0x2b7   : > { %1383 = vmax.xlane.f32.xlu0 %v4216_v8  ;;  %v2793_v10 = vpop.f32.mrb[52].mxu1  ;;  %v4226_v13 = vsel %vm1187_vm0, %v1351_v5, -1e+30  ;;  %v4241_v30 = vsel %vm1187_vm0, %v1707_v17, -1e+30 }
 0x2b8   : > { %1389 = vmax.xlane.f32.xlu1 %v4220_v9  ;;  %v1290_v27 = vpop.f32.mrb[53].mxu1  ;;  %v2849_v12 = vpop.f32.mrb[52].mxu0  ;;  %v1354_v24 = vmul.f32 0.17677669, %v2793_v10  ;;  %v4236_v57 = vsel %vm1187_vm0, %v1706_v15, -1e+30 }
 0x2b9   : > { %v1645_v14 = vpop.f32.mrb[53].mxu0  ;;  %v1353_v20 = vmul.f32 0.17677669, %v1290_v27  ;;  %v1709_v42 = vmul.f32 0.17677669, %v2849_v12 }
 0x2ba   : > { %v1708_v0 = vmul.f32 0.17677669, %v1645_v14  ;;  %v4250_v40 = vsel %vm1187_vm0, %v1354_v24, -1e+30 }
 0x2bb   : > { %1736 = vmax.xlane.f32.xlu0 %v4230_v16  ;;  %v2796_v18 = vpop.f32.mrb[54].mxu1  ;;  %v4246_v34 = vsel %vm1187_vm0, %v1353_v20, -1e+30  ;;  %v4261_v60 = vsel %vm1187_vm0, %v1709_v42, -1e+30 }
 0x2bc   : > { %1387 = vmax.xlane.f32.xlu1 %v4226_v13  ;;  %v1300_v22 = vpop.f32.mrb[55].mxu1  ;;  %v2852_v23 = vpop.f32.mrb[54].mxu0  ;;  %v4256_v55 = vsel %vm1187_vm0, %v1708_v0, -1e+30  ;;  %v1356_v46 = vmul.f32 0.17677669, %v2796_v18 }
 0x2bd   : > { %v1655_v26 = vpop.f32.mrb[55].mxu0  ;;  %v1355_v44 = vmul.f32 0.17677669, %v1300_v22  ;;  %v1711_v36 = vmul.f32 0.17677669, %v2852_v23 }
 0x2be   : > { %v1710_v2 = vmul.f32 0.17677669, %v1655_v26  ;;  %v4270_v11 = vsel %vm1187_vm0, %v1356_v46, -1e+30 }
 0x2bf   : > { %1740 = vmax.xlane.f32.xlu0 %v4236_v57  ;;  %v2799_v39 = vpop.f32.mrb[56].mxu1  ;;  %v4266_v21 = vsel %vm1187_vm0, %v1355_v44, -1e+30  ;;  %v4281_v41 = vsel %vm1187_vm0, %v1711_v36, -1e+30 }
 0x2c0   : > { %1742 = vmax.xlane.f32.xlu1 %v4241_v30  ;;  %v1310_v37 = vpop.f32.mrb[57].mxu1  ;;  %v2855_v38 = vpop.f32.mrb[56].mxu0  ;;  %v4276_v29 = vsel %vm1187_vm0, %v1710_v2, -1e+30  ;;  %v1358_v33 = vmul.f32 0.17677669, %v2799_v39 }
 0x2c1   : > { %v1665_v53 = vpop.f32.mrb[57].mxu0  ;;  %v1357_v31 = vmul.f32 0.17677669, %v1310_v37  ;;  %v1713_v58 = vmul.f32 0.17677669, %v2855_v38 }
 0x2c2   : > { %v1712_v6 = vmul.f32 0.17677669, %v1665_v53  ;;  %v4290_v50 = vsel %vm1187_vm0, %v1358_v33, -1e+30 }
 0x2c3   : > { %1391 = vmax.xlane.f32.xlu0 %v4246_v34  ;;  %v2802_v43 = vpop.f32.mrb[58].mxu1  ;;  %v4286_v49 = vsel %vm1187_vm0, %v1357_v31, -1e+30  ;;  %v4301_v3 = vsel %vm1187_vm0, %v1713_v58, -1e+30 }
 0x2c4   : > { %1393 = vmax.xlane.f32.xlu1 %v4250_v40  ;;  %v1320_v47 = vpop.f32.mrb[59].mxu1  ;;  %v2858_v45 = vpop.f32.mrb[58].mxu0  ;;  %v4296_v51 = vsel %vm1187_vm0, %v1712_v6, -1e+30  ;;  %v1360_v1 = vmul.f32 0.17677669, %v2802_v43 }
 0x2c5   : > { %v1675_v52 = vpop.f32.mrb[59].mxu0  ;;  %v1359_v63 = vmul.f32 0.17677669, %v1320_v47  ;;  %v1715_v10 = vmul.f32 0.17677669, %v2858_v45 }
 0x2c6   : > { %v1714_v4 = vmul.f32 0.17677669, %v1675_v52  ;;  %v4310_v7 = vsel %vm1187_vm0, %v1360_v1, -1e+30 }
 0x2c7   : > { %1744 = vmax.xlane.f32.xlu0 %v4256_v55  ;;  %v2805_v25 = vpop.f32.mrb[60].mxu1  ;;  %v4306_v5 = vsel %vm1187_vm0, %v1359_v63, -1e+30  ;;  %v4321_v15 = vsel %vm1187_vm0, %v1715_v10, -1e+30 }
 0x2c8   : > { %1746 = vmax.xlane.f32.xlu1 %v4261_v60  ;;  %v1330_v32 = vpop.f32.mrb[61].mxu1  ;;  %v2861_v35 = vpop.f32.mrb[60].mxu0  ;;  %v4316_v27 = vsel %vm1187_vm0, %v1714_v4, -1e+30  ;;  %v1362_v14 = vmul.f32 0.17677669, %v2805_v25 }
 0x2c9   : > { %v1685_v28 = vpop.f32.mrb[61].mxu0  ;;  %v1361_v12 = vmul.f32 0.17677669, %v1330_v32  ;;  %v1717_v22 = vmul.f32 0.17677669, %v2861_v35 }
 0x2ca   : > { %v1716_v17 = vmul.f32 0.17677669, %v1685_v28  ;;  %v4330_v20 = vsel %vm1187_vm0, %v1362_v14, -1e+30 }
 0x2cb   : > { %1395 = vmax.xlane.f32.xlu0 %v4266_v21  ;;  %v2808_v19 = vpop.f32.mrb[62].mxu1  ;;  %v4326_v18 = vsel %vm1187_vm0, %v1361_v12, -1e+30  ;;  %v4341_v39 = vsel %vm1187_vm0, %v1717_v22, -1e+30 }
 0x2cc   : > { %1397 = vmax.xlane.f32.xlu1 %v4270_v11  ;;  %v1340_v54 = vpop.f32.mrb[63].mxu1  ;;  %v2864_v56 = vpop.f32.mrb[62].mxu0  ;;  %v4336_v23 = vsel %vm1187_vm0, %v1716_v17, -1e+30  ;;  %v1364_v26 = vmul.f32 0.17677669, %v2808_v19 }
 0x2cd   : > { %v1695_v59 = vpop.f32.mrb[63].mxu0  ;;  %v1363_v24 = vmul.f32 0.17677669, %v1340_v54  ;;  %v1719_v53 = vmul.f32 0.17677669, %v2864_v56 }
 0x2ce   : > { %v1718_v0 = vmul.f32 0.17677669, %v1695_v59  ;;  %v4350_v38 = vsel %vm1187_vm0, %v1364_v26, -1e+30 }
 0x2cf   : > { %1748 = vmax.xlane.f32.xlu0 %v4276_v29  ;;  %v4346_v37 = vsel %vm1187_vm0, %v1363_v24, -1e+30  ;;  %v4361_v44 = vsel %vm1187_vm0, %v1719_v53, -1e+30 }
 0x2d0   : > { %1750 = vmax.xlane.f32.xlu1 %v4281_v41  ;;  %v4356_v42 = vsel %vm1187_vm0, %v1718_v0, -1e+30 }
 0x2d3   : > { %1399 = vmax.xlane.f32.xlu0 %v4286_v49 }
 0x2d4   : > { %1401 = vmax.xlane.f32.xlu1 %v4290_v50 }
 0x2d7   : > { %1752 = vmax.xlane.f32.xlu0 %v4296_v51 }
 0x2d8   : > { %1754 = vmax.xlane.f32.xlu1 %v4301_v3 }
 0x2db   : > { %1403 = vmax.xlane.f32.xlu0 %v4306_v5 }
 0x2dc   : > { %1405 = vmax.xlane.f32.xlu1 %v4310_v7 }
 0x2df   : > { %1756 = vmax.xlane.f32.xlu0 %v4316_v27 }
 0x2e0   : > { %1758 = vmax.xlane.f32.xlu1 %v4321_v15 }
 0x2e3   : > { %1407 = vmax.xlane.f32.xlu0 %v4326_v18 }
 0x2e4   : > { %1409 = vmax.xlane.f32.xlu1 %v4330_v20 }
 0x2e7   : > { %1760 = vmax.xlane.f32.xlu0 %v4336_v23 }
 0x2e8   : > { %1762 = vmax.xlane.f32.xlu1 %v4341_v39 }
 0x2eb   : > { %1411 = vmax.xlane.f32.xlu0 %v4346_v37 }
 0x2ec   : > { %1413 = vmax.xlane.f32.xlu1 %v4350_v38 }
 0x2ef   : > { %v2899_v43 = vpop.f32.mrb[64].mxu1  ;;  %1764 = vmax.xlane.f32.xlu0 %v4356_v42 }
 0x2f0   : > { %v2059_v47 = vmul.f32 0.17677669, %v2899_v43  ;;  %1766 = vmax.xlane.f32.xlu1 %v4361_v44  ;;  %v1979_v45 = vpop.f32.mrb[65].mxu1 }
 0x2f1   : > { %v2058_v46 = vmul.f32 0.17677669, %v1979_v45 }
 0x2f2   : > { %v4366_v52 = vsel %vm1187_vm0, %v2059_v47, -1e+30 }
 0x2f3   : > { %v2902_v2 = vpop.f32.mrb[66].mxu1  ;;  %v4370_v25 = vsel %vm1187_vm0, %v2058_v46, -1e+30 }
 0x2f4   : > { %v2061_v32 = vmul.f32 0.17677669, %v2902_v2  ;;  %2092 = vmax.xlane.f32.xlu1 %v4366_v52  ;;  %v1989_v35 = vpop.f32.mrb[67].mxu1  ;;  %2090 = vmax.xlane.f32.xlu0 %v4370_v25 }
 0x2f5   : > { %v2060_v36 = vmul.f32 0.17677669, %v1989_v35 }
 0x2f6   : > { %v4376_v28 = vsel %vm1187_vm0, %v2061_v32, -1e+30 }
 0x2f7   : > { %v2905_v31 = vpop.f32.mrb[68].mxu1  ;;  %v4380_v33 = vsel %vm1187_vm0, %v2060_v36, -1e+30 }
 0x2f8   : > { %v2063_v6 = vmul.f32 0.17677669, %v2905_v31  ;;  %2096 = vmax.xlane.f32.xlu1 %v4376_v28  ;;  %v1999_v19 = vpop.f32.mrb[69].mxu1  ;;  %2094 = vmax.xlane.f32.xlu0 %v4380_v33 }
 0x2f9   : > { %v2062_v54 = vmul.f32 0.17677669, %v1999_v19 }
 0x2fa   : > { %v4386_v56 = vsel %vm1187_vm0, %v2063_v6, -1e+30 }
 0x2fb   : > { %v2908_v58 = vpop.f32.mrb[70].mxu1  ;;  %v4390_v59 = vsel %vm1187_vm0, %v2062_v54, -1e+30 }
 0x2fc   : > { %v2065_v63 = vmul.f32 0.17677669, %v2908_v58  ;;  %2100 = vmax.xlane.f32.xlu1 %v4386_v56  ;;  %v2009_v1 = vpop.f32.mrb[71].mxu1  ;;  %2098 = vmax.xlane.f32.xlu0 %v4390_v59 }
 0x2fd   : > { %v2064_v4 = vmul.f32 0.17677669, %v2009_v1 }
 0x2fe   : > { %v4396_v10 = vsel %vm1187_vm0, %v2065_v63, -1e+30 }
 0x2ff   : > { %v2911_v12 = vpop.f32.mrb[72].mxu1  ;;  %v4400_v14 = vsel %vm1187_vm0, %v2064_v4, -1e+30 }
 0x300   : > { %v2067_v17 = vmul.f32 0.17677669, %v2911_v12  ;;  %2104 = vmax.xlane.f32.xlu1 %v4396_v10  ;;  %v2019_v22 = vpop.f32.mrb[73].mxu1  ;;  %2102 = vmax.xlane.f32.xlu0 %v4400_v14 }
 0x301   : > { %v2066_v24 = vmul.f32 0.17677669, %v2019_v22 }
 0x302   : > { %v4406_v26 = vsel %vm1187_vm0, %v2067_v17, -1e+30 }
 0x303   : > { %v2914_v0 = vpop.f32.mrb[74].mxu1  ;;  %v4410_v53 = vsel %vm1187_vm0, %v2066_v24, -1e+30 }
 0x304   : > { %v2069_v43 = vmul.f32 0.17677669, %v2914_v0  ;;  %2108 = vmax.xlane.f32.xlu1 %v4406_v26  ;;  %v2029_v47 = vpop.f32.mrb[75].mxu1  ;;  %2106 = vmax.xlane.f32.xlu0 %v4410_v53 }
 0x305   : > { %v2068_v45 = vmul.f32 0.17677669, %v2029_v47 }
 0x306   : > { %v4416_v46 = vsel %vm1187_vm0, %v2069_v43, -1e+30 }
 0x307   : > { %v2917_v2 = vpop.f32.mrb[76].mxu1  ;;  %v4420_v32 = vsel %vm1187_vm0, %v2068_v45, -1e+30 }
 0x308   : > { %v2071_v35 = vmul.f32 0.17677669, %v2917_v2  ;;  %2112 = vmax.xlane.f32.xlu1 %v4416_v46  ;;  %v2039_v36 = vpop.f32.mrb[77].mxu1  ;;  %2110 = vmax.xlane.f32.xlu0 %v4420_v32 }
 0x309   : > { %v2070_v31 = vmul.f32 0.17677669, %v2039_v36 }
 0x30a   : > { %v4426_v6 = vsel %vm1187_vm0, %v2071_v35, -1e+30 }
 0x30b   : > { %v2920_v19 = vpop.f32.mrb[78].mxu1  ;;  %v4430_v54 = vsel %vm1187_vm0, %v2070_v31, -1e+30 }
 0x30c   : > { %v2073_v58 = vmul.f32 0.17677669, %v2920_v19  ;;  %2116 = vmax.xlane.f32.xlu1 %v4426_v6  ;;  %v2049_v63 = vpop.f32.mrb[79].mxu1  ;;  %2114 = vmax.xlane.f32.xlu0 %v4430_v54 }
 0x30d   : > { %v2072_v1 = vmul.f32 0.17677669, %v2049_v63 }
 0x30e   : > { %v4436_v4 = vsel %vm1187_vm0, %v2073_v58, -1e+30 }
 0x30f   : > { %v4440_v12 = vsel %vm1187_vm0, %v2072_v1, -1e+30 }
 0x310   : > { %2120 = vmax.xlane.f32.xlu1 %v4436_v4  ;;  %2118 = vmax.xlane.f32.xlu0 %v4440_v12 }
 0x340   : > { %v1386_v17 = vpop.xlane.xlu0 %1385 }
 0x341   : > { %v1416_v22 = vsub.f32 %v4206_v61, %v1386_v17  ;;  %v1739_v24 = vpop.xlane.xlu1 %1738 }
 0x342   : > { %v1769_v0 = vsub.f32 %v4211_v62, %v1739_v24 }
 0x343   : > { %v1433_v43 = vmul.f32 1.442695, %v1416_v22 }
 0x344   : > { %v1786_v47 = vmul.f32 1.442695, %v1769_v0  ;;  %v1384_v45 = vpop.xlane.xlu0 %1383 }
 0x345   : > { %3252 = vpow2.f32 %v1433_v43  ;;  %v1415_v2 = vsub.f32 %v4216_v8, %v1384_v45  ;;  %v1390_v35 = vpop.xlane.xlu1 %1389 }
 0x346   : > { %v1418_v48 = vsub.f32 %v4220_v9, %v1390_v35  ;;  %3254 = vpow2.f32 %v1786_v47 }
 0x347   : > { %v1431_v36 = vmul.f32 1.442695, %v1415_v2 }
 0x348   : > { %v1437_v31 = vmul.f32 1.442695, %v1418_v48  ;;  %v1737_v19 = vpop.xlane.xlu0 %1736 }
 0x349   : > { %3256 = vpow2.f32 %v1431_v36  ;;  %v1768_v58 = vsub.f32 %v4230_v16, %v1737_v19  ;;  %v1388_v61 = vpop.xlane.xlu1 %1387 }
 0x34a   : > { %v1417_v63 = vsub.f32 %v4226_v13, %v1388_v61  ;;  %3258 = vpow2.f32 %v1437_v31 }
 0x34b   : > { %v1784_v62 = vmul.f32 1.442695, %v1768_v58 }
 0x34c   : > { %v1741_v1 = vpop.xlane.xlu0 %1740  ;;  %v1435_v17 = vmul.f32 1.442695, %v1417_v63 }
 0x34d   : > { %3260 = vpow2.f32 %v1784_v62  ;;  %v1770_v8 = vsub.f32 %v4236_v57, %v1741_v1  ;;  %v1743_v22 = vpop.xlane.xlu1 %1742 }
 0x34e   : > { %v1771_v9 = vsub.f32 %v4241_v30, %v1743_v22  ;;  %3262 = vpow2.f32 %v1435_v17 }
 0x34f   : > { %v4452_v24 = vpop.eup %3252  ;;  %v1788_v16 = vmul.f32 1.442695, %v1770_v8 }
 0x350   : > { %v1790_v0 = vmul.f32 1.442695, %v1771_v9  ;;  %v1392_v43 = vpop.xlane.xlu0 %1391  ;;  %1465 = vadd.xlane.f32.xlu1 %v4452_v24  ;;  %v4456_v45 = vpop.eup %3254 }
 0x351   : > { %v1419_v13 = vsub.f32 %v4246_v34, %v1392_v43  ;;  %v1394_v47 = vpop.xlane.xlu1 %1393 }
 0x352   : > { %3264 = vpow2.f32 %v1790_v0  ;;  %v1420_v2 = vsub.f32 %v4250_v40, %v1394_v47 }
 0x353   : > { %v4459_v57 = vpop.eup %3256  ;;  %3266 = vpow2.f32 %v1788_v16  ;;  %v1439_v48 = vmul.f32 1.442695, %v1419_v13 }
 0x354   : > { %v1441_v35 = vmul.f32 1.442695, %v1420_v2  ;;  %v1745_v30 = vpop.xlane.xlu0 %1744  ;;  %1818 = vadd.xlane.f32.xlu1 %v4456_v45  ;;  %1463 = vadd.xlane.f32.xlu0 %v4459_v57  ;;  %v4464_v34 = vpop.eup %3258 }
 0x355   : > { %v1772_v36 = vsub.f32 %v4256_v55, %v1745_v30  ;;  %v1747_v31 = vpop.xlane.xlu1 %1746 }
 0x356   : > { %3268 = vpow2.f32 %v1441_v35  ;;  %v1773_v19 = vsub.f32 %v4261_v60, %v1747_v31 }
 0x357   : > { %v4467_v58 = vpop.eup %3260  ;;  %3270 = vpow2.f32 %v1439_v48  ;;  %v1792_v63 = vmul.f32 1.442695, %v1772_v36 }
 0x358   : > { %v1794_v40 = vmul.f32 1.442695, %v1773_v19  ;;  %v1396_v61 = vpop.xlane.xlu0 %1395  ;;  %1469 = vadd.xlane.f32.xlu1 %v4464_v34  ;;  %1816 = vadd.xlane.f32.xlu0 %v4467_v58  ;;  %v4473_v17 = vpop.eup %3262 }
 0x359   : > { %v1421_v62 = vsub.f32 %v4266_v21, %v1396_v61  ;;  %v1398_v1 = vpop.xlane.xlu1 %1397 }
 0x35a   : > { %3272 = vpow2.f32 %v1794_v40  ;;  %v1422_v55 = vsub.f32 %v4270_v11, %v1398_v1 }
 0x35b   : > { %3274 = vpow2.f32 %v1792_v63  ;;  %v1443_v9 = vmul.f32 1.442695, %v1421_v62 }
 0x35c   : > { %v4475_v8 = vpop.eup %3264  ;;  %v1445_v60 = vmul.f32 1.442695, %v1422_v55  ;;  %v1749_v22 = vpop.xlane.xlu0 %1748  ;;  %1467 = vadd.xlane.f32.xlu0 %v4473_v17 }
 0x35d   : > { %v1774_v0 = vsub.f32 %v4276_v29, %v1749_v22  ;;  %v1751_v43 = vpop.xlane.xlu1 %1750  ;;  %1822 = vadd.xlane.f32.xlu1 %v4475_v8  ;;  %v4481_v16 = vpop.eup %3266 }
 0x35e   : > { %3276 = vpow2.f32 %v1445_v60  ;;  %v1775_v21 = vsub.f32 %v4281_v41, %v1751_v43 }
 0x35f   : > { %3278 = vpow2.f32 %v1443_v9  ;;  %v1796_v2 = vmul.f32 1.442695, %v1774_v0 }
 0x360   : > { %v4483_v11 = vpop.eup %3268  ;;  %v1798_v13 = vmul.f32 1.442695, %v1775_v21  ;;  %v1400_v47 = vpop.xlane.xlu0 %1399  ;;  %1820 = vadd.xlane.f32.xlu0 %v4481_v16 }
 0x361   : > { %v1423_v35 = vsub.f32 %v4286_v49, %v1400_v47  ;;  %v1402_v30 = vpop.xlane.xlu1 %1401  ;;  %1473 = vadd.xlane.f32.xlu1 %v4483_v11  ;;  %v4489_v48 = vpop.eup %3270 }
 0x362   : > { %3280 = vpow2.f32 %v1798_v13  ;;  %v1424_v29 = vsub.f32 %v4290_v50, %v1402_v30 }
 0x363   : > { %3282 = vpow2.f32 %v1796_v2  ;;  %v1447_v19 = vmul.f32 1.442695, %v1423_v35 }
 0x364   : > { %v4491_v41 = vpop.eup %3272  ;;  %v1449_v36 = vmul.f32 1.442695, %v1424_v29  ;;  %v1753_v31 = vpop.xlane.xlu0 %1752  ;;  %1471 = vadd.xlane.f32.xlu0 %v4489_v48 }
 0x365   : > { %v1776_v40 = vsub.f32 %v4296_v51, %v1753_v31  ;;  %v1755_v61 = vpop.xlane.xlu1 %1754  ;;  %1826 = vadd.xlane.f32.xlu1 %v4491_v41  ;;  %v4497_v63 = vpop.eup %3274 }
 0x366   : > { %3284 = vpow2.f32 %v1449_v36  ;;  %v1777_v49 = vsub.f32 %v4301_v3, %v1755_v61 }
 0x367   : > { %3286 = vpow2.f32 %v1447_v19  ;;  %v1800_v55 = vmul.f32 1.442695, %v1776_v40 }
 0x368   : > { %v4499_v50 = vpop.eup %3276  ;;  %v1802_v62 = vmul.f32 1.442695, %v1777_v49  ;;  %v1404_v1 = vpop.xlane.xlu0 %1403  ;;  %1824 = vadd.xlane.f32.xlu0 %v4497_v63 }
 0x369   : > { %v1425_v60 = vsub.f32 %v4306_v5, %v1404_v1  ;;  %v1406_v22 = vpop.xlane.xlu1 %1405  ;;  %1477 = vadd.xlane.f32.xlu1 %v4499_v50  ;;  %v4505_v9 = vpop.eup %3278 }
 0x36a   : > { %3288 = vpow2.f32 %v1802_v62  ;;  %v1426_v51 = vsub.f32 %v4310_v7, %v1406_v22 }
 0x36b   : > { %3290 = vpow2.f32 %v1800_v55  ;;  %v1451_v21 = vmul.f32 1.442695, %v1425_v60 }
 0x36c   : > { %v4507_v3 = vpop.eup %3280  ;;  %v1453_v0 = vmul.f32 1.442695, %v1426_v51  ;;  %v1757_v43 = vpop.xlane.xlu0 %1756  ;;  %1475 = vadd.xlane.f32.xlu0 %v4505_v9 }
 0x36d   : > { %v1778_v13 = vsub.f32 %v4316_v27, %v1757_v43  ;;  %v1759_v47 = vpop.xlane.xlu1 %1758  ;;  %1830 = vadd.xlane.f32.xlu1 %v4507_v3  ;;  %v4513_v2 = vpop.eup %3282 }
 0x36e   : > { %3292 = vpow2.f32 %v1453_v0  ;;  %v1779_v5 = vsub.f32 %v4321_v15, %v1759_v47 }
 0x36f   : > { %3294 = vpow2.f32 %v1451_v21  ;;  %v1804_v29 = vmul.f32 1.442695, %v1778_v13 }
 0x370   : > { %v4515_v7 = vpop.eup %3284  ;;  %v1806_v35 = vmul.f32 1.442695, %v1779_v5  ;;  %v1408_v30 = vpop.xlane.xlu0 %1407  ;;  %1828 = vadd.xlane.f32.xlu0 %v4513_v2 }
 0x371   : > { %v1427_v36 = vsub.f32 %v4326_v18, %v1408_v30  ;;  %v1410_v31 = vpop.xlane.xlu1 %1409  ;;  %1481 = vadd.xlane.f32.xlu1 %v4515_v7  ;;  %v4521_v19 = vpop.eup %3286 }
 0x372   : > { %3296 = vpow2.f32 %v1806_v35  ;;  %v1428_v27 = vsub.f32 %v4330_v20, %v1410_v31 }
 0x373   : > { %3298 = vpow2.f32 %v1804_v29  ;;  %v1455_v49 = vmul.f32 1.442695, %v1427_v36 }
 0x374   : > { %v4523_v15 = vpop.eup %3288  ;;  %v1457_v40 = vmul.f32 1.442695, %v1428_v27  ;;  %v1761_v61 = vpop.xlane.xlu0 %1760  ;;  %1479 = vadd.xlane.f32.xlu0 %v4521_v19 }
 0x375   : > { %v1780_v62 = vsub.f32 %v4336_v23, %v1761_v61  ;;  %v1763_v1 = vpop.xlane.xlu1 %1762  ;;  %1834 = vadd.xlane.f32.xlu1 %v4523_v15  ;;  %v4529_v55 = vpop.eup %3290 }
 0x376   : > { %3300 = vpow2.f32 %v1457_v40  ;;  %v1781_v18 = vsub.f32 %v4341_v39, %v1763_v1 }
 0x377   : > { %3302 = vpow2.f32 %v1455_v49  ;;  %v1808_v51 = vmul.f32 1.442695, %v1780_v62 }
 0x378   : > { %v4531_v20 = vpop.eup %3292  ;;  %v1810_v60 = vmul.f32 1.442695, %v1781_v18  ;;  %1832 = vadd.xlane.f32.xlu0 %v4529_v55  ;;  %v1412_v22 = vpop.xlane.xlu0 %1411 }
 0x379   : > { %v1429_v0 = vsub.f32 %v4346_v37, %v1412_v22  ;;  %v1414_v43 = vpop.xlane.xlu1 %1413  ;;  %1485 = vadd.xlane.f32.xlu1 %v4531_v20  ;;  %v4537_v21 = vpop.eup %3294 }
 0x37a   : > { %3304 = vpow2.f32 %v1810_v60  ;;  %v1430_v23 = vsub.f32 %v4350_v38, %v1414_v43 }
 0x37b   : > { %3306 = vpow2.f32 %v1808_v51  ;;  %v1459_v5 = vmul.f32 1.442695, %v1429_v0 }
 0x37c   : > { %v4539_v39 = vpop.eup %3296  ;;  %v1461_v13 = vmul.f32 1.442695, %v1430_v23  ;;  %1483 = vadd.xlane.f32.xlu0 %v4537_v21  ;;  %v1765_v47 = vpop.xlane.xlu0 %1764 }
 0x37d   : > { %v1782_v35 = vsub.f32 %v4356_v42, %v1765_v47  ;;  %v1767_v30 = vpop.xlane.xlu1 %1766  ;;  %1838 = vadd.xlane.f32.xlu1 %v4539_v39  ;;  %v4545_v29 = vpop.eup %3298 }
 0x37e   : > { %3308 = vpow2.f32 %v1461_v13  ;;  %v1783_v37 = vsub.f32 %v4361_v44, %v1767_v30 }
 0x37f   : > { %3310 = vpow2.f32 %v1459_v5  ;;  %v1812_v31 = vmul.f32 1.442695, %v1782_v35 }
 0x380   : > { %v4547_v38 = vpop.eup %3300  ;;  %v1814_v36 = vmul.f32 1.442695, %v1783_v37  ;;  %1836 = vadd.xlane.f32.xlu0 %v4545_v29 }
 0x381   : > { %v2093_v27 = vpop.xlane.xlu1 %2092  ;;  %1489 = vadd.xlane.f32.xlu1 %v4547_v38  ;;  %v2091_v40 = vpop.xlane.xlu0 %2090 }
 0x382   : > { %3312 = vpow2.f32 %v1814_v36  ;;  %v2123_v42 = vsub.f32 %v4366_v52, %v2093_v27  ;;  %v2122_v61 = vsub.f32 %v4370_v25, %v2091_v40  ;;  %v4553_v49 = vpop.eup %3302 }
 0x383   : > { %3314 = vpow2.f32 %v1812_v31 }
 0x384   : > { %v4555_v44 = vpop.eup %3304  ;;  %v2140_v62 = vmul.f32 1.442695, %v2123_v42  ;;  %1487 = vadd.xlane.f32.xlu0 %v4553_v49  ;;  %v2138_v1 = vmul.f32 1.442695, %v2122_v61 }
 0x385   : > { %v2097_v18 = vpop.xlane.xlu1 %2096  ;;  %1842 = vadd.xlane.f32.xlu1 %v4555_v44  ;;  %v2095_v60 = vpop.xlane.xlu0 %2094 }
 0x386   : > { %3316 = vpow2.f32 %v2140_v62  ;;  %v2125_v22 = vsub.f32 %v4376_v28, %v2097_v18  ;;  %v2124_v52 = vsub.f32 %v4380_v33, %v2095_v60  ;;  %v4561_v51 = vpop.eup %3306 }
 0x387   : > { %3318 = vpow2.f32 %v2138_v1 }
 0x388   : > { %v4563_v25 = vpop.eup %3308  ;;  %v2144_v0 = vmul.f32 1.442695, %v2125_v22  ;;  %1840 = vadd.xlane.f32.xlu0 %v4561_v51  ;;  %v2142_v43 = vmul.f32 1.442695, %v2124_v52 }
 0x389   : > { %v2101_v23 = vpop.xlane.xlu1 %2100  ;;  %1493 = vadd.xlane.f32.xlu1 %v4563_v25  ;;  %v2099_v13 = vpop.xlane.xlu0 %2098 }
 0x38a   : > { %3320 = vpow2.f32 %v2144_v0  ;;  %v2127_v47 = vsub.f32 %v4386_v56, %v2101_v23  ;;  %v2126_v28 = vsub.f32 %v4390_v59, %v2099_v13  ;;  %v4569_v5 = vpop.eup %3310 }
 0x38b   : > { %3322 = vpow2.f32 %v2142_v43 }
 0x38c   : > { %v4571_v33 = vpop.eup %3312  ;;  %v2148_v35 = vmul.f32 1.442695, %v2127_v47  ;;  %1491 = vadd.xlane.f32.xlu0 %v4569_v5  ;;  %v2146_v30 = vmul.f32 1.442695, %v2126_v28 }
 0x38d   : > { %v2105_v37 = vpop.xlane.xlu1 %2104  ;;  %1846 = vadd.xlane.f32.xlu1 %v4571_v33  ;;  %v2103_v36 = vpop.xlane.xlu0 %2102 }
 0x38e   : > { %3324 = vpow2.f32 %v2148_v35  ;;  %v2129_v31 = vsub.f32 %v4396_v10, %v2105_v37  ;;  %v2128_v56 = vsub.f32 %v4400_v14, %v2103_v36  ;;  %v4577_v27 = vpop.eup %3314 }
 0x38f   : > { %3326 = vpow2.f32 %v2146_v30 }
 0x390   : > { %v4579_v59 = vpop.eup %3316  ;;  %v2152_v40 = vmul.f32 1.442695, %v2129_v31  ;;  %1844 = vadd.xlane.f32.xlu0 %v4577_v27  ;;  %v2150_v42 = vmul.f32 1.442695, %v2128_v56 }
 0x391   : > { %v2109_v61 = vpop.xlane.xlu1 %2108  ;;  %2172 = vadd.xlane.f32.xlu1 %v4579_v59  ;;  %v2107_v62 = vpop.xlane.xlu0 %2106 }
 0x392   : > { %3328 = vpow2.f32 %v2152_v40  ;;  %v2131_v1 = vsub.f32 %v4406_v26, %v2109_v61  ;;  %v2130_v10 = vsub.f32 %v4410_v53, %v2107_v62  ;;  %v4585_v18 = vpop.eup %3318 }
 0x393   : > { %3330 = vpow2.f32 %v2150_v42 }
 0x394   : > { %v4587_v14 = vpop.eup %3320  ;;  %v2156_v60 = vmul.f32 1.442695, %v2131_v1  ;;  %2170 = vadd.xlane.f32.xlu0 %v4585_v18  ;;  %v2154_v22 = vmul.f32 1.442695, %v2130_v10 }
 0x395   : > { %v2113_v52 = vpop.xlane.xlu1 %2112  ;;  %2176 = vadd.xlane.f32.xlu1 %v4587_v14  ;;  %v2111_v0 = vpop.xlane.xlu0 %2110 }
 0x396   : > { %3332 = vpow2.f32 %v2156_v60  ;;  %v2133_v43 = vsub.f32 %v4416_v46, %v2113_v52  ;;  %v2132_v26 = vsub.f32 %v4420_v32, %v2111_v0  ;;  %v4593_v23 = vpop.eup %3322 }
 0x397   : > { %3334 = vpow2.f32 %v2154_v22 }
 0x398   : > { %v4595_v53 = vpop.eup %3324  ;;  %v2160_v13 = vmul.f32 1.442695, %v2133_v43  ;;  %2174 = vadd.xlane.f32.xlu0 %v4593_v23  ;;  %v2158_v47 = vmul.f32 1.442695, %v2132_v26 }
 0x399   : > { %v2117_v28 = vpop.xlane.xlu1 %2116  ;;  %2180 = vadd.xlane.f32.xlu1 %v4595_v53  ;;  %v2115_v35 = vpop.xlane.xlu0 %2114 }
 0x39a   : > { %3336 = vpow2.f32 %v2160_v13  ;;  %v2135_v30 = vsub.f32 %v4426_v6, %v2117_v28  ;;  %v2134_v46 = vsub.f32 %v4430_v54, %v2115_v35  ;;  %v4601_v37 = vpop.eup %3326 }
 0x39b   : > { %3338 = vpow2.f32 %v2158_v47 }
 0x39c   : > { %v4603_v32 = vpop.eup %3328  ;;  %v2164_v36 = vmul.f32 1.442695, %v2135_v30  ;;  %2178 = vadd.xlane.f32.xlu0 %v4601_v37  ;;  %v2162_v31 = vmul.f32 1.442695, %v2134_v46 }
 0x39d   : > { %2184 = vadd.xlane.f32.xlu1 %v4603_v32  ;;  %v2121_v56 = vpop.xlane.xlu1 %2120  ;;  %v2119_v40 = vpop.xlane.xlu0 %2118 }
 0x39e   : > { %3340 = vpow2.f32 %v2164_v36  ;;  %v2137_v42 = vsub.f32 %v4436_v4, %v2121_v56  ;;  %v2136_v6 = vsub.f32 %v4440_v12, %v2119_v40  ;;  %v4609_v61 = vpop.eup %3330 }
 0x39f   : > { %3342 = vpow2.f32 %v2162_v31 }
 0x3a0   : > { %v4611_v54 = vpop.eup %3332  ;;  %v2168_v62 = vmul.f32 1.442695, %v2137_v42  ;;  %2182 = vadd.xlane.f32.xlu0 %v4609_v61  ;;  %v2166_v1 = vmul.f32 1.442695, %v2136_v6 }
 0x3a1   : > { %2188 = vadd.xlane.f32.xlu1 %v4611_v54  ;;  %v4615_v10 = vpop.eup %3334 }
 0x3a2   : > { %3344 = vpow2.f32 %v2168_v62 }
 0x3a3   : > { %3346 = vpow2.f32 %v2166_v1 }
 0x3a4   : > { %v4617_v60 = vpop.eup %3336  ;;  %2186 = vadd.xlane.f32.xlu0 %v4615_v10 }
 0x3a5   : > { %2192 = vadd.xlane.f32.xlu1 %v4617_v60  ;;  %v4621_v4 = vpop.eup %3338 }
 0x3a8   : > { %v4623_v12 = vpop.eup %3340  ;;  %2190 = vadd.xlane.f32.xlu0 %v4621_v4 }
 0x3a9   : > { %2196 = vadd.xlane.f32.xlu1 %v4623_v12  ;;  %v4627_v22 = vpop.eup %3342 }
 0x3ac   : > { %v4629_v52 = vpop.eup %3344  ;;  %2194 = vadd.xlane.f32.xlu0 %v4627_v22 }
 0x3ad   : > { %2200 = vadd.xlane.f32.xlu1 %v4629_v52  ;;  %v4633_v0 = vpop.eup %3346 }
 0x3b0   : > { %2198 = vadd.xlane.f32.xlu0 %v4633_v0 }
 0x3dd   : > { %v1466_v43 = vpop.xlane.xlu1 %1465 }
 0x3de   : > { %3348 = vrcp.f32 %v1466_v43 }
 0x3e1   : > { %v1819_v26 = vpop.xlane.xlu1 %1818  ;;  %v1464_v13 = vpop.xlane.xlu0 %1463 }
 0x3e2   : > { %3350 = vrcp.f32 %v1819_v26 }
 0x3e3   : > { %3352 = vrcp.f32 %v1464_v13 }
 0x3e5   : > { %v1470_v47 = vpop.xlane.xlu1 %1469  ;;  %v1817_v28 = vpop.xlane.xlu0 %1816 }
 0x3e6   : > { %3354 = vrcp.f32 %v1470_v47 }
 0x3e7   : > { %3356 = vrcp.f32 %v1817_v28 }
 0x3e8   : > { %v3349_v35 = vpop.eup %3348 }
 0x3e9   : > { %v1512_v30 = vmul.f32 %v3349_v35, %v4452_v24  ;;  %v1468_v46 = vpop.xlane.xlu0 %1467 }
 0x3ea   : > { %3358 = vrcp.f32 %v1468_v46  ;;  %v1823_v36 = vpop.xlane.xlu1 %1822 }
 0x3eb   : > { %1528 = vst [vmem:[%s4638_s19 + $0x8] sm:$0xff] %v1512_v30  ;;  %3360 = vrcp.f32 %v1823_v36 }
 0x3ec   : > { %v3351_v31 = vpop.eup %3350 }
 0x3ed   : > { %v3353_v56 = vpop.eup %3352  ;;  %v1865_v40 = vmul.f32 %v3351_v31, %v4456_v45  ;;  %v1821_v42 = vpop.xlane.xlu0 %1820 }
 0x3ee   : > { %v1511_v6 = vmul.f32 %v3353_v56, %v4459_v57  ;;  %3362 = vrcp.f32 %v1821_v42  ;;  %v1474_v24 = vpop.xlane.xlu1 %1473 }
 0x3ef   : > { %2443 = vst [vmem:[%s4638_s19 + $0x88] sm:$0xff] %v1865_v40  ;;  %3364 = vrcp.f32 %v1474_v24 }
 0x3f0   : > { %v3355_v62 = vpop.eup %3354  ;;  %1527 = vst [vmem:[%s4638_s19] sm:$0xff] %v1511_v6 }
 0x3f1   : > { %v3357_v1 = vpop.eup %3356  ;;  %v1514_v43 = vmul.f32 %v3355_v62, %v4464_v34  ;;  %v1472_v26 = vpop.xlane.xlu0 %1471 }
 0x3f2   : > { %v1864_v13 = vmul.f32 %v3357_v1, %v4467_v58  ;;  %3366 = vrcp.f32 %v1472_v26  ;;  %v1827_v45 = vpop.xlane.xlu1 %1826 }
 0x3f3   : > { %1530 = vst [vmem:[%s4638_s19 + $0x18] sm:$0xff] %v1514_v43  ;;  %3368 = vrcp.f32 %v1827_v45 }
 0x3f4   : > { %v3359_v57 = vpop.eup %3358  ;;  %2442 = vst [vmem:[%s4638_s19 + $0x80] sm:$0xff] %v1864_v13 }
 0x3f5   : > { %v3361_v47 = vpop.eup %3360  ;;  %v1513_v28 = vmul.f32 %v3359_v57, %v4473_v17  ;;  %v1825_v35 = vpop.xlane.xlu0 %1824 }
 0x3f6   : > { %v1867_v30 = vmul.f32 %v3361_v47, %v4475_v8  ;;  %3370 = vrcp.f32 %v1825_v35  ;;  %v1478_v34 = vpop.xlane.xlu1 %1477 }
 0x3f7   : > { %1529 = vst [vmem:[%s4638_s19 + $0x10] sm:$0xff] %v1513_v28  ;;  %3372 = vrcp.f32 %v1478_v34 }
 0x3f8   : > { %v3363_v58 = vpop.eup %3362  ;;  %2445 = vst [vmem:[%s4638_s19 + $0x98] sm:$0xff] %v1867_v30 }
 0x3f9   : > { %v3365_v46 = vpop.eup %3364  ;;  %v1866_v36 = vmul.f32 %v3363_v58, %v4481_v16  ;;  %v1476_v31 = vpop.xlane.xlu0 %1475 }
 0x3fa   : > { %v1516_v56 = vmul.f32 %v3365_v46, %v4483_v11  ;;  %3374 = vrcp.f32 %v1476_v31  ;;  %v1831_v17 = vpop.xlane.xlu1 %1830 }
 0x3fb   : > { %2444 = vst [vmem:[%s4638_s19 + $0x90] sm:$0xff] %v1866_v36  ;;  %3376 = vrcp.f32 %v1831_v17 }
 0x3fc   : > { %v3367_v8 = vpop.eup %3366  ;;  %1532 = vst [vmem:[%s4638_s19 + $0x28] sm:$0xff] %v1516_v56 }
 0x3fd   : > { %v3369_v40 = vpop.eup %3368  ;;  %v1515_v42 = vmul.f32 %v3367_v8, %v4489_v48  ;;  %v1829_v6 = vpop.xlane.xlu0 %1828 }
 0x3fe   : > { %v1869_v24 = vmul.f32 %v3369_v40, %v4491_v41  ;;  %3378 = vrcp.f32 %v1829_v6  ;;  %v1482_v16 = vpop.xlane.xlu1 %1481 }
 0x3ff   : > { %1531 = vst [vmem:[%s4638_s19 + $0x20] sm:$0xff] %v1515_v42  ;;  %3380 = vrcp.f32 %v1482_v16 }
 0x400   : > { %v3371_v11 = vpop.eup %3370  ;;  %2447 = vst [vmem:[%s4638_s19 + $0xa8] sm:$0xff] %v1869_v24 }
 0x401   : > { %v3373_v62 = vpop.eup %3372  ;;  %v1868_v1 = vmul.f32 %v3371_v11, %v4497_v63  ;;  %v1480_v43 = vpop.xlane.xlu0 %1479 }
 0x402   : > { %v1518_v26 = vmul.f32 %v3373_v62, %v4499_v50  ;;  %3382 = vrcp.f32 %v1480_v43  ;;  %v1835_v48 = vpop.xlane.xlu1 %1834 }
 0x403   : > { %2446 = vst [vmem:[%s4638_s19 + $0xa0] sm:$0xff] %v1868_v1  ;;  %3384 = vrcp.f32 %v1835_v48 }
 0x404   : > { %v3375_v41 = vpop.eup %3374  ;;  %1534 = vst [vmem:[%s4638_s19 + $0x38] sm:$0xff] %v1518_v26 }
 0x405   : > { %v3377_v13 = vpop.eup %3376  ;;  %v1517_v45 = vmul.f32 %v3375_v41, %v4505_v9  ;;  %v1833_v57 = vpop.xlane.xlu0 %1832 }
 0x406   : > { %v1871_v47 = vmul.f32 %v3377_v13, %v4507_v3  ;;  %3386 = vrcp.f32 %v1833_v57  ;;  %v1486_v63 = vpop.xlane.xlu1 %1485 }
 0x407   : > { %1533 = vst [vmem:[%s4638_s19 + $0x30] sm:$0xff] %v1517_v45  ;;  %3388 = vrcp.f32 %v1486_v63 }
 0x408   : > { %v3379_v50 = vpop.eup %3378  ;;  %2449 = vst [vmem:[%s4638_s19 + $0xb8] sm:$0xff] %v1871_v47 }
 0x409   : > { %v3381_v28 = vpop.eup %3380  ;;  %v1870_v35 = vmul.f32 %v3379_v50, %v4513_v2  ;;  %v1484_v30 = vpop.xlane.xlu0 %1483 }
 0x40a   : > { %v1520_v34 = vmul.f32 %v3381_v28, %v4515_v7  ;;  %3390 = vrcp.f32 %v1484_v30  ;;  %v1839_v9 = vpop.xlane.xlu1 %1838 }
 0x40b   : > { %2448 = vst [vmem:[%s4638_s19 + $0xb0] sm:$0xff] %v1870_v35  ;;  %3392 = vrcp.f32 %v1839_v9 }
 0x40c   : > { %v3383_v3 = vpop.eup %3382  ;;  %1536 = vst [vmem:[%s4638_s19 + $0x48] sm:$0xff] %v1520_v34 }
 0x40d   : > { %v3385_v58 = vpop.eup %3384  ;;  %v1519_v46 = vmul.f32 %v3383_v3, %v4521_v19  ;;  %v1837_v36 = vpop.xlane.xlu0 %1836 }
 0x40e   : > { %v1873_v31 = vmul.f32 %v3385_v58, %v4523_v15  ;;  %3394 = vrcp.f32 %v1837_v36  ;;  %v1490_v2 = vpop.xlane.xlu1 %1489 }
 0x40f   : > { %1535 = vst [vmem:[%s4638_s19 + $0x40] sm:$0xff] %v1519_v46  ;;  %3396 = vrcp.f32 %v1490_v2 }
 0x410   : > { %v3387_v7 = vpop.eup %3386  ;;  %2451 = vst [vmem:[%s4638_s19 + $0xc8] sm:$0xff] %v1873_v31 }
 0x411   : > { %v3389_v56 = vpop.eup %3388  ;;  %v1872_v17 = vmul.f32 %v3387_v7, %v4529_v55  ;;  %v1488_v8 = vpop.xlane.xlu0 %1487 }
 0x412   : > { %v1522_v40 = vmul.f32 %v3389_v56, %v4531_v20  ;;  %3398 = vrcp.f32 %v1488_v8  ;;  %v1843_v19 = vpop.xlane.xlu1 %1842 }
 0x413   : > { %2450 = vst [vmem:[%s4638_s19 + $0xc0] sm:$0xff] %v1872_v17  ;;  %3400 = vrcp.f32 %v1843_v19 }
 0x414   : > { %v3391_v15 = vpop.eup %3390  ;;  %1538 = vst [vmem:[%s4638_s19 + $0x58] sm:$0xff] %v1522_v40 }
 0x415   : > { %v3393_v42 = vpop.eup %3392  ;;  %v1521_v6 = vmul.f32 %v3391_v15, %v4537_v21  ;;  %v1841_v24 = vpop.xlane.xlu0 %1840 }
 0x416   : > { %v1875_v16 = vmul.f32 %v3393_v42, %v4539_v39  ;;  %3402 = vrcp.f32 %v1841_v24  ;;  %v1494_v55 = vpop.xlane.xlu1 %1493 }
 0x417   : > { %1537 = vst [vmem:[%s4638_s19 + $0x50] sm:$0xff] %v1521_v6  ;;  %3404 = vrcp.f32 %v1494_v55 }
 0x418   : > { %v3395_v20 = vpop.eup %3394  ;;  %2453 = vst [vmem:[%s4638_s19 + $0xd8] sm:$0xff] %v1875_v16 }
 0x419   : > { %v3397_v11 = vpop.eup %3396  ;;  %v1874_v62 = vmul.f32 %v3395_v20, %v4545_v29  ;;  %v1492_v1 = vpop.xlane.xlu0 %1491 }
 0x41a   : > { %v1524_v43 = vmul.f32 %v3397_v11, %v4547_v38  ;;  %3406 = vrcp.f32 %v1492_v1  ;;  %v1847_v21 = vpop.xlane.xlu1 %1846 }
 0x41b   : > { %2452 = vst [vmem:[%s4638_s19 + $0xd0] sm:$0xff] %v1874_v62  ;;  %3408 = vrcp.f32 %v1847_v21 }
 0x41c   : > { %v3399_v39 = vpop.eup %3398  ;;  %1540 = vst [vmem:[%s4638_s19 + $0x68] sm:$0xff] %v1524_v43 }
 0x41d   : > { %v3401_v26 = vpop.eup %3400  ;;  %v1523_v48 = vmul.f32 %v3399_v39, %v4553_v49  ;;  %v1845_v41 = vpop.xlane.xlu0 %1844 }
 0x41e   : > { %v1877_v13 = vmul.f32 %v3401_v26, %v4555_v44  ;;  %3410 = vrcp.f32 %v1845_v41  ;;  %v2173_v29 = vpop.xlane.xlu1 %2172 }
 0x41f   : > { %1539 = vst [vmem:[%s4638_s19 + $0x60] sm:$0xff] %v1523_v48  ;;  %3412 = vrcp.f32 %v2173_v29 }
 0x420   : > { %v3403_v38 = vpop.eup %3402  ;;  %2455 = vst [vmem:[%s4638_s19 + $0xe8] sm:$0xff] %v1877_v13 }
 0x421   : > { %v3405_v45 = vpop.eup %3404  ;;  %v1876_v57 = vmul.f32 %v3403_v38, %v4561_v51  ;;  %v2171_v47 = vpop.xlane.xlu0 %2170 }
 0x422   : > { %v1526_v63 = vmul.f32 %v3405_v45, %v4563_v25  ;;  %3414 = vrcp.f32 %v2171_v47  ;;  %v2177_v49 = vpop.xlane.xlu1 %2176 }
 0x423   : > { %2454 = vst [vmem:[%s4638_s19 + $0xe0] sm:$0xff] %v1876_v57  ;;  %3416 = vrcp.f32 %v2177_v49 }
 0x424   : > { %v3407_v44 = vpop.eup %3406  ;;  %1542 = vst [vmem:[%s4638_s19 + $0x78] sm:$0xff] %v1526_v63 }
 0x425   : > { %v3409_v50 = vpop.eup %3408  ;;  %v1525_v28 = vmul.f32 %v3407_v44, %v4569_v5  ;;  %v2175_v35 = vpop.xlane.xlu0 %2174 }
 0x426   : > { %v1879_v30 = vmul.f32 %v3409_v50, %v4571_v33  ;;  %3418 = vrcp.f32 %v2175_v35  ;;  %v2181_v51 = vpop.xlane.xlu1 %2180 }
 0x427   : > { %1541 = vst [vmem:[%s4638_s19 + $0x70] sm:$0xff] %v1525_v28  ;;  %3420 = vrcp.f32 %v2181_v51 }
 0x428   : > { %v3411_v25 = vpop.eup %3410  ;;  %2457 = vst [vmem:[%s4638_s19 + $0xf8] sm:$0xff] %v1879_v30 }
 0x429   : > { %v3413_v34 = vpop.eup %3412  ;;  %v1878_v9 = vmul.f32 %v3411_v25, %v4577_v27  ;;  %v2179_v3 = vpop.xlane.xlu0 %2178 }
 0x42a   : > { %v2219_v58 = vmul.f32 %v3413_v34, %v4579_v59  ;;  %3422 = vrcp.f32 %v2179_v3  ;;  %v2185_v5 = vpop.xlane.xlu1 %2184 }
 0x42b   : > { %2456 = vst [vmem:[%s4638_s19 + $0xf0] sm:$0xff] %v1878_v9  ;;  %3424 = vrcp.f32 %v2185_v5 }
 0x42c   : > { %v3415_v33 = vpop.eup %3414  ;;  %2459 = vst [vmem:[%s4638_s19 + $0x108] sm:$0xff] %v2219_v58 }
 0x42d   : > { %v3417_v46 = vpop.eup %3416  ;;  %v2218_v36 = vmul.f32 %v3415_v33, %v4585_v18  ;;  %v2183_v31 = vpop.xlane.xlu0 %2182 }
 0x42e   : > { %v2221_v2 = vmul.f32 %v3417_v46, %v4587_v14  ;;  %3426 = vrcp.f32 %v2183_v31  ;;  %v2189_v27 = vpop.xlane.xlu1 %2188 }
 0x42f   : > { %2458 = vst [vmem:[%s4638_s19 + $0x100] sm:$0xff] %v2218_v36  ;;  %3428 = vrcp.f32 %v2189_v27 }
 0x430   : > { %v3419_v59 = vpop.eup %3418  ;;  %2461 = vst [vmem:[%s4638_s19 + $0x118] sm:$0xff] %v2221_v2 }
 0x431   : > { %v3421_v7 = vpop.eup %3420  ;;  %v2220_v56 = vmul.f32 %v3419_v59, %v4593_v23  ;;  %v2187_v17 = vpop.xlane.xlu0 %2186 }
 0x432   : > { %v2223_v8 = vmul.f32 %v3421_v7, %v4595_v53  ;;  %3430 = vrcp.f32 %v2187_v17  ;;  %v2193_v18 = vpop.xlane.xlu1 %2192 }
 0x433   : > { %2460 = vst [vmem:[%s4638_s19 + $0x110] sm:$0xff] %v2220_v56  ;;  %3432 = vrcp.f32 %v2193_v18 }
 0x434   : > { %v3423_v14 = vpop.eup %3422  ;;  %2463 = vst [vmem:[%s4638_s19 + $0x128] sm:$0xff] %v2223_v8 }
 0x435   : > { %v3425_v40 = vpop.eup %3424  ;;  %v2222_v19 = vmul.f32 %v3423_v14, %v4601_v37  ;;  %v2191_v15 = vpop.xlane.xlu0 %2190 }
 0x436   : > { %v2225_v42 = vmul.f32 %v3425_v40, %v4603_v32  ;;  %3434 = vrcp.f32 %v2191_v15  ;;  %v2197_v23 = vpop.xlane.xlu1 %2196 }
 0x437   : > { %2462 = vst [vmem:[%s4638_s19 + $0x120] sm:$0xff] %v2222_v19  ;;  %3436 = vrcp.f32 %v2197_v23 }
 0x438   : > { %v3427_v53 = vpop.eup %3426  ;;  %2465 = vst [vmem:[%s4638_s19 + $0x138] sm:$0xff] %v2225_v42 }
 0x439   : > { %v3429_v6 = vpop.eup %3428  ;;  %v2224_v24 = vmul.f32 %v3427_v53, %v4609_v61  ;;  %v2195_v16 = vpop.xlane.xlu0 %2194 }
 0x43a   : > { %v2227_v55 = vmul.f32 %v3429_v6, %v4611_v54  ;;  %3438 = vrcp.f32 %v2195_v16  ;;  %v2201_v37 = vpop.xlane.xlu1 %2200 }
 0x43b   : > { %2464 = vst [vmem:[%s4638_s19 + $0x130] sm:$0xff] %v2224_v24  ;;  %3440 = vrcp.f32 %v2201_v37 }
 0x43c   : > { %v3431_v32 = vpop.eup %3430  ;;  %2467 = vst [vmem:[%s4638_s19 + $0x148] sm:$0xff] %v2227_v55 }
 0x43d   : > { %v3433_v20 = vpop.eup %3432  ;;  %v2226_v11 = vmul.f32 %v3431_v32, %v4615_v10  ;;  %v2199_v62 = vpop.xlane.xlu0 %2198 }
 0x43e   : > { %v2229_v1 = vmul.f32 %v3433_v20, %v4617_v60  ;;  %3442 = vrcp.f32 %v2199_v62 }
 0x43f   : > { %2466 = vst [vmem:[%s4638_s19 + $0x140] sm:$0xff] %v2226_v11 }
 0x440   : > { %v3435_v61 = vpop.eup %3434  ;;  %2469 = vst [vmem:[%s4638_s19 + $0x158] sm:$0xff] %v2229_v1 }
 0x441   : > { %v3437_v54 = vpop.eup %3436  ;;  %v2228_v43 = vmul.f32 %v3435_v61, %v4621_v4 }
 0x442   : > { %v2231_v21 = vmul.f32 %v3437_v54, %v4623_v12 }
 0x443   : > { %2468 = vst [vmem:[%s4638_s19 + $0x150] sm:$0xff] %v2228_v43 }
 0x444   : > { %v3439_v39 = vpop.eup %3438  ;;  %2471 = vst [vmem:[%s4638_s19 + $0x168] sm:$0xff] %v2231_v21 }
 0x445   : > { %v3441_v10 = vpop.eup %3440  ;;  %v2230_v26 = vmul.f32 %v3439_v39, %v4627_v22 }
 0x446   : > { %v2233_v60 = vmul.f32 %v3441_v10, %v4629_v52 }
 0x447   : > { %2470 = vst [vmem:[%s4638_s19 + $0x160] sm:$0xff] %v2230_v26 }
 0x448   : > { %v3443_v48 = vpop.eup %3442  ;;  %2473 = vst [vmem:[%s4638_s19 + $0x178] sm:$0xff] %v2233_v60 }
 0x449   : > { %v2232_v41 = vmul.f32 %v3443_v48, %v4633_v0 }
 0x44b   : > { %2472 = vst [vmem:[%s4638_s19 + $0x170] sm:$0xff] %v2232_v41 }
 0x44c   : > { %s2480_s17 = sshll.u32 %s3618_s24, 11  ;;  %s2283_s3 = sshll.u32 %s4638_s19, 4  ;;  %s2284_s3 = int_to_ptr.vmem [resolvable:$true] %s2283_s3 }
 0x44d   : > { %s2266_s2 = scalar_lea.hbm %s4784_s6, %s2480_s17  ;;  %s3637_s20 = smov 2048  }
 0x44e   : > { %p4811_p1 = scmp.ne.s32.totalorder %s4801_s10, 0  ;;  %s3638_s8 = smov 4096  }
 0x44f   : > { %s3639_s11 = smov 16   ;;  %s3640_s15 = smov 128  }
 0x450   : > { %3158 = sst [smem:[#allocation13]] (%p4811_p1), %s3637_s20  ;;  %s3641_s24 = smov 8  }
 0x451   : > { %3159 = sst [smem:[#allocation13 + $0x1]] (%p4811_p1), %s3638_s8  ;;  %s3642_s0 = smov [#allocation12]  }
 0x452   : > { %3160 = sst [smem:[#allocation13 + $0x2]] (%p4811_p1), %s3639_s11  ;;  %s3643_s7 = smov 0  }
 0x453   : > { %3161 = sst [smem:[#allocation13 + $0x3]] (%p4811_p1), %s3640_s15 }
 0x454   : > { %3162 = sst [smem:[#allocation13 + $0x4]] (%p4811_p1), %s3640_s15 }
 0x455   : > { %3163 = sst [smem:[#allocation13 + $0x5]] (%p4811_p1), %s3641_s24 }
 0x456   : > { %3164 = dma.general (%p4811_p1), %s2284_s3, 6144, %s2266_s2, %s2252_s9, %s3642_s0, [#allocation13], %s3643_s7, 0  }
 0x457 PF: > { %s2311_s14 = sand.u32 1, %s3606_s21   ;;  %p4812_p6 = scmp.ne.s32.totalorder %s4794_s30, 0 }
 0x458   : > { %p4813_p10 = scmp.ge.s32.totalorder %s3626_s26, 2  ;;  %s2312_s27 = scalar_lea.sflag [#allocation5], %s2311_s14 }
 0x45a   : > { %p3181_p3 = pnand %p4813_p10, %p4812_p6 }
 0x45c   : > { %3601 = dma.done.wait (!%p3181_p3), %s2312_s27, 6144  }
 0x45d   : > { %3603 = vsyncadd (!%p3181_p3), %s2312_s27, 4294961152  ;;  %s26_s26 = sadd.s32 1, %s3626_s26   ;;  %s4814_s29 = sld [smem:[#allocation20_spill]] }
 0x45e   : > { %p23_p4 = scmp.ge.s32.totalorder %s26_s26, 4   ;;  %s4815_s10 = sld [smem:[#allocation19_spill]] }
 0x45f   : > { %s4816_s21 = smov %s3610_s22  ;;  %s4817_s22 = smov %s3614_s23 }
 0x460   : > { %s4819_s24 = smov %s3622_s25  ;;  %25 = sbr.rel (!%p23_p4) target bundleno = 13 (0xd), region = 121 }
 0x463   : > { %s4818_s23 = smov %s4814_s29 }
 0x464   : > { %s4820_s25 = smov %s4815_s10 }
 0x467   :  { %2317 = vsyncpa [#allocation4], 1 }
 0x468   :  { %2319 = vsyncpa [#allocation4 + $0x1], 1 }
 0x469   :  { %2320 = vsyncpa [#allocation7], 1 }
 0x46a   :  { %2322 = vsyncpa [#allocation7 + $0x1], 1 }
 0x46b   :  { %2323 = vsyncpa [#allocation10], 1 }
 0x46c   :  { %2324 = vsyncpa [#allocation5], 1 }
 0x46d   :  { %2326 = vsyncpa [#allocation5 + $0x1], 1 }

</bundles_post_ra>
